<compile_context>
chip_gen: v7x
topology: tpu7x:2x2x1
jax: 0.10.0
libtpu: 0.0.40
codegen_flags: <defaults>
</compile_context>

<pallas_src>
import functools

import jax
import jax.numpy as jnp
from jax import lax
from jax.experimental import pallas as pl
from jax.experimental.pallas import tpu as pltpu


def _cdiv(a, b):
    return -(-a // b)


def _round_up(a, b):
    return _cdiv(a, b) * b


def _tiled_bytes(shape, dtype=jnp.float32):
    """Approximate physical VMEM footprint of an (8,128)-tiled buffer."""
    s = [int(d) for d in shape]
    if len(s) >= 1:
        s[-1] = _round_up(s[-1], 128)
    if len(s) >= 2:
        s[-2] = _round_up(s[-2], 8)
    n = 1
    for d in s:
        n *= d
    return n * jnp.dtype(dtype).itemsize


def _vmem_capacity_bytes():
    # Generation-gated budget (v5e/v6e: 128 MiB, v7x: 64 MiB).
    try:
        return int(pltpu.get_tpu_info().vmem_capacity_bytes)
    except Exception:
        return 64 * 1024 * 1024      # conservative (v7x-sized) default


# ----------------------------------------------------------------------------
# Fused kernel: the whole conv stack for one block of independent columns.
# ----------------------------------------------------------------------------
def _fused_kernel(x_ref, *refs, cfgs, n_blk, negative_slope):
    n_layers = len(cfgs)
    wb_refs = refs[:2 * n_layers]
    out_ref = refs[2 * n_layers]
    act_bufs = refs[2 * n_layers + 1:]

    prev = None                      # previous layer's output value (rows, cin)
    for li, cfg in enumerate(cfgs):
        k, s, pad = cfg["k"], cfg["s"], cfg["pad"]
        h_in, h_out = cfg["h_in"], cfg["h_out"]
        cin, cout = cfg["cin"], cfg["cout"]
        rows_pad = cfg["rows_pad"]
        back = rows_pad - pad - h_in
        w_ref, b_ref = wb_refs[2 * li], wb_refs[2 * li + 1]
        buf = act_bufs[li]

        # Stage the zero-padded layer input in VMEM scratch (in-kernel "same"
        # padding: no HBM pad round trip).
        if pad > 0:
            buf[pl.ds(0, pad), :, :] = jnp.zeros((pad, n_blk, cin), jnp.float32)
        if back > 0:
            buf[pl.ds(pad + h_in, back), :, :] = jnp.zeros(
                (back, n_blk, cin), jnp.float32)
        if li == 0:
            buf[pl.ds(pad, h_in), :, :] = x_ref[...].astype(jnp.float32)
        else:
            buf[pl.ds(pad, h_in), :, :] = prev.reshape(h_in, n_blk, cin)

        rows = h_out * n_blk

        def tap(kk):                 # static k -> static (strided) ref read
            if s == 1:
                xk = buf[pl.ds(kk, h_out), :, :]
            else:
                xk = buf[pl.ds(kk, h_out, s), :, :]
            return xk.reshape(rows, cin)       # merge leading (non-lane) dims

        if not cfg["is_last"]:
            acc = jnp.zeros((rows, cout), jnp.float32)
            if cin == 1:
                # Depth-1 contraction: VPU broadcast multiply-add.
                for kk in range(k):
                    acc = acc + tap(kk) * w_ref[pl.ds(kk, 1), :]
            else:
                # Per-tap MXU dots, f32 accumulation (no lane-concat im2col).
                for kk in range(k):
                    acc = acc + jnp.dot(tap(kk),
                                        w_ref[pl.ds(kk * cin, cin), :],
                                        preferred_element_type=jnp.float32)
            acc = acc + b_ref[...]                       # (1, cout) broadcast
            acc = jnp.where(acc >= 0, acc, negative_slope * acc)  # LeakyReLU
            prev = acc
        else:
            # Final layer computed transposed so the ONLY HBM store of the
            # kernel is lane-dense: (cout, h_out * n_blk).
            acc = jnp.zeros((cout, rows), jnp.float32)
            for kk in range(k):
                acc = acc + jnp.dot(w_ref[:, pl.ds(kk * cin, cin)],  # (cout,cin)
                                    tap(kk).T,                       # (cin,rows)
                                    preferred_element_type=jnp.float32)
            acc = acc + b_ref[...]                       # (cout, 1) broadcast
            out_ref[...] = acc.reshape(1, cout, rows)


# ----------------------------------------------------------------------------
# Forward pass wrapper: one pallas_call for the whole discriminator stack.
# ----------------------------------------------------------------------------
def forward(x, conv_params, out_conv_params, *, period, negative_slope=0.1):
    """x: (B, in_channels, T) -> (B, out_channels * H_final * period)."""
    b, c_in, t = x.shape
    if t % period != 0:
        n_pad = period - t % period
        x = jnp.pad(x, ((0, 0), (0, 0), (0, n_pad)), mode="reflect")
        t += n_pad
    h0, w_cols = t // period, period
    n_real = b * w_cols
    n_cols = _round_up(n_real, 8)

    # (B, C, T) -> (B, C, H, W) -> (H, B*W, C); pad columns (width-1 kernels:
    # padded columns never mix with real ones, sliced off at the end).
    xk = jnp.transpose(x.reshape(b, c_in, h0, w_cols), (2, 0, 3, 1))
    xk = xk.reshape(h0, n_real, c_in)
    if n_cols != n_real:
        xk = jnp.pad(xk, ((0, 0), (0, n_cols - n_real), (0, 0)))
    xk = xk.astype(jnp.float32)

    # ---- static layer schedule ------------------------------------------
    all_params = list(conv_params) + [out_conv_params]
    cfgs = []
    h_in = h0
    for li, p in enumerate(all_params):
        k, cin, cout = p["w"].shape
        s, pad = int(p["stride"]), int(p["padding"])
        h_out = (h_in + 2 * pad - k) // s + 1
        rows_needed = s * (h_out - 1) + k
        rows_pad = pad + h_in + max(0, rows_needed - pad - h_in)
        cfgs.append(dict(k=int(k), s=s, pad=pad, h_in=int(h_in),
                         h_out=int(h_out), cin=int(cin), cout=int(cout),
                         rows_pad=int(rows_pad),
                         is_last=(li == len(all_params) - 1)))
        h_in = h_out
    h_f, cout_f = cfgs[-1]["h_out"], cfgs[-1]["cout"]

    # ---- column blocking: grid over independent (batch x width) columns ---
    # Columns are fully independent, so this axis is "parallel" (v7x megacore
    # shards it whenever num_blocks >= 2, e.g. larger batch * period).
    n_blk = n_cols
    if n_cols > 64:
        for cand in (64, 32, 16, 8):
            if n_cols % cand == 0:
                n_blk = cand
                break
    num_blocks = n_cols // n_blk

    # ---- flatten weights (weight_norm is identity at forward time) -------
    w_list, b_list = [], []
    for cfg, p in zip(cfgs, all_params):
        k, cin, cout = p["w"].shape
        w2 = p["w"].reshape(k * cin, cout).astype(jnp.float32)
        if cfg["is_last"]:
            w_list.append(jnp.transpose(w2))                     # (cout, K*cin)
            b_list.append(p["b"].reshape(cout, 1).astype(jnp.float32))
        else:
            w_list.append(w2)                                    # (K*cin, cout)
            b_list.append(p["b"].reshape(1, cout).astype(jnp.float32))

    # ---- VMEM budget (generation-gated) -----------------------------------
    scratch_shapes = [pltpu.VMEM((c["rows_pad"], n_blk, c["cin"]), jnp.float32)
                      for c in cfgs]
    block_bytes = _tiled_bytes((h0, n_blk, c_in))
    block_bytes += sum(_tiled_bytes(w.shape) + _tiled_bytes(bb.shape)
                       for w, bb in zip(w_list, b_list))
    block_bytes += _tiled_bytes((1, cout_f, h_f * n_blk))
    scratch_bytes = sum(_tiled_bytes((c["rows_pad"], n_blk, c["cin"]))
                        for c in cfgs)
    needed = 2 * block_bytes + scratch_bytes     # pipeline double-buffers blocks
    vmem_cap = _vmem_capacity_bytes()
    vmem_limit = int(min((vmem_cap * 3) // 8,          # <=24 MiB v7x, <=48 MiB v6e
                         max(8 * 1024 * 1024, 2 * needed)))
    if needed > vmem_limit:
        # TODO(synk): tile the fused pipeline over H (receptive-field halos)
        # for very long inputs instead of holding full-H activations in VMEM.
        raise ValueError(
            f"fused working set {needed} B exceeds VMEM budget {vmem_limit} B")

    in_specs = [pl.BlockSpec((h0, n_blk, c_in), lambda j: (0, j, 0))]
    wb_args = []
    for w2, b2 in zip(w_list, b_list):
        in_specs.append(pl.BlockSpec(w2.shape, lambda j: (0, 0)))
        in_specs.append(pl.BlockSpec(b2.shape, lambda j: (0, 0)))
        wb_args.extend([w2, b2])

    kern = functools.partial(_fused_kernel, cfgs=tuple(cfgs), n_blk=n_blk,
                             negative_slope=negative_slope)

    y = pl.pallas_call(
        kern,
        out_shape=jax.ShapeDtypeStruct((num_blocks, cout_f, h_f * n_blk),
                                       jnp.float32),
        grid=(num_blocks,),
        in_specs=in_specs,
        out_specs=pl.BlockSpec((1, cout_f, h_f * n_blk), lambda j: (j, 0, 0)),
        scratch_shapes=scratch_shapes,
        compiler_params=pltpu.CompilerParams(
            dimension_semantics=("parallel",),
            vmem_limit_bytes=vmem_limit),
    )(xk, *wb_args)

    # (blocks, cout, h_f, n_blk) -> (h_f, cols, cout) -> (B, cout, h_f, W) flat
    y = y.reshape(num_blocks, cout_f, h_f, n_blk)
    y = jnp.transpose(y, (2, 0, 3, 1)).reshape(h_f, n_cols, cout_f)[:, :n_real, :]
    y = y.reshape(h_f, b, w_cols, cout_f)
    return jnp.transpose(y, (1, 3, 0, 2)).reshape(b, -1)


# ----------------------------------------------------------------------------
# Parameter init (deterministic, synthetic; weight_norm folded into weights)
# ----------------------------------------------------------------------------
def init_params(key, *, in_channels, out_channels, kernel_sizes, channels,
                downsample_scales, max_downsample_channels):
    conv_params = []
    in_chs, out_chs = in_channels, channels
    for ds in downsample_scales:
        key, kw, kb = jax.random.split(key, 3)
        w = 0.1 * jax.random.normal(kw, (kernel_sizes[0], in_chs, out_chs),
                                    jnp.float32)
        b = 0.1 * jax.random.normal(kb, (out_chs,), jnp.float32)
        conv_params.append(dict(w=w, b=b, stride=int(ds),
                                padding=(kernel_sizes[0] - 1) // 2))
        in_chs = out_chs
        out_chs = min(out_chs * 4, max_downsample_channels)
    key, kw, kb = jax.random.split(key, 3)
    kf = kernel_sizes[1] - 1
    w = 0.1 * jax.random.normal(kw, (kf, in_chs, out_channels), jnp.float32)
    b = 0.1 * jax.random.normal(kb, (out_channels,), jnp.float32)
    out_conv = dict(w=w, b=b, stride=1, padding=(kernel_sizes[1] - 1) // 2)
    return conv_params, out_conv


# ----------------------------------------------------------------------------
# Pure-JAX (XLA conv) reference for validation
# ----------------------------------------------------------------------------
def reference_forward(x, conv_params, out_conv_params, *, period,
                      negative_slope=0.1):
    b, c, t = x.shape
    if t % period != 0:
        n_pad = period - t % period
        x = jnp.pad(x, ((0, 0), (0, 0), (0, n_pad)), mode="reflect")
        t += n_pad
    x4 = x.reshape(b, c, t // period, period)

    def conv2d(x4, p, act):
        w = jnp.transpose(p["w"], (2, 1, 0))[..., None]   # (O, I, K, 1)
        y = lax.conv_general_dilated(
            x4, w, window_strides=(p["stride"], 1),
            padding=((p["padding"], p["padding"]), (0, 0)),
            dimension_numbers=("NCHW", "OIHW", "NCHW"),
            precision=lax.Precision.HIGHEST)
        y = y + p["b"][None, :, None, None]
        if act:
            y = jnp.where(y >= 0, y, negative_slope * y)
        return y

    for p in conv_params:
        x4 = conv2d(x4, p, True)
    x4 = conv2d(x4, out_conv_params, False)
    return x4.reshape(b, -1)


if __name__ == "__main__":
    # Small config consistent with the module's structure.
    period = 3
    kernel_sizes = [5, 3]
    channels = 8
    downsample_scales = [3, 3, 3, 3, 1]
    max_downsample_channels = 32
    in_channels = 1
    out_channels = 1
    B, T = 2, 301     # T % period != 0 exercises the reflect-pad path.

    key = jax.random.PRNGKey(0)
    key, kx, kp = jax.random.split(key, 3)
    x = jax.random.normal(kx, (B, in_channels, T), jnp.float32)
    conv_params, out_conv_params = init_params(
        kp, in_channels=in_channels, out_channels=out_channels,
        kernel_sizes=kernel_sizes, channels=channels,
        downsample_scales=downsample_scales,
        max_downsample_channels=max_downsample_channels)

    out = jax.block_until_ready(
        forward(x, conv_params, out_conv_params, period=period))

    ref = reference_forward(x, conv_params, out_conv_params, period=period)
    assert out.shape == ref.shape, (out.shape, ref.shape)
    err = float(jnp.max(jnp.abs(out - ref)))
    scale = float(jnp.max(jnp.abs(ref))) + 1e-6
    assert err <= 2e-2 * scale + 1e-3, (err, scale)
    print("KERNEL_OK")
</pallas_src>

<mosaic_0001>
module attributes {stable_mosaic.version = 11 : i64} {
  func.func @_fused_kernel(%arg0: i32, %arg1: memref<101x8x1xf32, #tpu.memory_space<vmem>>, %arg2: memref<5x8xf32, #tpu.memory_space<vmem>>, %arg3: memref<1x8xf32, #tpu.memory_space<vmem>>, %arg4: memref<40x32xf32, #tpu.memory_space<vmem>>, %arg5: memref<1x32xf32, #tpu.memory_space<vmem>>, %arg6: memref<160x32xf32, #tpu.memory_space<vmem>>, %arg7: memref<1x32xf32, #tpu.memory_space<vmem>>, %arg8: memref<160x32xf32, #tpu.memory_space<vmem>>, %arg9: memref<1x32xf32, #tpu.memory_space<vmem>>, %arg10: memref<160x32xf32, #tpu.memory_space<vmem>>, %arg11: memref<1x32xf32, #tpu.memory_space<vmem>>, %arg12: memref<1x64xf32, #tpu.memory_space<vmem>>, %arg13: memref<1x1xf32, #tpu.memory_space<vmem>>, %arg14: memref<1x1x24xf32, #tpu.memory_space<vmem>>, %arg15: memref<104x8x1xf32, #tpu.memory_space<vmem>>, %arg16: memref<38x8x8xf32, #tpu.memory_space<vmem>>, %arg17: memref<14x8x32xf32, #tpu.memory_space<vmem>>, %arg18: memref<8x8x32xf32, #tpu.memory_space<vmem>>, %arg19: memref<6x8x32xf32, #tpu.memory_space<vmem>>, %arg20: memref<4x8x32xf32, #tpu.memory_space<vmem>>) attributes {dimension_semantics = [#tpu.dimension_semantics<parallel>], iteration_bounds = array<i64: 1>, scalar_prefetch = 0 : i64, scratch_operands = 6 : i64, tpu.core_type = #tpu.core_type<tc>, window_params = [{transform_indices = @transform_0, window_bounds = array<i64: 101, 8, 1>}, {pipeline_mode = #tpu.pipeline_mode<synchronous>, transform_indices = @transform_1, window_bounds = array<i64: 5, 8>}, {pipeline_mode = #tpu.pipeline_mode<synchronous>, transform_indices = @transform_2, window_bounds = array<i64: 1, 8>}, {pipeline_mode = #tpu.pipeline_mode<synchronous>, transform_indices = @transform_3, window_bounds = array<i64: 40, 32>}, {pipeline_mode = #tpu.pipeline_mode<synchronous>, transform_indices = @transform_4, window_bounds = array<i64: 1, 32>}, {pipeline_mode = #tpu.pipeline_mode<synchronous>, transform_indices = @transform_5, window_bounds = array<i64: 160, 32>}, {pipeline_mode = #tpu.pipeline_mode<synchronous>, transform_indices = @transform_6, window_bounds = array<i64: 1, 32>}, {pipeline_mode = #tpu.pipeline_mode<synchronous>, transform_indices = @transform_7, window_bounds = array<i64: 160, 32>}, {pipeline_mode = #tpu.pipeline_mode<synchronous>, transform_indices = @transform_8, window_bounds = array<i64: 1, 32>}, {pipeline_mode = #tpu.pipeline_mode<synchronous>, transform_indices = @transform_9, window_bounds = array<i64: 160, 32>}, {pipeline_mode = #tpu.pipeline_mode<synchronous>, transform_indices = @transform_10, window_bounds = array<i64: 1, 32>}, {pipeline_mode = #tpu.pipeline_mode<synchronous>, transform_indices = @transform_11, window_bounds = array<i64: 1, 64>}, {pipeline_mode = #tpu.pipeline_mode<synchronous>, transform_indices = @transform_12, window_bounds = array<i64: 1, 1>}, {transform_indices = @transform_13, window_bounds = array<i64: 1, 1, 24>}]} {
    %cst = arith.constant 0.000000e+00 : f32
    %0 = vector.broadcast %cst : f32 to vector<2x8x1xf32>
    %c0 = arith.constant 0 : index
    %c0_0 = arith.constant 0 : index
    %c0_1 = arith.constant 0 : index
    %1 = vector.load %arg15[%c0, %c0_0, %c0_1] : memref<104x8x1xf32, #tpu.memory_space<vmem>>, vector<2x8x1xf32>
    tpu.vector_store %arg15[%c0, %c0_0, %c0_1], %0 {strides = array<i32>} : memref<104x8x1xf32, #tpu.memory_space<vmem>>, vector<2x8x1xf32>,
    %cst_2 = arith.constant 0.000000e+00 : f32
    %2 = vector.broadcast %cst_2 : f32 to vector<1x8x1xf32>
    %c103 = arith.constant 103 : index
    %c0_3 = arith.constant 0 : index
    %c0_4 = arith.constant 0 : index
    %3 = vector.load %arg15[%c103, %c0_3, %c0_4] : memref<104x8x1xf32, #tpu.memory_space<vmem>>, vector<1x8x1xf32>
    tpu.vector_store %arg15[%c103, %c0_3, %c0_4], %2 {strides = array<i32>} : memref<104x8x1xf32, #tpu.memory_space<vmem>>, vector<1x8x1xf32>,
    %c0_5 = arith.constant 0 : index
    %c0_6 = arith.constant 0 : index
    %c0_7 = arith.constant 0 : index
    %4 = vector.load %arg1[%c0_5, %c0_6, %c0_7] : memref<101x8x1xf32, #tpu.memory_space<vmem>>, vector<101x8x1xf32>
    %c2 = arith.constant 2 : index
    %c0_8 = arith.constant 0 : index
    %c0_9 = arith.constant 0 : index
    %5 = vector.load %arg15[%c2, %c0_8, %c0_9] : memref<104x8x1xf32, #tpu.memory_space<vmem>>, vector<101x8x1xf32>
    tpu.vector_store %arg15[%c2, %c0_8, %c0_9], %4 {strides = array<i32>} : memref<104x8x1xf32, #tpu.memory_space<vmem>>, vector<101x8x1xf32>,
    %cst_10 = arith.constant 0.000000e+00 : f32
    %6 = vector.broadcast %cst_10 : f32 to vector<272x8xf32>
    %c0_11 = arith.constant 0 : index
    %c0_12 = arith.constant 0 : index
    %c0_13 = arith.constant 0 : index
    %7 = tpu.strided_load %arg15[%c0_11, %c0_12, %c0_13] {strides = array<i32: 3, 1, 1>} : memref<104x8x1xf32, #tpu.memory_space<vmem>>, vector<34x8x1xf32>
    %8 = vector.shape_cast %7 : vector<34x8x1xf32> to vector<272x1xf32>
    %c0_14 = arith.constant 0 : index
    %c0_15 = arith.constant 0 : index
    %9 = vector.load %arg2[%c0_14, %c0_15] : memref<5x8xf32, #tpu.memory_space<vmem>>, vector<1x8xf32>
    %10 = vector.broadcast %8 : vector<272x1xf32> to vector<272x8xf32>
    %11 = vector.broadcast %9 : vector<1x8xf32> to vector<272x8xf32>
    %12 = arith.mulf %10, %11 : vector<272x8xf32>
    %13 = arith.addf %6, %12 : vector<272x8xf32>
    %c1 = arith.constant 1 : index
    %c0_16 = arith.constant 0 : index
    %c0_17 = arith.constant 0 : index
    %14 = tpu.strided_load %arg15[%c1, %c0_16, %c0_17] {strides = array<i32: 3, 1, 1>} : memref<104x8x1xf32, #tpu.memory_space<vmem>>, vector<34x8x1xf32>
    %15 = vector.shape_cast %14 : vector<34x8x1xf32> to vector<272x1xf32>
    %c1_18 = arith.constant 1 : index
    %c0_19 = arith.constant 0 : index
    %16 = vector.load %arg2[%c1_18, %c0_19] : memref<5x8xf32, #tpu.memory_space<vmem>>, vector<1x8xf32>
    %17 = vector.broadcast %15 : vector<272x1xf32> to vector<272x8xf32>
    %18 = vector.broadcast %16 : vector<1x8xf32> to vector<272x8xf32>
    %19 = arith.mulf %17, %18 : vector<272x8xf32>
    %20 = arith.addf %13, %19 : vector<272x8xf32>
    %c2_20 = arith.constant 2 : index
    %c0_21 = arith.constant 0 : index
    %c0_22 = arith.constant 0 : index
    %21 = tpu.strided_load %arg15[%c2_20, %c0_21, %c0_22] {strides = array<i32: 3, 1, 1>} : memref<104x8x1xf32, #tpu.memory_space<vmem>>, vector<34x8x1xf32>
    %22 = vector.shape_cast %21 : vector<34x8x1xf32> to vector<272x1xf32>
    %c2_23 = arith.constant 2 : index
    %c0_24 = arith.constant 0 : index
    %23 = vector.load %arg2[%c2_23, %c0_24] : memref<5x8xf32, #tpu.memory_space<vmem>>, vector<1x8xf32>
    %24 = vector.broadcast %22 : vector<272x1xf32> to vector<272x8xf32>
    %25 = vector.broadcast %23 : vector<1x8xf32> to vector<272x8xf32>
    %26 = arith.mulf %24, %25 : vector<272x8xf32>
    %27 = arith.addf %20, %26 : vector<272x8xf32>
    %c3 = arith.constant 3 : index
    %c0_25 = arith.constant 0 : index
    %c0_26 = arith.constant 0 : index
    %28 = tpu.strided_load %arg15[%c3, %c0_25, %c0_26] {strides = array<i32: 3, 1, 1>} : memref<104x8x1xf32, #tpu.memory_space<vmem>>, vector<34x8x1xf32>
    %29 = vector.shape_cast %28 : vector<34x8x1xf32> to vector<272x1xf32>
    %c3_27 = arith.constant 3 : index
    %c0_28 = arith.constant 0 : index
    %30 = vector.load %arg2[%c3_27, %c0_28] : memref<5x8xf32, #tpu.memory_space<vmem>>, vector<1x8xf32>
    %31 = vector.broadcast %29 : vector<272x1xf32> to vector<272x8xf32>
    %32 = vector.broadcast %30 : vector<1x8xf32> to vector<272x8xf32>
    %33 = arith.mulf %31, %32 : vector<272x8xf32>
    %34 = arith.addf %27, %33 : vector<272x8xf32>
    %c4 = arith.constant 4 : index
    %c0_29 = arith.constant 0 : index
    %c0_30 = arith.constant 0 : index
    %35 = tpu.strided_load %arg15[%c4, %c0_29, %c0_30] {strides = array<i32: 3, 1, 1>} : memref<104x8x1xf32, #tpu.memory_space<vmem>>, vector<34x8x1xf32>
    %36 = vector.shape_cast %35 : vector<34x8x1xf32> to vector<272x1xf32>
    %c4_31 = arith.constant 4 : index
    %c0_32 = arith.constant 0 : index
    %37 = vector.load %arg2[%c4_31, %c0_32] : memref<5x8xf32, #tpu.memory_space<vmem>>, vector<1x8xf32>
    %38 = vector.broadcast %36 : vector<272x1xf32> to vector<272x8xf32>
    %39 = vector.broadcast %37 : vector<1x8xf32> to vector<272x8xf32>
    %40 = arith.mulf %38, %39 : vector<272x8xf32>
    %41 = arith.addf %34, %40 : vector<272x8xf32>
    %c0_33 = arith.constant 0 : index
    %c0_34 = arith.constant 0 : index
    %42 = vector.load %arg3[%c0_33, %c0_34] : memref<1x8xf32, #tpu.memory_space<vmem>>, vector<1x8xf32>
    %43 = vector.broadcast %42 : vector<1x8xf32> to vector<272x8xf32>
    %44 = arith.addf %41, %43 : vector<272x8xf32>
    %cst_35 = arith.constant 0.000000e+00 : f32
    %45 = vector.broadcast %cst_35 : f32 to vector<272x8xf32>
    %46 = arith.cmpf oge, %44, %45 : vector<272x8xf32>
    %cst_36 = arith.constant 1.000000e-01 : f32
    %47 = vector.broadcast %cst_36 : f32 to vector<272x8xf32>
    %48 = arith.mulf %47, %44 : vector<272x8xf32>
    %49 = arith.select %46, %44, %48 : vector<272x8xi1>, vector<272x8xf32>
    %cst_37 = arith.constant 0.000000e+00 : f32
    %50 = vector.broadcast %cst_37 : f32 to vector<2x8x8xf32>
    %c0_38 = arith.constant 0 : index
    %c0_39 = arith.constant 0 : index
    %c0_40 = arith.constant 0 : index
    %51 = vector.load %arg16[%c0_38, %c0_39, %c0_40] : memref<38x8x8xf32, #tpu.memory_space<vmem>>, vector<2x8x8xf32>
    tpu.vector_store %arg16[%c0_38, %c0_39, %c0_40], %50 {strides = array<i32>} : memref<38x8x8xf32, #tpu.memory_space<vmem>>, vector<2x8x8xf32>,
    %cst_41 = arith.constant 0.000000e+00 : f32
    %52 = vector.broadcast %cst_41 : f32 to vector<2x8x8xf32>
    %c36 = arith.constant 36 : index
    %c0_42 = arith.constant 0 : index
    %c0_43 = arith.constant 0 : index
    %53 = vector.load %arg16[%c36, %c0_42, %c0_43] : memref<38x8x8xf32, #tpu.memory_space<vmem>>, vector<2x8x8xf32>
    tpu.vector_store %arg16[%c36, %c0_42, %c0_43], %52 {strides = array<i32>} : memref<38x8x8xf32, #tpu.memory_space<vmem>>, vector<2x8x8xf32>,
    %54 = vector.shape_cast %49 : vector<272x8xf32> to vector<34x8x8xf32>
    %c2_44 = arith.constant 2 : index
    %c0_45 = arith.constant 0 : index
    %c0_46 = arith.constant 0 : index
    %55 = vector.load %arg16[%c2_44, %c0_45, %c0_46] : memref<38x8x8xf32, #tpu.memory_space<vmem>>, vector<34x8x8xf32>
    tpu.vector_store %arg16[%c2_44, %c0_45, %c0_46], %54 {strides = array<i32>} : memref<38x8x8xf32, #tpu.memory_space<vmem>>, vector<34x8x8xf32>,
    %cst_47 = arith.constant 0.000000e+00 : f32
    %56 = vector.broadcast %cst_47 : f32 to vector<96x32xf32>
    %c0_48 = arith.constant 0 : index
    %c0_49 = arith.constant 0 : index
    %c0_50 = arith.constant 0 : index
    %57 = tpu.strided_load %arg16[%c0_48, %c0_49, %c0_50] {strides = array<i32: 3, 1, 1>} : memref<38x8x8xf32, #tpu.memory_space<vmem>>, vector<12x8x8xf32>
    %58 = vector.shape_cast %57 : vector<12x8x8xf32> to vector<96x8xf32>
    %c0_51 = arith.constant 0 : index
    %c0_52 = arith.constant 0 : index
    %59 = vector.load %arg4[%c0_51, %c0_52] : memref<40x32xf32, #tpu.memory_space<vmem>>, vector<8x32xf32>
    %cst_53 = arith.constant dense<0.000000e+00> : vector<96x32xf32>
    %60 = tpu.matmul %58, %59, %cst_53 {dimension_numbers = #tpu.dot_dimension_numbers<[1], [0], [0], [1], [0, 0, 1, 1], [], []>} : vector<96x8xf32>, vector<8x32xf32>, vector<96x32xf32> -> vector<96x32xf32>
    %61 = arith.addf %56, %60 : vector<96x32xf32>
    %c1_54 = arith.constant 1 : index
    %c0_55 = arith.constant 0 : index
    %c0_56 = arith.constant 0 : index
    %62 = tpu.strided_load %arg16[%c1_54, %c0_55, %c0_56] {strides = array<i32: 3, 1, 1>} : memref<38x8x8xf32, #tpu.memory_space<vmem>>, vector<12x8x8xf32>
    %63 = vector.shape_cast %62 : vector<12x8x8xf32> to vector<96x8xf32>
    %c8 = arith.constant 8 : index
    %c0_57 = arith.constant 0 : index
    %64 = vector.load %arg4[%c8, %c0_57] : memref<40x32xf32, #tpu.memory_space<vmem>>, vector<8x32xf32>
    %cst_58 = arith.constant dense<0.000000e+00> : vector<96x32xf32>
    %65 = tpu.matmul %63, %64, %cst_58 {dimension_numbers = #tpu.dot_dimension_numbers<[1], [0], [0], [1], [0, 0, 1, 1], [], []>} : vector<96x8xf32>, vector<8x32xf32>, vector<96x32xf32> -> vector<96x32xf32>
    %66 = arith.addf %61, %65 : vector<96x32xf32>
    %c2_59 = arith.constant 2 : index
    %c0_60 = arith.constant 0 : index
    %c0_61 = arith.constant 0 : index
    %67 = tpu.strided_load %arg16[%c2_59, %c0_60, %c0_61] {strides = array<i32: 3, 1, 1>} : memref<38x8x8xf32, #tpu.memory_space<vmem>>, vector<12x8x8xf32>
    %68 = vector.shape_cast %67 : vector<12x8x8xf32> to vector<96x8xf32>
    %c16 = arith.constant 16 : index
    %c0_62 = arith.constant 0 : index
    %69 = vector.load %arg4[%c16, %c0_62] : memref<40x32xf32, #tpu.memory_space<vmem>>, vector<8x32xf32>
    %cst_63 = arith.constant dense<0.000000e+00> : vector<96x32xf32>
    %70 = tpu.matmul %68, %69, %cst_63 {dimension_numbers = #tpu.dot_dimension_numbers<[1], [0], [0], [1], [0, 0, 1, 1], [], []>} : vector<96x8xf32>, vector<8x32xf32>, vector<96x32xf32> -> vector<96x32xf32>
    %71 = arith.addf %66, %70 : vector<96x32xf32>
    %c3_64 = arith.constant 3 : index
    %c0_65 = arith.constant 0 : index
    %c0_66 = arith.constant 0 : index
    %72 = tpu.strided_load %arg16[%c3_64, %c0_65, %c0_66] {strides = array<i32: 3, 1, 1>} : memref<38x8x8xf32, #tpu.memory_space<vmem>>, vector<12x8x8xf32>
    %73 = vector.shape_cast %72 : vector<12x8x8xf32> to vector<96x8xf32>
    %c24 = arith.constant 24 : index
    %c0_67 = arith.constant 0 : index
    %74 = vector.load %arg4[%c24, %c0_67] : memref<40x32xf32, #tpu.memory_space<vmem>>, vector<8x32xf32>
    %cst_68 = arith.constant dense<0.000000e+00> : vector<96x32xf32>
    %75 = tpu.matmul %73, %74, %cst_68 {dimension_numbers = #tpu.dot_dimension_numbers<[1], [0], [0], [1], [0, 0, 1, 1], [], []>} : vector<96x8xf32>, vector<8x32xf32>, vector<96x32xf32> -> vector<96x32xf32>
    %76 = arith.addf %71, %75 : vector<96x32xf32>
    %c4_69 = arith.constant 4 : index
    %c0_70 = arith.constant 0 : index
    %c0_71 = arith.constant 0 : index
    %77 = tpu.strided_load %arg16[%c4_69, %c0_70, %c0_71] {strides = array<i32: 3, 1, 1>} : memref<38x8x8xf32, #tpu.memory_space<vmem>>, vector<12x8x8xf32>
    %78 = vector.shape_cast %77 : vector<12x8x8xf32> to vector<96x8xf32>
    %c32 = arith.constant 32 : index
    %c0_72 = arith.constant 0 : index
    %79 = vector.load %arg4[%c32, %c0_72] : memref<40x32xf32, #tpu.memory_space<vmem>>, vector<8x32xf32>
    %cst_73 = arith.constant dense<0.000000e+00> : vector<96x32xf32>
    %80 = tpu.matmul %78, %79, %cst_73 {dimension_numbers = #tpu.dot_dimension_numbers<[1], [0], [0], [1], [0, 0, 1, 1], [], []>} : vector<96x8xf32>, vector<8x32xf32>, vector<96x32xf32> -> vector<96x32xf32>
    %81 = arith.addf %76, %80 : vector<96x32xf32>
    %c0_74 = arith.constant 0 : index
    %c0_75 = arith.constant 0 : index
    %82 = vector.load %arg5[%c0_74, %c0_75] : memref<1x32xf32, #tpu.memory_space<vmem>>, vector<1x32xf32>
    %83 = vector.broadcast %82 : vector<1x32xf32> to vector<96x32xf32>
    %84 = arith.addf %81, %83 : vector<96x32xf32>
    %cst_76 = arith.constant 0.000000e+00 : f32
    %85 = vector.broadcast %cst_76 : f32 to vector<96x32xf32>
    %86 = arith.cmpf oge, %84, %85 : vector<96x32xf32>
    %cst_77 = arith.constant 1.000000e-01 : f32
    %87 = vector.broadcast %cst_77 : f32 to vector<96x32xf32>
    %88 = arith.mulf %87, %84 : vector<96x32xf32>
    %89 = arith.select %86, %84, %88 : vector<96x32xi1>, vector<96x32xf32>
    %cst_78 = arith.constant 0.000000e+00 : f32
    %90 = vector.broadcast %cst_78 : f32 to vector<2x8x32xf32>
    %c0_79 = arith.constant 0 : index
    %c0_80 = arith.constant 0 : index
    %c0_81 = arith.constant 0 : index
    %91 = vector.load %arg17[%c0_79, %c0_80, %c0_81] : memref<14x8x32xf32, #tpu.memory_space<vmem>>, vector<2x8x32xf32>
    tpu.vector_store %arg17[%c0_79, %c0_80, %c0_81], %90 {strides = array<i32>} : memref<14x8x32xf32, #tpu.memory_space<vmem>>, vector<2x8x32xf32>,
    %92 = vector.shape_cast %89 : vector<96x32xf32> to vector<12x8x32xf32>
    %c2_82 = arith.constant 2 : index
    %c0_83 = arith.constant 0 : index
    %c0_84 = arith.constant 0 : index
    %93 = vector.load %arg17[%c2_82, %c0_83, %c0_84] : memref<14x8x32xf32, #tpu.memory_space<vmem>>, vector<12x8x32xf32>
    tpu.vector_store %arg17[%c2_82, %c0_83, %c0_84], %92 {strides = array<i32>} : memref<14x8x32xf32, #tpu.memory_space<vmem>>, vector<12x8x32xf32>,
    %cst_85 = arith.constant 0.000000e+00 : f32
    %94 = vector.broadcast %cst_85 : f32 to vector<32x32xf32>
    %c0_86 = arith.constant 0 : index
    %c0_87 = arith.constant 0 : index
    %c0_88 = arith.constant 0 : index
    %95 = tpu.strided_load %arg17[%c0_86, %c0_87, %c0_88] {strides = array<i32: 3, 1, 1>} : memref<14x8x32xf32, #tpu.memory_space<vmem>>, vector<4x8x32xf32>
    %96 = vector.shape_cast %95 : vector<4x8x32xf32> to vector<32x32xf32>
    %c0_89 = arith.constant 0 : index
    %c0_90 = arith.constant 0 : index
    %97 = vector.load %arg6[%c0_89, %c0_90] : memref<160x32xf32, #tpu.memory_space<vmem>>, vector<32x32xf32>
    %cst_91 = arith.constant dense<0.000000e+00> : vector<32x32xf32>
    %98 = tpu.matmul %96, %97, %cst_91 {dimension_numbers = #tpu.dot_dimension_numbers<[1], [0], [0], [1], [0, 0, 1, 1], [], []>} : vector<32x32xf32>, vector<32x32xf32>, vector<32x32xf32> -> vector<32x32xf32>
    %99 = arith.addf %94, %98 : vector<32x32xf32>
    %c1_92 = arith.constant 1 : index
    %c0_93 = arith.constant 0 : index
    %c0_94 = arith.constant 0 : index
    %100 = tpu.strided_load %arg17[%c1_92, %c0_93, %c0_94] {strides = array<i32: 3, 1, 1>} : memref<14x8x32xf32, #tpu.memory_space<vmem>>, vector<4x8x32xf32>
    %101 = vector.shape_cast %100 : vector<4x8x32xf32> to vector<32x32xf32>
    %c32_95 = arith.constant 32 : index
    %c0_96 = arith.constant 0 : index
    %102 = vector.load %arg6[%c32_95, %c0_96] : memref<160x32xf32, #tpu.memory_space<vmem>>, vector<32x32xf32>
    %cst_97 = arith.constant dense<0.000000e+00> : vector<32x32xf32>
    %103 = tpu.matmul %101, %102, %cst_97 {dimension_numbers = #tpu.dot_dimension_numbers<[1], [0], [0], [1], [0, 0, 1, 1], [], []>} : vector<32x32xf32>, vector<32x32xf32>, vector<32x32xf32> -> vector<32x32xf32>
    %104 = arith.addf %99, %103 : vector<32x32xf32>
    %c2_98 = arith.constant 2 : index
    %c0_99 = arith.constant 0 : index
    %c0_100 = arith.constant 0 : index
    %105 = tpu.strided_load %arg17[%c2_98, %c0_99, %c0_100] {strides = array<i32: 3, 1, 1>} : memref<14x8x32xf32, #tpu.memory_space<vmem>>, vector<4x8x32xf32>
    %106 = vector.shape_cast %105 : vector<4x8x32xf32> to vector<32x32xf32>
    %c64 = arith.constant 64 : index
    %c0_101 = arith.constant 0 : index
    %107 = vector.load %arg6[%c64, %c0_101] : memref<160x32xf32, #tpu.memory_space<vmem>>, vector<32x32xf32>
    %cst_102 = arith.constant dense<0.000000e+00> : vector<32x32xf32>
    %108 = tpu.matmul %106, %107, %cst_102 {dimension_numbers = #tpu.dot_dimension_numbers<[1], [0], [0], [1], [0, 0, 1, 1], [], []>} : vector<32x32xf32>, vector<32x32xf32>, vector<32x32xf32> -> vector<32x32xf32>
    %109 = arith.addf %104, %108 : vector<32x32xf32>
    %c3_103 = arith.constant 3 : index
    %c0_104 = arith.constant 0 : index
    %c0_105 = arith.constant 0 : index
    %110 = tpu.strided_load %arg17[%c3_103, %c0_104, %c0_105] {strides = array<i32: 3, 1, 1>} : memref<14x8x32xf32, #tpu.memory_space<vmem>>, vector<4x8x32xf32>
    %111 = vector.shape_cast %110 : vector<4x8x32xf32> to vector<32x32xf32>
    %c96 = arith.constant 96 : index
    %c0_106 = arith.constant 0 : index
    %112 = vector.load %arg6[%c96, %c0_106] : memref<160x32xf32, #tpu.memory_space<vmem>>, vector<32x32xf32>
    %cst_107 = arith.constant dense<0.000000e+00> : vector<32x32xf32>
    %113 = tpu.matmul %111, %112, %cst_107 {dimension_numbers = #tpu.dot_dimension_numbers<[1], [0], [0], [1], [0, 0, 1, 1], [], []>} : vector<32x32xf32>, vector<32x32xf32>, vector<32x32xf32> -> vector<32x32xf32>
    %114 = arith.addf %109, %113 : vector<32x32xf32>
    %c4_108 = arith.constant 4 : index
    %c0_109 = arith.constant 0 : index
    %c0_110 = arith.constant 0 : index
    %115 = tpu.strided_load %arg17[%c4_108, %c0_109, %c0_110] {strides = array<i32: 3, 1, 1>} : memref<14x8x32xf32, #tpu.memory_space<vmem>>, vector<4x8x32xf32>
    %116 = vector.shape_cast %115 : vector<4x8x32xf32> to vector<32x32xf32>
    %c128 = arith.constant 128 : index
    %c0_111 = arith.constant 0 : index
    %117 = vector.load %arg6[%c128, %c0_111] : memref<160x32xf32, #tpu.memory_space<vmem>>, vector<32x32xf32>
    %cst_112 = arith.constant dense<0.000000e+00> : vector<32x32xf32>
    %118 = tpu.matmul %116, %117, %cst_112 {dimension_numbers = #tpu.dot_dimension_numbers<[1], [0], [0], [1], [0, 0, 1, 1], [], []>} : vector<32x32xf32>, vector<32x32xf32>, vector<32x32xf32> -> vector<32x32xf32>
    %119 = arith.addf %114, %118 : vector<32x32xf32>
    %c0_113 = arith.constant 0 : index
    %c0_114 = arith.constant 0 : index
    %120 = vector.load %arg7[%c0_113, %c0_114] : memref<1x32xf32, #tpu.memory_space<vmem>>, vector<1x32xf32>
    %121 = vector.broadcast %120 : vector<1x32xf32> to vector<32x32xf32>
    %122 = arith.addf %119, %121 : vector<32x32xf32>
    %cst_115 = arith.constant 0.000000e+00 : f32
    %123 = vector.broadcast %cst_115 : f32 to vector<32x32xf32>
    %124 = arith.cmpf oge, %122, %123 : vector<32x32xf32>
    %cst_116 = arith.constant 1.000000e-01 : f32
    %125 = vector.broadcast %cst_116 : f32 to vector<32x32xf32>
    %126 = arith.mulf %125, %122 : vector<32x32xf32>
    %127 = arith.select %124, %122, %126 : vector<32x32xi1>, vector<32x32xf32>
    %cst_117 = arith.constant 0.000000e+00 : f32
    %128 = vector.broadcast %cst_117 : f32 to vector<2x8x32xf32>
    %c0_118 = arith.constant 0 : index
    %c0_119 = arith.constant 0 : index
    %c0_120 = arith.constant 0 : index
    %129 = vector.load %arg18[%c0_118, %c0_119, %c0_120] : memref<8x8x32xf32, #tpu.memory_space<vmem>>, vector<2x8x32xf32>
    tpu.vector_store %arg18[%c0_118, %c0_119, %c0_120], %128 {strides = array<i32>} : memref<8x8x32xf32, #tpu.memory_space<vmem>>, vector<2x8x32xf32>,
    %cst_121 = arith.constant 0.000000e+00 : f32
    %130 = vector.broadcast %cst_121 : f32 to vector<2x8x32xf32>
    %c6 = arith.constant 6 : index
    %c0_122 = arith.constant 0 : index
    %c0_123 = arith.constant 0 : index
    %131 = vector.load %arg18[%c6, %c0_122, %c0_123] : memref<8x8x32xf32, #tpu.memory_space<vmem>>, vector<2x8x32xf32>
    tpu.vector_store %arg18[%c6, %c0_122, %c0_123], %130 {strides = array<i32>} : memref<8x8x32xf32, #tpu.memory_space<vmem>>, vector<2x8x32xf32>,
    %132 = vector.shape_cast %127 : vector<32x32xf32> to vector<4x8x32xf32>
    %c2_124 = arith.constant 2 : index
    %c0_125 = arith.constant 0 : index
    %c0_126 = arith.constant 0 : index
    %133 = vector.load %arg18[%c2_124, %c0_125, %c0_126] : memref<8x8x32xf32, #tpu.memory_space<vmem>>, vector<4x8x32xf32>
    tpu.vector_store %arg18[%c2_124, %c0_125, %c0_126], %132 {strides = array<i32>} : memref<8x8x32xf32, #tpu.memory_space<vmem>>, vector<4x8x32xf32>,
    %cst_127 = arith.constant 0.000000e+00 : f32
    %134 = vector.broadcast %cst_127 : f32 to vector<16x32xf32>
    %c0_128 = arith.constant 0 : index
    %c0_129 = arith.constant 0 : index
    %c0_130 = arith.constant 0 : index
    %135 = tpu.strided_load %arg18[%c0_128, %c0_129, %c0_130] {strides = array<i32: 3, 1, 1>} : memref<8x8x32xf32, #tpu.memory_space<vmem>>, vector<2x8x32xf32>
    %136 = vector.shape_cast %135 : vector<2x8x32xf32> to vector<16x32xf32>
    %c0_131 = arith.constant 0 : index
    %c0_132 = arith.constant 0 : index
    %137 = vector.load %arg8[%c0_131, %c0_132] : memref<160x32xf32, #tpu.memory_space<vmem>>, vector<32x32xf32>
    %cst_133 = arith.constant dense<0.000000e+00> : vector<16x32xf32>
    %138 = tpu.matmul %136, %137, %cst_133 {dimension_numbers = #tpu.dot_dimension_numbers<[1], [0], [0], [1], [0, 0, 1, 1], [], []>} : vector<16x32xf32>, vector<32x32xf32>, vector<16x32xf32> -> vector<16x32xf32>
    %139 = arith.addf %134, %138 : vector<16x32xf32>
    %c1_134 = arith.constant 1 : index
    %c0_135 = arith.constant 0 : index
    %c0_136 = arith.constant 0 : index
    %140 = tpu.strided_load %arg18[%c1_134, %c0_135, %c0_136] {strides = array<i32: 3, 1, 1>} : memref<8x8x32xf32, #tpu.memory_space<vmem>>, vector<2x8x32xf32>
    %141 = vector.shape_cast %140 : vector<2x8x32xf32> to vector<16x32xf32>
    %c32_137 = arith.constant 32 : index
    %c0_138 = arith.constant 0 : index
    %142 = vector.load %arg8[%c32_137, %c0_138] : memref<160x32xf32, #tpu.memory_space<vmem>>, vector<32x32xf32>
    %cst_139 = arith.constant dense<0.000000e+00> : vector<16x32xf32>
    %143 = tpu.matmul %141, %142, %cst_139 {dimension_numbers = #tpu.dot_dimension_numbers<[1], [0], [0], [1], [0, 0, 1, 1], [], []>} : vector<16x32xf32>, vector<32x32xf32>, vector<16x32xf32> -> vector<16x32xf32>
    %144 = arith.addf %139, %143 : vector<16x32xf32>
    %c2_140 = arith.constant 2 : index
    %c0_141 = arith.constant 0 : index
    %c0_142 = arith.constant 0 : index
    %145 = tpu.strided_load %arg18[%c2_140, %c0_141, %c0_142] {strides = array<i32: 3, 1, 1>} : memref<8x8x32xf32, #tpu.memory_space<vmem>>, vector<2x8x32xf32>
    %146 = vector.shape_cast %145 : vector<2x8x32xf32> to vector<16x32xf32>
    %c64_143 = arith.constant 64 : index
    %c0_144 = arith.constant 0 : index
    %147 = vector.load %arg8[%c64_143, %c0_144] : memref<160x32xf32, #tpu.memory_space<vmem>>, vector<32x32xf32>
    %cst_145 = arith.constant dense<0.000000e+00> : vector<16x32xf32>
    %148 = tpu.matmul %146, %147, %cst_145 {dimension_numbers = #tpu.dot_dimension_numbers<[1], [0], [0], [1], [0, 0, 1, 1], [], []>} : vector<16x32xf32>, vector<32x32xf32>, vector<16x32xf32> -> vector<16x32xf32>
    %149 = arith.addf %144, %148 : vector<16x32xf32>
    %c3_146 = arith.constant 3 : index
    %c0_147 = arith.constant 0 : index
    %c0_148 = arith.constant 0 : index
    %150 = tpu.strided_load %arg18[%c3_146, %c0_147, %c0_148] {strides = array<i32: 3, 1, 1>} : memref<8x8x32xf32, #tpu.memory_space<vmem>>, vector<2x8x32xf32>
    %151 = vector.shape_cast %150 : vector<2x8x32xf32> to vector<16x32xf32>
    %c96_149 = arith.constant 96 : index
    %c0_150 = arith.constant 0 : index
    %152 = vector.load %arg8[%c96_149, %c0_150] : memref<160x32xf32, #tpu.memory_space<vmem>>, vector<32x32xf32>
    %cst_151 = arith.constant dense<0.000000e+00> : vector<16x32xf32>
    %153 = tpu.matmul %151, %152, %cst_151 {dimension_numbers = #tpu.dot_dimension_numbers<[1], [0], [0], [1], [0, 0, 1, 1], [], []>} : vector<16x32xf32>, vector<32x32xf32>, vector<16x32xf32> -> vector<16x32xf32>
    %154 = arith.addf %149, %153 : vector<16x32xf32>
    %c4_152 = arith.constant 4 : index
    %c0_153 = arith.constant 0 : index
    %c0_154 = arith.constant 0 : index
    %155 = tpu.strided_load %arg18[%c4_152, %c0_153, %c0_154] {strides = array<i32: 3, 1, 1>} : memref<8x8x32xf32, #tpu.memory_space<vmem>>, vector<2x8x32xf32>
    %156 = vector.shape_cast %155 : vector<2x8x32xf32> to vector<16x32xf32>
    %c128_155 = arith.constant 128 : index
    %c0_156 = arith.constant 0 : index
    %157 = vector.load %arg8[%c128_155, %c0_156] : memref<160x32xf32, #tpu.memory_space<vmem>>, vector<32x32xf32>
    %cst_157 = arith.constant dense<0.000000e+00> : vector<16x32xf32>
    %158 = tpu.matmul %156, %157, %cst_157 {dimension_numbers = #tpu.dot_dimension_numbers<[1], [0], [0], [1], [0, 0, 1, 1], [], []>} : vector<16x32xf32>, vector<32x32xf32>, vector<16x32xf32> -> vector<16x32xf32>
    %159 = arith.addf %154, %158 : vector<16x32xf32>
    %c0_158 = arith.constant 0 : index
    %c0_159 = arith.constant 0 : index
    %160 = vector.load %arg9[%c0_158, %c0_159] : memref<1x32xf32, #tpu.memory_space<vmem>>, vector<1x32xf32>
    %161 = vector.broadcast %160 : vector<1x32xf32> to vector<16x32xf32>
    %162 = arith.addf %159, %161 : vector<16x32xf32>
    %cst_160 = arith.constant 0.000000e+00 : f32
    %163 = vector.broadcast %cst_160 : f32 to vector<16x32xf32>
    %164 = arith.cmpf oge, %162, %163 : vector<16x32xf32>
    %cst_161 = arith.constant 1.000000e-01 : f32
    %165 = vector.broadcast %cst_161 : f32 to vector<16x32xf32>
    %166 = arith.mulf %165, %162 : vector<16x32xf32>
    %167 = arith.select %164, %162, %166 : vector<16x32xi1>, vector<16x32xf32>
    %cst_162 = arith.constant 0.000000e+00 : f32
    %168 = vector.broadcast %cst_162 : f32 to vector<2x8x32xf32>
    %c0_163 = arith.constant 0 : index
    %c0_164 = arith.constant 0 : index
    %c0_165 = arith.constant 0 : index
    %169 = vector.load %arg19[%c0_163, %c0_164, %c0_165] : memref<6x8x32xf32, #tpu.memory_space<vmem>>, vector<2x8x32xf32>
    tpu.vector_store %arg19[%c0_163, %c0_164, %c0_165], %168 {strides = array<i32>} : memref<6x8x32xf32, #tpu.memory_space<vmem>>, vector<2x8x32xf32>,
    %cst_166 = arith.constant 0.000000e+00 : f32
    %170 = vector.broadcast %cst_166 : f32 to vector<2x8x32xf32>
    %c4_167 = arith.constant 4 : index
    %c0_168 = arith.constant 0 : index
    %c0_169 = arith.constant 0 : index
    %171 = vector.load %arg19[%c4_167, %c0_168, %c0_169] : memref<6x8x32xf32, #tpu.memory_space<vmem>>, vector<2x8x32xf32>
    tpu.vector_store %arg19[%c4_167, %c0_168, %c0_169], %170 {strides = array<i32>} : memref<6x8x32xf32, #tpu.memory_space<vmem>>, vector<2x8x32xf32>,
    %172 = vector.shape_cast %167 : vector<16x32xf32> to vector<2x8x32xf32>
    %c2_170 = arith.constant 2 : index
    %c0_171 = arith.constant 0 : index
    %c0_172 = arith.constant 0 : index
    %173 = vector.load %arg19[%c2_170, %c0_171, %c0_172] : memref<6x8x32xf32, #tpu.memory_space<vmem>>, vector<2x8x32xf32>
    tpu.vector_store %arg19[%c2_170, %c0_171, %c0_172], %172 {strides = array<i32>} : memref<6x8x32xf32, #tpu.memory_space<vmem>>, vector<2x8x32xf32>,
    %cst_173 = arith.constant 0.000000e+00 : f32
    %174 = vector.broadcast %cst_173 : f32 to vector<16x32xf32>
    %c0_174 = arith.constant 0 : index
    %c0_175 = arith.constant 0 : index
    %c0_176 = arith.constant 0 : index
    %175 = vector.load %arg19[%c0_174, %c0_175, %c0_176] : memref<6x8x32xf32, #tpu.memory_space<vmem>>, vector<2x8x32xf32>
    %176 = vector.shape_cast %175 : vector<2x8x32xf32> to vector<16x32xf32>
    %c0_177 = arith.constant 0 : index
    %c0_178 = arith.constant 0 : index
    %177 = vector.load %arg10[%c0_177, %c0_178] : memref<160x32xf32, #tpu.memory_space<vmem>>, vector<32x32xf32>
    %cst_179 = arith.constant dense<0.000000e+00> : vector<16x32xf32>
    %178 = tpu.matmul %176, %177, %cst_179 {dimension_numbers = #tpu.dot_dimension_numbers<[1], [0], [0], [1], [0, 0, 1, 1], [], []>} : vector<16x32xf32>, vector<32x32xf32>, vector<16x32xf32> -> vector<16x32xf32>
    %179 = arith.addf %174, %178 : vector<16x32xf32>
    %c1_180 = arith.constant 1 : index
    %c0_181 = arith.constant 0 : index
    %c0_182 = arith.constant 0 : index
    %180 = vector.load %arg19[%c1_180, %c0_181, %c0_182] : memref<6x8x32xf32, #tpu.memory_space<vmem>>, vector<2x8x32xf32>
    %181 = vector.shape_cast %180 : vector<2x8x32xf32> to vector<16x32xf32>
    %c32_183 = arith.constant 32 : index
    %c0_184 = arith.constant 0 : index
    %182 = vector.load %arg10[%c32_183, %c0_184] : memref<160x32xf32, #tpu.memory_space<vmem>>, vector<32x32xf32>
    %cst_185 = arith.constant dense<0.000000e+00> : vector<16x32xf32>
    %183 = tpu.matmul %181, %182, %cst_185 {dimension_numbers = #tpu.dot_dimension_numbers<[1], [0], [0], [1], [0, 0, 1, 1], [], []>} : vector<16x32xf32>, vector<32x32xf32>, vector<16x32xf32> -> vector<16x32xf32>
    %184 = arith.addf %179, %183 : vector<16x32xf32>
    %c2_186 = arith.constant 2 : index
    %c0_187 = arith.constant 0 : index
    %c0_188 = arith.constant 0 : index
    %185 = vector.load %arg19[%c2_186, %c0_187, %c0_188] : memref<6x8x32xf32, #tpu.memory_space<vmem>>, vector<2x8x32xf32>
    %186 = vector.shape_cast %185 : vector<2x8x32xf32> to vector<16x32xf32>
    %c64_189 = arith.constant 64 : index
    %c0_190 = arith.constant 0 : index
    %187 = vector.load %arg10[%c64_189, %c0_190] : memref<160x32xf32, #tpu.memory_space<vmem>>, vector<32x32xf32>
    %cst_191 = arith.constant dense<0.000000e+00> : vector<16x32xf32>
    %188 = tpu.matmul %186, %187, %cst_191 {dimension_numbers = #tpu.dot_dimension_numbers<[1], [0], [0], [1], [0, 0, 1, 1], [], []>} : vector<16x32xf32>, vector<32x32xf32>, vector<16x32xf32> -> vector<16x32xf32>
    %189 = arith.addf %184, %188 : vector<16x32xf32>
    %c3_192 = arith.constant 3 : index
    %c0_193 = arith.constant 0 : index
    %c0_194 = arith.constant 0 : index
    %190 = vector.load %arg19[%c3_192, %c0_193, %c0_194] : memref<6x8x32xf32, #tpu.memory_space<vmem>>, vector<2x8x32xf32>
    %191 = vector.shape_cast %190 : vector<2x8x32xf32> to vector<16x32xf32>
    %c96_195 = arith.constant 96 : index
    %c0_196 = arith.constant 0 : index
    %192 = vector.load %arg10[%c96_195, %c0_196] : memref<160x32xf32, #tpu.memory_space<vmem>>, vector<32x32xf32>
    %cst_197 = arith.constant dense<0.000000e+00> : vector<16x32xf32>
    %193 = tpu.matmul %191, %192, %cst_197 {dimension_numbers = #tpu.dot_dimension_numbers<[1], [0], [0], [1], [0, 0, 1, 1], [], []>} : vector<16x32xf32>, vector<32x32xf32>, vector<16x32xf32> -> vector<16x32xf32>
    %194 = arith.addf %189, %193 : vector<16x32xf32>
    %c4_198 = arith.constant 4 : index
    %c0_199 = arith.constant 0 : index
    %c0_200 = arith.constant 0 : index
    %195 = vector.load %arg19[%c4_198, %c0_199, %c0_200] : memref<6x8x32xf32, #tpu.memory_space<vmem>>, vector<2x8x32xf32>
    %196 = vector.shape_cast %195 : vector<2x8x32xf32> to vector<16x32xf32>
    %c128_201 = arith.constant 128 : index
    %c0_202 = arith.constant 0 : index
    %197 = vector.load %arg10[%c128_201, %c0_202] : memref<160x32xf32, #tpu.memory_space<vmem>>, vector<32x32xf32>
    %cst_203 = arith.constant dense<0.000000e+00> : vector<16x32xf32>
    %198 = tpu.matmul %196, %197, %cst_203 {dimension_numbers = #tpu.dot_dimension_numbers<[1], [0], [0], [1], [0, 0, 1, 1], [], []>} : vector<16x32xf32>, vector<32x32xf32>, vector<16x32xf32> -> vector<16x32xf32>
    %199 = arith.addf %194, %198 : vector<16x32xf32>
    %c0_204 = arith.constant 0 : index
    %c0_205 = arith.constant 0 : index
    %200 = vector.load %arg11[%c0_204, %c0_205] : memref<1x32xf32, #tpu.memory_space<vmem>>, vector<1x32xf32>
    %201 = vector.broadcast %200 : vector<1x32xf32> to vector<16x32xf32>
    %202 = arith.addf %199, %201 : vector<16x32xf32>
    %cst_206 = arith.constant 0.000000e+00 : f32
    %203 = vector.broadcast %cst_206 : f32 to vector<16x32xf32>
    %204 = arith.cmpf oge, %202, %203 : vector<16x32xf32>
    %cst_207 = arith.constant 1.000000e-01 : f32
    %205 = vector.broadcast %cst_207 : f32 to vector<16x32xf32>
    %206 = arith.mulf %205, %202 : vector<16x32xf32>
    %207 = arith.select %204, %202, %206 : vector<16x32xi1>, vector<16x32xf32>
    %cst_208 = arith.constant 0.000000e+00 : f32
    %208 = vector.broadcast %cst_208 : f32 to vector<1x8x32xf32>
    %c0_209 = arith.constant 0 : index
    %c0_210 = arith.constant 0 : index
    %c0_211 = arith.constant 0 : index
    %209 = vector.load %arg20[%c0_209, %c0_210, %c0_211] : memref<4x8x32xf32, #tpu.memory_space<vmem>>, vector<1x8x32xf32>
    tpu.vector_store %arg20[%c0_209, %c0_210, %c0_211], %208 {strides = array<i32>} : memref<4x8x32xf32, #tpu.memory_space<vmem>>, vector<1x8x32xf32>,
    %cst_212 = arith.constant 0.000000e+00 : f32
    %210 = vector.broadcast %cst_212 : f32 to vector<1x8x32xf32>
    %c3_213 = arith.constant 3 : index
    %c0_214 = arith.constant 0 : index
    %c0_215 = arith.constant 0 : index
    %211 = vector.load %arg20[%c3_213, %c0_214, %c0_215] : memref<4x8x32xf32, #tpu.memory_space<vmem>>, vector<1x8x32xf32>
    tpu.vector_store %arg20[%c3_213, %c0_214, %c0_215], %210 {strides = array<i32>} : memref<4x8x32xf32, #tpu.memory_space<vmem>>, vector<1x8x32xf32>,
    %212 = vector.shape_cast %207 : vector<16x32xf32> to vector<2x8x32xf32>
    %c1_216 = arith.constant 1 : index
    %c0_217 = arith.constant 0 : index
    %c0_218 = arith.constant 0 : index
    %213 = vector.load %arg20[%c1_216, %c0_217, %c0_218] : memref<4x8x32xf32, #tpu.memory_space<vmem>>, vector<2x8x32xf32>
    tpu.vector_store %arg20[%c1_216, %c0_217, %c0_218], %212 {strides = array<i32>} : memref<4x8x32xf32, #tpu.memory_space<vmem>>, vector<2x8x32xf32>,
    %cst_219 = arith.constant 0.000000e+00 : f32
    %214 = vector.broadcast %cst_219 : f32 to vector<1x24xf32>
    %c0_220 = arith.constant 0 : index
    %c0_221 = arith.constant 0 : index
    %215 = vector.load %arg12[%c0_220, %c0_221] : memref<1x64xf32, #tpu.memory_space<vmem>>, vector<1x32xf32>
    %c0_222 = arith.constant 0 : index
    %c0_223 = arith.constant 0 : index
    %c0_224 = arith.constant 0 : index
    %216 = vector.load %arg20[%c0_222, %c0_223, %c0_224] : memref<4x8x32xf32, #tpu.memory_space<vmem>>, vector<3x8x32xf32>
    %217 = vector.shape_cast %216 : vector<3x8x32xf32> to vector<24x32xf32>
    %218 = tpu.transpose %217, [1, 0] : vector<24x32xf32> -> vector<32x24xf32>
    %cst_225 = arith.constant dense<0.000000e+00> : vector<1x24xf32>
    %219 = tpu.matmul %215, %218, %cst_225 {dimension_numbers = #tpu.dot_dimension_numbers<[1], [0], [0], [1], [0, 0, 1, 1], [], []>} : vector<1x32xf32>, vector<32x24xf32>, vector<1x24xf32> -> vector<1x24xf32>
    %220 = arith.addf %214, %219 : vector<1x24xf32>
    %c0_226 = arith.constant 0 : index
    %c32_227 = arith.constant 32 : index
    %221 = vector.load %arg12[%c0_226, %c32_227] : memref<1x64xf32, #tpu.memory_space<vmem>>, vector<1x32xf32>
    %c1_228 = arith.constant 1 : index
    %c0_229 = arith.constant 0 : index
    %c0_230 = arith.constant 0 : index
    %222 = vector.load %arg20[%c1_228, %c0_229, %c0_230] : memref<4x8x32xf32, #tpu.memory_space<vmem>>, vector<3x8x32xf32>
    %223 = vector.shape_cast %222 : vector<3x8x32xf32> to vector<24x32xf32>
    %224 = tpu.transpose %223, [1, 0] : vector<24x32xf32> -> vector<32x24xf32>
    %cst_231 = arith.constant dense<0.000000e+00> : vector<1x24xf32>
    %225 = tpu.matmul %221, %224, %cst_231 {dimension_numbers = #tpu.dot_dimension_numbers<[1], [0], [0], [1], [0, 0, 1, 1], [], []>} : vector<1x32xf32>, vector<32x24xf32>, vector<1x24xf32> -> vector<1x24xf32>
    %226 = arith.addf %220, %225 : vector<1x24xf32>
    %c0_232 = arith.constant 0 : index
    %c0_233 = arith.constant 0 : index
    %227 = vector.load %arg13[%c0_232, %c0_233] : memref<1x1xf32, #tpu.memory_space<vmem>>, vector<1x1xf32>
    %228 = vector.broadcast %227 : vector<1x1xf32> to vector<1x24xf32>
    %229 = arith.addf %226, %228 : vector<1x24xf32>
    %230 = vector.shape_cast %229 : vector<1x24xf32> to vector<1x1x24xf32>
    %c0_234 = arith.constant 0 : index
    %c0_235 = arith.constant 0 : index
    %c0_236 = arith.constant 0 : index
    %231 = vector.load %arg14[%c0_234, %c0_235, %c0_236] : memref<1x1x24xf32, #tpu.memory_space<vmem>>, vector<1x1x24xf32>
    tpu.vector_store %arg14[%c0_234, %c0_235, %c0_236], %230 {strides = array<i32>} : memref<1x1x24xf32, #tpu.memory_space<vmem>>, vector<1x1x24xf32>,
    return
  }
  func.func @transform_0(%arg0: i32) -> (i32, i32, i32) {
    %c0_i32 = arith.constant 0 : i32
    %c0_i32_0 = arith.constant 0 : i32
    %c0_i32_1 = arith.constant 0 : i32
    return %c0_i32, %arg0, %c0_i32_0 : i32, i32, i32
  }
  func.func @transform_1(%arg0: i32) -> (i32, i32) {
    %c0_i32 = arith.constant 0 : i32
    %c0_i32_0 = arith.constant 0 : i32
    %c0_i32_1 = arith.constant 0 : i32
    return %c0_i32, %c0_i32_0 : i32, i32
  }
  func.func @transform_2(%arg0: i32) -> (i32, i32) {
    %c0_i32 = arith.constant 0 : i32
    %c0_i32_0 = arith.constant 0 : i32
    %c0_i32_1 = arith.constant 0 : i32
    return %c0_i32, %c0_i32_0 : i32, i32
  }
  func.func @transform_3(%arg0: i32) -> (i32, i32) {
    %c0_i32 = arith.constant 0 : i32
    %c0_i32_0 = arith.constant 0 : i32
    %c0_i32_1 = arith.constant 0 : i32
    return %c0_i32, %c0_i32_0 : i32, i32
  }
  func.func @transform_4(%arg0: i32) -> (i32, i32) {
    %c0_i32 = arith.constant 0 : i32
    %c0_i32_0 = arith.constant 0 : i32
    %c0_i32_1 = arith.constant 0 : i32
    return %c0_i32, %c0_i32_0 : i32, i32
  }
  func.func @transform_5(%arg0: i32) -> (i32, i32) {
    %c0_i32 = arith.constant 0 : i32
    %c0_i32_0 = arith.constant 0 : i32
    %c0_i32_1 = arith.constant 0 : i32
    return %c0_i32, %c0_i32_0 : i32, i32
  }
  func.func @transform_6(%arg0: i32) -> (i32, i32) {
    %c0_i32 = arith.constant 0 : i32
    %c0_i32_0 = arith.constant 0 : i32
    %c0_i32_1 = arith.constant 0 : i32
    return %c0_i32, %c0_i32_0 : i32, i32
  }
  func.func @transform_7(%arg0: i32) -> (i32, i32) {
    %c0_i32 = arith.constant 0 : i32
    %c0_i32_0 = arith.constant 0 : i32
    %c0_i32_1 = arith.constant 0 : i32
    return %c0_i32, %c0_i32_0 : i32, i32
  }
  func.func @transform_8(%arg0: i32) -> (i32, i32) {
    %c0_i32 = arith.constant 0 : i32
    %c0_i32_0 = arith.constant 0 : i32
    %c0_i32_1 = arith.constant 0 : i32
    return %c0_i32, %c0_i32_0 : i32, i32
  }
  func.func @transform_9(%arg0: i32) -> (i32, i32) {
    %c0_i32 = arith.constant 0 : i32
    %c0_i32_0 = arith.constant 0 : i32
    %c0_i32_1 = arith.constant 0 : i32
    return %c0_i32, %c0_i32_0 : i32, i32
  }
  func.func @transform_10(%arg0: i32) -> (i32, i32) {
    %c0_i32 = arith.constant 0 : i32
    %c0_i32_0 = arith.constant 0 : i32
    %c0_i32_1 = arith.constant 0 : i32
    return %c0_i32, %c0_i32_0 : i32, i32
  }
  func.func @transform_11(%arg0: i32) -> (i32, i32) {
    %c0_i32 = arith.constant 0 : i32
    %c0_i32_0 = arith.constant 0 : i32
    %c0_i32_1 = arith.constant 0 : i32
    return %c0_i32, %c0_i32_0 : i32, i32
  }
  func.func @transform_12(%arg0: i32) -> (i32, i32) {
    %c0_i32 = arith.constant 0 : i32
    %c0_i32_0 = arith.constant 0 : i32
    %c0_i32_1 = arith.constant 0 : i32
    return %c0_i32, %c0_i32_0 : i32, i32
  }
  func.func @transform_13(%arg0: i32) -> (i32, i32, i32) {
    %c0_i32 = arith.constant 0 : i32
    %c0_i32_0 = arith.constant 0 : i32
    %c0_i32_1 = arith.constant 0 : i32
    return %arg0, %c0_i32, %c0_i32_0 : i32, i32, i32
  }
}

</mosaic_0001>

<bundles_post_ra>
// kernel: tpu_custom_call.1
= control target key start
LH: loop header
LB: loop body
LE: loop exit
PB: predicated region body
PF: predicated region fallthrough
CT: control target
= control target key end

     0   :  { %s6866_s0 = inlined_call_operand.vmem [shape: f32[101,8,1], index: 0, kind: input, shape index: {}]   ;;  %s6867_s1 = inlined_call_operand.vmem [shape: f32[5,8], index: 1, kind: input, shape index: {}]   ;;  %s6868_s2 = inlined_call_operand.vmem [shape: f32[1,8], index: 2, kind: input, shape index: {}]   ;;  %s6869_s3 = inlined_call_operand.vmem [shape: f32[40,32], index: 3, kind: input, shape index: {}]   ;;  %s6870_s4 = inlined_call_operand.vmem [shape: f32[1,32], index: 4, kind: input, shape index: {}]   ;;  %s6871_s5 = inlined_call_operand.vmem [shape: f32[160,32], index: 5, kind: input, shape index: {}]   ;;  %s6872_s6 = inlined_call_operand.vmem [shape: f32[1,32], index: 6, kind: input, shape index: {}]   ;;  %s6873_s7 = inlined_call_operand.vmem [shape: f32[160,32], index: 7, kind: input, shape index: {}]   ;;  %s6874_s8 = inlined_call_operand.vmem [shape: f32[1,32], index: 8, kind: input, shape index: {}]   ;;  %s6875_s9 = inlined_call_operand.vmem [shape: f32[160,32], index: 9, kind: input, shape index: {}]   ;;  %s6876_s10 = inlined_call_operand.vmem [shape: f32[1,32], index: 10, kind: input, shape index: {}]   ;;  %s6877_s11 = inlined_call_operand.vmem [shape: f32[1,64], index: 11, kind: input, shape index: {}]   ;;  %s6878_s12 = inlined_call_operand.<no memory space> [shape: f32[1,1], index: 12, kind: input, shape index: {}]   ;;  %s6879_s13 = inlined_call_operand.hbm [shape: f32[1,1,24], index: 13, kind: output, shape index: {}]  }
   0x1   :  { %v18_v0 = vstv %s6878_s12 }
   0x2   :  { %19 = vst [vmem:[#allocation8] sm:$0x1] %v18_v0 }
   0x3   :  { %vm47_vm0 = vcmask 7168   ;;  %v58_v1 = vld [vmem:[%s6866_s0 + $0x30] sm:$0xff]  ;;  %v56_v2 = vld [vmem:[%s6866_s0 + $0x20] sm:$0xff]  ;;  %v65_v3 = vld [vmem:[%s6866_s0 + $0x68] sm:$0xff]  ;;  %v5349_v4 = vmov 0   ;;  %vm1786_vm1 = vcmask 64512  }
   0x4   :  { %5318 = vset.pattern.permute.xlu1 %v5349_v4  ;;  %5317 = vset.pattern.permute.xlu0 %v5349_v4  ;;  %160 = vst.msk [vmem:[#allocation2 + $0x40] sm:$0xff] %vm47_vm0, %v58_v1  ;;  %158 = vst.msk [vmem:[#allocation2 + $0x30] sm:$0xff] %vm47_vm0, %v56_v2  ;;  %v57_v5 = vld [vmem:[%s6866_s0 + $0x28] sm:$0xff]  ;;  %v74_v6 = vld [vmem:[%s6866_s0 + $0xb0] sm:$0xff] }
   0x5   :  { %167 = vst.msk [vmem:[#allocation2 + $0x78] sm:$0xff] %vm47_vm0, %v65_v3  ;;  %v66_v7 = vld [vmem:[%s6866_s0 + $0x70] sm:$0xff]  ;;  %159 = vst.msk [vmem:[#allocation2 + $0x38] sm:$0xff] %vm47_vm0, %v57_v5  ;;  %v59_v8 = vld [vmem:[%s6866_s0 + $0x38] sm:$0xff] }
   0x6   :  { %176 = vst.msk [vmem:[#allocation2 + $0xc0] sm:$0xff] %vm47_vm0, %v74_v6  ;;  %168 = vst.msk [vmem:[#allocation2 + $0x80] sm:$0xff] %vm47_vm0, %v66_v7  ;;  %v75_v9 = vld [vmem:[%s6866_s0 + $0xb8] sm:$0xff]  ;;  %v76_v10 = vld [vmem:[%s6866_s0 + $0xc0] sm:$0xff] }
   0x7   :  { %161 = vst.msk [vmem:[#allocation2 + $0x48] sm:$0xff] %vm47_vm0, %v59_v8  ;;  %177 = vst.msk [vmem:[#allocation2 + $0xc8] sm:$0xff] %vm47_vm0, %v75_v9  ;;  %v67_v11 = vld [vmem:[%s6866_s0 + $0x78] sm:$0xff]  ;;  %v60_v13 = vld [vmem:[%s6866_s0 + $0x40] sm:$0xff] }
   0x8   :  { %178 = vst.msk [vmem:[#allocation2 + $0xd0] sm:$0xff] %vm47_vm0, %v76_v10  ;;  %v83_v12 = vld [vmem:[%s6866_s0 + $0xf8] sm:$0xff]  ;;  %169 = vst.msk [vmem:[#allocation2 + $0x88] sm:$0xff] %vm47_vm0, %v67_v11  ;;  %v68_v14 = vld [vmem:[%s6866_s0 + $0x80] sm:$0xff] }
   0x9   :  { %185 = vst.msk [vmem:[#allocation2 + $0x108] sm:$0xff] %vm47_vm0, %v83_v12  ;;  %162 = vst.msk [vmem:[#allocation2 + $0x50] sm:$0xff] %vm47_vm0, %v60_v13  ;;  %v84_v15 = vld [vmem:[%s6866_s0 + $0x100] sm:$0xff]  ;;  %v93_v16 = vld [vmem:[%s6866_s0 + $0x148] sm:$0xff] }
   0xa   :  { %170 = vst.msk [vmem:[#allocation2 + $0x90] sm:$0xff] %vm47_vm0, %v68_v14  ;;  %186 = vst.msk [vmem:[#allocation2 + $0x110] sm:$0xff] %vm47_vm0, %v84_v15  ;;  %v92_v17 = vld [vmem:[%s6866_s0 + $0x140] sm:$0xff]  ;;  %v85_v18 = vld [vmem:[%s6866_s0 + $0x108] sm:$0xff] }
   0xb   :  { %195 = vst.msk [vmem:[#allocation2 + $0x158] sm:$0xff] %vm47_vm0, %v93_v16  ;;  %v77_v19 = vld [vmem:[%s6866_s0 + $0xc8] sm:$0xff]  ;;  %194 = vst.msk [vmem:[#allocation2 + $0x150] sm:$0xff] %vm47_vm0, %v92_v17  ;;  %v94_v20 = vld [vmem:[%s6866_s0 + $0x150] sm:$0xff] }
   0xc   :  { %187 = vst.msk [vmem:[#allocation2 + $0x118] sm:$0xff] %vm47_vm0, %v85_v18  ;;  %179 = vst.msk [vmem:[#allocation2 + $0xd8] sm:$0xff] %vm47_vm0, %v77_v19  ;;  %v69_v21 = vld [vmem:[%s6866_s0 + $0x88] sm:$0xff]  ;;  %v78_v23 = vld [vmem:[%s6866_s0 + $0xd0] sm:$0xff]  ;;  %v5350_v19 = vmov 0.0  }
   0xd   :  { %v101_v22 = vld [vmem:[%s6866_s0 + $0x188] sm:$0xff]  ;;  %196 = vst.msk [vmem:[#allocation2 + $0x160] sm:$0xff] %vm47_vm0, %v94_v20  ;;  %171 = vst.msk [vmem:[#allocation2 + $0x98] sm:$0xff] %vm47_vm0, %v69_v21  ;;  %v86_v24 = vld [vmem:[%s6866_s0 + $0x110] sm:$0xff] }
   0xe   :  { %203 = vst.msk [vmem:[#allocation2 + $0x198] sm:$0xff] %vm47_vm0, %v101_v22  ;;  %v102_v25 = vld [vmem:[%s6866_s0 + $0x190] sm:$0xff]  ;;  %v812_v26 = vld [vmem:[#allocation2 + $0x40] sm:$0xff]  ;;  %180 = vst.msk [vmem:[#allocation2 + $0xe0] sm:$0xff] %vm47_vm0, %v78_v23 }
   0xf   :  { %v5521_v27 = vld [vmem:[#allocation2 + $0x30] sm:$0xff]  ;;  %188 = vst.msk [vmem:[#allocation2 + $0x120] sm:$0xff] %vm47_vm0, %v86_v24  ;;  %204 = vst.msk [vmem:[#allocation2 + $0x1a0] sm:$0xff] %vm47_vm0, %v102_v25  ;;  %857 = vperm.xlu1 %5318, %v812_v26   ;;  %v5527_v28 = vld [vmem:[#allocation2 + $0x78] sm:$0xff] }
  0x10   :  { %302 = vperm.xlu0 %5317, %v5521_v27   ;;  %v5529_v29 = vld [vmem:[#allocation2 + $0x38] sm:$0xff]  ;;  %v5533_v30 = vld [vmem:[#allocation2 + $0xc0] sm:$0xff]  ;;  %v1090_v32 = vld [vmem:[#allocation2 + $0x48] sm:$0xff]  ;;  %1788 = vst.msk [vmem:[#allocation3 + $0x8] sm:$0xff] %vm1786_vm1, %v5350_v19 }
  0x11   :  { %v5535_v31 = vld [vmem:[#allocation2 + $0x80] sm:$0xff]  ;;  %v5537_v33 = vld [vmem:[#allocation2 + $0xc8] sm:$0xff]  ;;  %v111_v34 = vld [vmem:[%s6866_s0 + $0x1d8] sm:$0xff]  ;;  %48 = vst.msk [vmem:[#allocation2] sm:$0xff] %vm47_vm0, %v5350_v19 }
  0x12   :  { %v110_v35 = vld [vmem:[%s6866_s0 + $0x1d0] sm:$0xff]  ;;  %v103_v36 = vld [vmem:[%s6866_s0 + $0x198] sm:$0xff]  ;;  %213 = vst.msk [vmem:[#allocation2 + $0x1e8] sm:$0xff] %vm47_vm0, %v111_v34  ;;  %v112_v38 = vld [vmem:[%s6866_s0 + $0x1e0] sm:$0xff] }
  0x13   :  { %317 = vperm.xlu1 %5318, %v5527_v28   ;;  %212 = vst.msk [vmem:[#allocation2 + $0x1e0] sm:$0xff] %vm47_vm0, %v110_v35  ;;  %205 = vst.msk [vmem:[#allocation2 + $0x1a8] sm:$0xff] %vm47_vm0, %v103_v36  ;;  %v95_v37 = vld [vmem:[%s6866_s0 + $0x158] sm:$0xff]  ;;  %v96_v41 = vld [vmem:[%s6866_s0 + $0x160] sm:$0xff] }
  0x14   :  { %580 = vperm.xlu0 %5317, %v5529_v29   ;;  %v87_v39 = vld [vmem:[%s6866_s0 + $0x118] sm:$0xff]  ;;  %197 = vst.msk [vmem:[#allocation2 + $0x168] sm:$0xff] %vm47_vm0, %v95_v37  ;;  %214 = vst.msk [vmem:[#allocation2 + $0x1f0] sm:$0xff] %vm47_vm0, %v112_v38  ;;  %v104_v42 = vld [vmem:[%s6866_s0 + $0x1a0] sm:$0xff] }
  0x15   :  { %189 = vst.msk [vmem:[#allocation2 + $0x128] sm:$0xff] %vm47_vm0, %v87_v39  ;;  %v119_v40 = vld [vmem:[%s6866_s0 + $0x218] sm:$0xff]  ;;  %198 = vst.msk [vmem:[#allocation2 + $0x170] sm:$0xff] %vm47_vm0, %v96_v41  ;;  %v120_v43 = vld [vmem:[%s6866_s0 + $0x220] sm:$0xff] }
  0x16   :  { %221 = vst.msk [vmem:[#allocation2 + $0x228] sm:$0xff] %vm47_vm0, %v119_v40  ;;  %206 = vst.msk [vmem:[#allocation2 + $0x1b0] sm:$0xff] %vm47_vm0, %v104_v42  ;;  %v129_v44 = vld [vmem:[%s6866_s0 + $0x268] sm:$0xff]  ;;  %v128_v45 = vld [vmem:[%s6866_s0 + $0x260] sm:$0xff] }
  0x17   :  { %332 = vperm.xlu1 %5318, %v5533_v30   ;;  %v818_v46 = vld [vmem:[#allocation2 + $0xd0] sm:$0xff]  ;;  %v815_v47 = vld [vmem:[#allocation2 + $0x88] sm:$0xff]  ;;  %222 = vst.msk [vmem:[#allocation2 + $0x230] sm:$0xff] %vm47_vm0, %v120_v43  ;;  %231 = vst.msk [vmem:[#allocation2 + $0x278] sm:$0xff] %vm47_vm0, %v129_v44 }
  0x18   :  { %595 = vperm.xlu0 %5317, %v5535_v31   ;;  %230 = vst.msk [vmem:[#allocation2 + $0x270] sm:$0xff] %vm47_vm0, %v128_v45  ;;  %v121_v48 = vld [vmem:[%s6866_s0 + $0x228] sm:$0xff]  ;;  %v130_v50 = vld [vmem:[%s6866_s0 + $0x270] sm:$0xff]  ;;  %v147_v56 = vld [vmem:[%s6866_s0 + $0x2f8] sm:$0xff] }
  0x19   :  { %v113_v49 = vld [vmem:[%s6866_s0 + $0x1e8] sm:$0xff]  ;;  %223 = vst.msk [vmem:[#allocation2 + $0x238] sm:$0xff] %vm47_vm0, %v121_v48  ;;  %232 = vst.msk [vmem:[#allocation2 + $0x280] sm:$0xff] %vm47_vm0, %v130_v50  ;;  %v114_v53 = vld [vmem:[%s6866_s0 + $0x1f0] sm:$0xff] }
  0x1a   :  { %215 = vst.msk [vmem:[#allocation2 + $0x1f8] sm:$0xff] %vm47_vm0, %v113_v49  ;;  %v105_v51 = vld [vmem:[%s6866_s0 + $0x1a8] sm:$0xff]  ;;  %216 = vst.msk [vmem:[#allocation2 + $0x200] sm:$0xff] %vm47_vm0, %v114_v53  ;;  %v122_v54 = vld [vmem:[%s6866_s0 + $0x230] sm:$0xff] }
  0x1b   :  { %1135 = vperm.xlu1 %5318, %v1090_v32   ;;  %v137_v52 = vld [vmem:[%s6866_s0 + $0x2a8] sm:$0xff]  ;;  %207 = vst.msk [vmem:[#allocation2 + $0x1b8] sm:$0xff] %vm47_vm0, %v105_v51  ;;  %v138_v55 = vld [vmem:[%s6866_s0 + $0x2b0] sm:$0xff]  ;;  %224 = vst.msk [vmem:[#allocation2 + $0x240] sm:$0xff] %vm47_vm0, %v122_v54 }
  0x1c   :  { %610 = vperm.xlu0 %5317, %v5537_v33   ;;  %239 = vst.msk [vmem:[#allocation2 + $0x2b8] sm:$0xff] %vm47_vm0, %v137_v52  ;;  %240 = vst.msk [vmem:[#allocation2 + $0x2c0] sm:$0xff] %vm47_vm0, %v138_v55  ;;  %v146_v57 = vld [vmem:[%s6866_s0 + $0x2f0] sm:$0xff]  ;;  %v139_v58 = vld [vmem:[%s6866_s0 + $0x2b8] sm:$0xff] }
  0x1d   :  { %249 = vst.msk [vmem:[#allocation2 + $0x308] sm:$0xff] %vm47_vm0, %v147_v56  ;;  %v131_v59 = vld [vmem:[%s6866_s0 + $0x278] sm:$0xff]  ;;  %248 = vst.msk [vmem:[#allocation2 + $0x300] sm:$0xff] %vm47_vm0, %v146_v57  ;;  %v5638_v60 = vld [vmem:[#allocation2 + $0x108] sm:$0xff] }
  0x1e   :  { %241 = vst.msk [vmem:[#allocation2 + $0x2c8] sm:$0xff] %vm47_vm0, %v139_v58  ;;  %233 = vst.msk [vmem:[#allocation2 + $0x288] sm:$0xff] %vm47_vm0, %v131_v59  ;;  %v1368_v61 = vld [vmem:[#allocation2 + $0x50] sm:$0xff]  ;;  %v5643_v0 = vld [vmem:[#allocation2 + $0x158] sm:$0xff] }
  0x1f   :  { %887 = vperm.xlu1 %5318, %v818_v46   ;;  %v1093_v62 = vld [vmem:[#allocation2 + $0x90] sm:$0xff]  ;;  %v148_v2 = vld [vmem:[%s6866_s0 + $0x300] sm:$0xff]  ;;  %v123_v3 = vld [vmem:[%s6866_s0 + $0x238] sm:$0xff]  ;;  %49 = vst.msk [vmem:[#allocation2 + $0x8] sm:$0xff] %vm47_vm0, %v5350_v19 }
  0x20   :  { %872 = vperm.xlu0 %5317, %v815_v47   ;;  %v5641_v63 = vld [vmem:[#allocation2 + $0x110] sm:$0xff]  ;;  %v140_v4 = vld [vmem:[%s6866_s0 + $0x2c0] sm:$0xff]  ;;  %250 = vst.msk [vmem:[#allocation2 + $0x310] sm:$0xff] %vm47_vm0, %v148_v2  ;;  %225 = vst.msk [vmem:[#allocation2 + $0x248] sm:$0xff] %vm47_vm0, %v123_v3 }
  0x21   :  { %v5645_v1 = vld [vmem:[#allocation2 + $0x150] sm:$0xff]  ;;  %242 = vst.msk [vmem:[#allocation2 + $0x2d0] sm:$0xff] %vm47_vm0, %v140_v4  ;;  %v132_v5 = vld [vmem:[%s6866_s0 + $0x280] sm:$0xff]  ;;  %v53_v7 = vld [vmem:[%s6866_s0 + $0x8] sm:$0xff] }
  0x22   :  { %v54_v6 = vld [vmem:[%s6866_s0 + $0x10] sm:$0xff]  ;;  %234 = vst.msk [vmem:[#allocation2 + $0x290] sm:$0xff] %vm47_vm0, %v132_v5  ;;  %155 = vst.msk [vmem:[#allocation2 + $0x18] sm:$0xff] %vm47_vm0, %v53_v7  ;;  %v141_v8 = vld [vmem:[%s6866_s0 + $0x2c8] sm:$0xff] }
  0x23   :  { %347 = vperm.xlu1 %5318, %v5638_v60   ;;  %156 = vst.msk [vmem:[#allocation2 + $0x20] sm:$0xff] %vm47_vm0, %v54_v6  ;;  %v149_v9 = vld [vmem:[%s6866_s0 + $0x308] sm:$0xff]  ;;  %v150_v10 = vld [vmem:[%s6866_s0 + $0x310] sm:$0xff]  ;;  %243 = vst.msk [vmem:[#allocation2 + $0x2d8] sm:$0xff] %vm47_vm0, %v141_v8 }
  0x24   :  { %1413 = vperm.xlu0 %5317, %v1368_v61   ;;  %251 = vst.msk [vmem:[#allocation2 + $0x318] sm:$0xff] %vm47_vm0, %v149_v9  ;;  %252 = vst.msk [vmem:[#allocation2 + $0x320] sm:$0xff] %vm47_vm0, %v150_v10  ;;  %v55_v11 = vld [vmem:[%s6866_s0 + $0x18] sm:$0xff]  ;;  %v62_v13 = vld [vmem:[%s6866_s0 + $0x50] sm:$0xff] }
  0x25   :  { %v63_v12 = vld [vmem:[%s6866_s0 + $0x58] sm:$0xff]  ;;  %157 = vst.msk [vmem:[#allocation2 + $0x28] sm:$0xff] %vm47_vm0, %v55_v11  ;;  %164 = vst.msk [vmem:[#allocation2 + $0x60] sm:$0xff] %vm47_vm0, %v62_v13  ;;  %v72_v14 = vld [vmem:[%s6866_s0 + $0xa0] sm:$0xff] }
  0x26   :  { %165 = vst.msk [vmem:[#allocation2 + $0x68] sm:$0xff] %vm47_vm0, %v63_v12  ;;  %v71_v15 = vld [vmem:[%s6866_s0 + $0x98] sm:$0xff]  ;;  %v64_v16 = vld [vmem:[%s6866_s0 + $0x60] sm:$0xff]  ;;  %174 = vst.msk [vmem:[#allocation2 + $0xb0] sm:$0xff] %vm47_vm0, %v72_v14 }
  0x27   :  { %1150 = vperm.xlu1 %5318, %v1093_v62   ;;  %v821_v17 = vld [vmem:[#allocation2 + $0x118] sm:$0xff]  ;;  %173 = vst.msk [vmem:[#allocation2 + $0xa8] sm:$0xff] %vm47_vm0, %v71_v15  ;;  %166 = vst.msk [vmem:[#allocation2 + $0x70] sm:$0xff] %vm47_vm0, %v64_v16  ;;  %v73_v18 = vld [vmem:[%s6866_s0 + $0xa8] sm:$0xff] }
  0x28   :  { %625 = vperm.xlu0 %5317, %v5641_v63   ;;  %51 = vst.msk [vmem:[#allocation2 + $0x338] sm:$0xff] %vm47_vm0, %v5350_v19  ;;  %v1096_v20 = vld [vmem:[#allocation2 + $0xd8] sm:$0xff]  ;;  %175 = vst.msk [vmem:[#allocation2 + $0xb8] sm:$0xff] %vm47_vm0, %v73_v18  ;;  %v81_v21 = vld [vmem:[%s6866_s0 + $0xe8] sm:$0xff] }
  0x29   :  { %1787 = vst.msk [vmem:[#allocation3] sm:$0xff] %vm1786_vm1, %v5350_v19  ;;  %1790 = vst.msk [vmem:[#allocation3 + $0x120] sm:$0xff] %vm1786_vm1, %v5350_v19  ;;  %v80_v22 = vld [vmem:[%s6866_s0 + $0xe0] sm:$0xff]  ;;  %v89_v23 = vld [vmem:[%s6866_s0 + $0x128] sm:$0xff] }
  0x2a   :  { %1791 = vst.msk [vmem:[#allocation3 + $0x128] sm:$0xff] %vm1786_vm1, %v5350_v19  ;;  %v90_v24 = vld [vmem:[%s6866_s0 + $0x130] sm:$0xff]  ;;  %v824_v25 = vld [vmem:[#allocation2 + $0x160] sm:$0xff]  ;;  %v1371_v26 = vld [vmem:[#allocation2 + $0x98] sm:$0xff] }
  0x2b   :  { %640 = vperm.xlu1 %5318, %v5643_v0   ;;  %183 = vst.msk [vmem:[#allocation2 + $0xf8] sm:$0xff] %vm47_vm0, %v81_v21  ;;  %182 = vst.msk [vmem:[#allocation2 + $0xf0] sm:$0xff] %vm47_vm0, %v80_v22  ;;  %v82_v32 = vld [vmem:[%s6866_s0 + $0xf0] sm:$0xff]  ;;  %v5747_v34 = vld [vmem:[#allocation2 + $0x198] sm:$0xff] }
  0x2c   :  { %362 = vperm.xlu0 %5317, %v5645_v1   ;;  %191 = vst.msk [vmem:[#allocation2 + $0x138] sm:$0xff] %vm47_vm0, %v89_v23  ;;  %192 = vst.msk [vmem:[#allocation2 + $0x140] sm:$0xff] %vm47_vm0, %v90_v24  ;;  %v1374_v35 = vld [vmem:[#allocation2 + $0xe0] sm:$0xff]  ;;  %v91_v36 = vld [vmem:[%s6866_s0 + $0x138] sm:$0xff] }
  0x2d   :  { %184 = vst.msk [vmem:[#allocation2 + $0x100] sm:$0xff] %vm47_vm0, %v82_v32  ;;  %v1099_v37 = vld [vmem:[#allocation2 + $0x120] sm:$0xff]  ;;  %193 = vst.msk [vmem:[#allocation2 + $0x148] sm:$0xff] %vm47_vm0, %v91_v36  ;;  %v99_v39 = vld [vmem:[%s6866_s0 + $0x178] sm:$0xff] }
  0x2e   :  { %v5753_v38 = vld [vmem:[#allocation2 + $0x1a0] sm:$0xff]  ;;  %v98_v40 = vld [vmem:[%s6866_s0 + $0x170] sm:$0xff]  ;;  %v107_v41 = vld [vmem:[%s6866_s0 + $0x1b8] sm:$0xff]  ;;  %201 = vst.msk [vmem:[#allocation2 + $0x188] sm:$0xff] %vm47_vm0, %v99_v39 }
  0x2f   :  { %902 = vperm.xlu1 %5318, %v821_v17   ;;  %200 = vst.msk [vmem:[#allocation2 + $0x180] sm:$0xff] %vm47_vm0, %v98_v40  ;;  %209 = vst.msk [vmem:[#allocation2 + $0x1c8] sm:$0xff] %vm47_vm0, %v107_v41  ;;  %v108_v42 = vld [vmem:[%s6866_s0 + $0x1c0] sm:$0xff]  ;;  %v1853_v43 = vld [vmem:[%s6869_s3 + $0x8] sm:$0xff] }
  0x30   :  { %1165 = vperm.xlu0 %5317, %v1096_v20   ;;  %v1841_v44 = vld [vmem:[#allocation3 + $0x8] sm:$0xff]  ;;  %210 = vst.msk [vmem:[#allocation2 + $0x1d0] sm:$0xff] %vm47_vm0, %v108_v42  ;;  %4805 = vmatprep.subr.mxu0 %v1853_v43  ;;  %v100_v45 = vld [vmem:[%s6866_s0 + $0x180] sm:$0xff] }
  0x31   :  { %4807 = vmatprep.mubr.msk.f32.mxu0 %vm1786_vm1, %v1841_v44  ;;  %v109_v46 = vld [vmem:[%s6866_s0 + $0x1c8] sm:$0xff]  ;;  %4806 = vmatpush3.msra.mxu0 %v1853_v43  ;;  %202 = vst.msk [vmem:[#allocation2 + $0x190] sm:$0xff] %vm47_vm0, %v100_v45  ;;  %v116_v48 = vld [vmem:[%s6866_s0 + $0x200] sm:$0xff] }
  0x32   :  { %v117_v47 = vld [vmem:[%s6866_s0 + $0x208] sm:$0xff]  ;;  %211 = vst.msk [vmem:[#allocation2 + $0x1d8] sm:$0xff] %vm47_vm0, %v109_v46 }
  0x33   :  { %917 = vperm.xlu1 %5318, %v824_v25   ;;  %219 = vst.msk [vmem:[#allocation2 + $0x218] sm:$0xff] %vm47_vm0, %v117_v47  ;;  %v125_v49 = vld [vmem:[%s6866_s0 + $0x248] sm:$0xff] }
  0x34   :  { %1428 = vperm.xlu0 %5317, %v1371_v26  }
  0x37   :  { %377 = vperm.xlu1 %5318, %v5747_v34  }
  0x38   :  { %1443 = vperm.xlu0 %5317, %v1374_v35  }
  0x39   :  { %20 = vsyncpa [#allocation10], 0  ;;  %218 = vst.msk [vmem:[#allocation2 + $0x210] sm:$0xff] %vm47_vm0, %v116_v48  ;;  %v126_v50 = vld [vmem:[%s6866_s0 + $0x250] sm:$0xff]  ;;  %v5801_v51 = vld [vmem:[#allocation2 + $0x1e8] sm:$0xff] }
  0x3a   :  { %227 = vst.msk [vmem:[#allocation2 + $0x258] sm:$0xff] %vm47_vm0, %v125_v49  ;;  %v5803_v52 = vld [vmem:[#allocation2 + $0x1e0] sm:$0xff]  ;;  %228 = vst.msk [vmem:[#allocation2 + $0x260] sm:$0xff] %vm47_vm0, %v126_v50  ;;  %v118_v53 = vld [vmem:[%s6866_s0 + $0x210] sm:$0xff] }
  0x3b   :  { %1180 = vperm.xlu1 %5318, %v1099_v37   ;;  %v827_v54 = vld [vmem:[#allocation2 + $0x1a8] sm:$0xff]  ;;  %220 = vst.msk [vmem:[#allocation2 + $0x220] sm:$0xff] %vm47_vm0, %v118_v53  ;;  %v127_v56 = vld [vmem:[%s6866_s0 + $0x258] sm:$0xff]  ;;  %v830_v57 = vld [vmem:[#allocation2 + $0x1f0] sm:$0xff] }
  0x3c   :  { %655 = vperm.xlu0 %5317, %v5753_v38   ;;  %v1102_v55 = vld [vmem:[#allocation2 + $0x168] sm:$0xff]  ;;  %229 = vst.msk [vmem:[#allocation2 + $0x268] sm:$0xff] %vm47_vm0, %v127_v56  ;;  %v135_v59 = vld [vmem:[%s6866_s0 + $0x298] sm:$0xff]  ;;  %v134_v61 = vld [vmem:[%s6866_s0 + $0x290] sm:$0xff] }
  0x3d   :  { %v1377_v58 = vld [vmem:[#allocation2 + $0x128] sm:$0xff]  ;;  %v1380_v2 = vld [vmem:[#allocation2 + $0x170] sm:$0xff]  ;;  %237 = vst.msk [vmem:[#allocation2 + $0x2a8] sm:$0xff] %vm47_vm0, %v135_v59  ;;  %236 = vst.msk [vmem:[#allocation2 + $0x2a0] sm:$0xff] %vm47_vm0, %v134_v61 }
  0x3e   :  { %v5822_v62 = vld [vmem:[#allocation2 + $0x228] sm:$0xff]  ;;  %v143_v3 = vld [vmem:[%s6866_s0 + $0x2d8] sm:$0xff]  ;;  %v1105_v4 = vld [vmem:[#allocation2 + $0x1b0] sm:$0xff] }
  0x3f   :  { %670 = vperm.xlu1 %5318, %v5801_v51   ;;  %v5830_v5 = vld [vmem:[#allocation2 + $0x230] sm:$0xff]  ;;  %245 = vst.msk [vmem:[#allocation2 + $0x2e8] sm:$0xff] %vm47_vm0, %v143_v3  ;;  %v144_v6 = vld [vmem:[%s6866_s0 + $0x2e0] sm:$0xff]  ;;  %v5837_v7 = vld [vmem:[#allocation2 + $0x278] sm:$0xff] }
  0x40   :  { %392 = vperm.xlu0 %5317, %v5803_v52   ;;  %v5839_v8 = vld [vmem:[#allocation2 + $0x270] sm:$0xff]  ;;  %246 = vst.msk [vmem:[#allocation2 + $0x2f0] sm:$0xff] %vm47_vm0, %v144_v6  ;;  %v136_v9 = vld [vmem:[%s6866_s0 + $0x2a0] sm:$0xff]  ;;  %v833_v10 = vld [vmem:[#allocation2 + $0x238] sm:$0xff] }
  0x41   :  { %v1108_v11 = vld [vmem:[#allocation2 + $0x1f8] sm:$0xff]  ;;  %238 = vst.msk [vmem:[#allocation2 + $0x2b0] sm:$0xff] %vm47_vm0, %v136_v9  ;;  %v145_v12 = vld [vmem:[%s6866_s0 + $0x2e8] sm:$0xff]  ;;  %v836_v13 = vld [vmem:[#allocation2 + $0x280] sm:$0xff] }
  0x42   :  { %v1383_v14 = vld [vmem:[#allocation2 + $0x1b8] sm:$0xff]  ;;  %247 = vst.msk [vmem:[#allocation2 + $0x2f8] sm:$0xff] %vm47_vm0, %v145_v12  ;;  %v1386_v16 = vld [vmem:[#allocation2 + $0x200] sm:$0xff]  ;;  %v5858_v20 = vld [vmem:[#allocation2 + $0x308] sm:$0xff] }
  0x43   :  { %932 = vperm.xlu1 %5318, %v827_v54   ;;  %v5852_v15 = vld [vmem:[#allocation2 + $0x2b8] sm:$0xff]  ;;  %v1111_v17 = vld [vmem:[#allocation2 + $0x240] sm:$0xff]  ;;  %v839_v23 = vld [vmem:[#allocation2 + $0x2c8] sm:$0xff] }
  0x44   :  { %1195 = vperm.xlu0 %5317, %v1102_v55   ;;  %v5855_v18 = vld [vmem:[#allocation2 + $0x2c0] sm:$0xff]  ;;  %v1114_v24 = vld [vmem:[#allocation2 + $0x288] sm:$0xff]  ;;  %v842_v26 = vld [vmem:[#allocation2 + $0x310] sm:$0xff] }
  0x45   :  { %v5860_v21 = vld [vmem:[#allocation2 + $0x300] sm:$0xff]  ;;  %v61_v25 = vld [vmem:[%s6866_s0 + $0x48] sm:$0xff]  ;;  %v1117_v35 = vld [vmem:[#allocation2 + $0x2d0] sm:$0xff] }
  0x46   :  { %v52_v22 = vld [vmem:[%s6866_s0] sm:$0xff]  ;;  %v1389_v32 = vld [vmem:[#allocation2 + $0x248] sm:$0xff]  ;;  %163 = vst.msk [vmem:[#allocation2 + $0x58] sm:$0xff] %vm47_vm0, %v61_v25  ;;  %v1392_v36 = vld [vmem:[#allocation2 + $0x290] sm:$0xff] }
  0x47   :  { %947 = vperm.xlu1 %5318, %v830_v57   ;;  %154 = vst.msk [vmem:[#allocation2 + $0x10] sm:$0xff] %vm47_vm0, %v52_v22  ;;  %v5872_v37 = vld [vmem:[#allocation2 + $0x20] sm:$0xff]  ;;  %v5874_v39 = vld [vmem:[#allocation2 + $0x18] sm:$0xff]  ;;  %v70_v42 = vld [vmem:[%s6866_s0 + $0x90] sm:$0xff] }
  0x48   :  { %1458 = vperm.xlu0 %5317, %v1377_v58   ;;  %v1395_v40 = vld [vmem:[#allocation2 + $0x2d8] sm:$0xff]  ;;  %v1398_v43 = vld [vmem:[#allocation2 + $0x320] sm:$0xff]  ;;  %v811_v44 = vld [vmem:[#allocation2 + $0x28] sm:$0xff]  ;;  %172 = vst.msk [vmem:[#allocation2 + $0xa0] sm:$0xff] %vm47_vm0, %v70_v42 }
  0x49   :  { %v1120_v41 = vld [vmem:[#allocation2 + $0x318] sm:$0xff]  ;;  %v5885_v46 = vld [vmem:[#allocation2 + $0x68] sm:$0xff]  ;;  %v5887_v47 = vld [vmem:[#allocation2 + $0x60] sm:$0xff] }
  0x4a   :  { %v79_v45 = vld [vmem:[%s6866_s0 + $0xd8] sm:$0xff]  ;;  %v5892_v48 = vld [vmem:[#allocation2 + $0xb0] sm:$0xff]  ;;  %v5894_v49 = vld [vmem:[#allocation2 + $0xa8] sm:$0xff] }
  0x4b   :  { %407 = vperm.xlu1 %5318, %v5822_v62   ;;  %181 = vst.msk [vmem:[#allocation2 + $0xe8] sm:$0xff] %vm47_vm0, %v79_v45  ;;  %v814_v50 = vld [vmem:[#allocation2 + $0x70] sm:$0xff]  ;;  %v817_v53 = vld [vmem:[#allocation2 + $0xb8] sm:$0xff]  ;;  %v88_v56 = vld [vmem:[%s6866_s0 + $0x120] sm:$0xff] }
  0x4c   :  { %1473 = vperm.xlu0 %5317, %v1380_v2   ;;  %v5903_v57 = vld [vmem:[#allocation2 + $0xf8] sm:$0xff]  ;;  %v5905_v58 = vld [vmem:[#allocation2 + $0xf0] sm:$0xff]  ;;  %190 = vst.msk [vmem:[#allocation2 + $0x130] sm:$0xff] %vm47_vm0, %v88_v56  ;;  %v5921_v2 = vld [vmem:[%s6867_s1 + $0x1] ss:$0 sm:$0xff] }
  0x4d   :  { %v5930_v6 = vld [vmem:[%s6867_s1] ss:$0 sm:$0xff]  ;;  %v5987_v56 = vld [vmem:[#allocation2 + $0x1c8] sm:$0xff] }
  0x4e   :  { %v5932_v9 = vld [vmem:[#allocation2 + $0x140] sm:$0xff] }
  0x4f   :  { %1210 = vperm.xlu1 %5318, %v1105_v4   ;;  %v5951_v22 = vld [vmem:[%s6869_s3] sm:$0xff] }
  0x50   :  { %685 = vperm.xlu0 %5317, %v5830_v5   ;;  %4825 = vmatprep.subr.mxu0 %v5951_v22  ;;  %v5976_v45 = vld [vmem:[#allocation2 + $0x180] sm:$0xff] }
  0x53   :  { %700 = vperm.xlu1 %5318, %v5837_v7  }
  0x54   :  { %422 = vperm.xlu0 %5317, %v5839_v8  }
  0x57   :  { %962 = vperm.xlu1 %5318, %v833_v10  }
  0x58   :  { %1225 = vperm.xlu0 %5317, %v1108_v11  }
  0x5b   :  { %977 = vperm.xlu1 %5318, %v836_v13  }
  0x5c   :  { %1488 = vperm.xlu0 %5317, %v1383_v14   ;;  %v5946_v14 = vld [vmem:[%s6867_s1 + $0x3] ss:$0 sm:$0xff] }
  0x5f   :  { %437 = vperm.xlu1 %5318, %v5852_v15  }
  0x60   :  { %1503 = vperm.xlu0 %5317, %v1386_v16   ;;  %v820_v16 = vld [vmem:[#allocation2 + $0x100] sm:$0xff] }
  0x63   :  { %1240 = vperm.xlu1 %5318, %v1111_v17  }
  0x64   :  { %715 = vperm.xlu0 %5317, %v5855_v18  }
  0x67   :  { %730 = vperm.xlu1 %5318, %v5858_v20  }
  0x68   :  { %452 = vperm.xlu0 %5317, %v5860_v21  }
  0x6b   :  { %992 = vperm.xlu1 %5318, %v839_v23  }
  0x6c   :  { %1255 = vperm.xlu0 %5317, %v1114_v24  }
  0x6f   :  { %1007 = vperm.xlu1 %5318, %v842_v26   ;;  %v5960_v26 = vld [vmem:[%s6867_s1 + $0x4] ss:$0 sm:$0xff] }
  0x70   :  { %1518 = vperm.xlu0 %5317, %v1389_v32   ;;  %v823_v32 = vld [vmem:[#allocation2 + $0x148] sm:$0xff] }
  0x73   :  { %1270 = vperm.xlu1 %5318, %v1117_v35  }
  0x74   :  { %1533 = vperm.xlu0 %5317, %v1392_v36  }
  0x77   :  { %575 = vperm.xlu1 %5318, %v5872_v37  }
  0x78   :  { %297 = vperm.xlu0 %5317, %v5874_v39  }
  0x7b   :  { %1548 = vperm.xlu1 %5318, %v1395_v40  }
  0x7c   :  { %1285 = vperm.xlu0 %5317, %v1120_v41  }
  0x7f   :  { %1563 = vperm.xlu1 %5318, %v1398_v43   ;;  %v5972_v43 = vld [vmem:[%s6868_s2] ss:$0 sm:$0xff] }
  0x80   :  { %852 = vperm.xlu0 %5317, %v811_v44   ;;  %v5974_v44 = vld [vmem:[#allocation2 + $0x188] sm:$0xff] }
  0x83   :  { %590 = vperm.xlu1 %5318, %v5885_v46  }
  0x84   :  { %312 = vperm.xlu0 %5317, %v5887_v47  }
  0x87   :  { %605 = vperm.xlu1 %5318, %v5892_v48  }
  0x88   :  { %327 = vperm.xlu0 %5317, %v5894_v49  }
  0x8b   :  { %867 = vperm.xlu1 %5318, %v814_v50  }
  0x8c   :  { %1130 = vperm.xlu0 %5317, %v5521_v27   ;;  %v97_v27 = vld [vmem:[%s6866_s0 + $0x168] sm:$0xff] }
  0x8d   :  { %199 = vst.msk [vmem:[#allocation2 + $0x178] sm:$0xff] %vm47_vm0, %v97_v27 }
  0x8e   :  { %v858_v54 = vpop.permute.xlu1 %857 }
  0x8f   :  { %v303_v55 = vpop.permute.xlu0 %302  ;;  %1408 = vperm.xlu1 %5318, %v5529_v29   ;;  %v5915_v29 = vld [vmem:[#allocation2 + $0x138] sm:$0xff] }
  0x90   :  { %882 = vperm.xlu0 %5317, %v817_v53   ;;  %v466_v13 = vmul.f32 %v5930_v6, %v303_v55  ;;  %v115_v55 = vld [vmem:[%s6866_s0 + $0x1f8] sm:$0xff] }
  0x91   :  { %217 = vst.msk [vmem:[#allocation2 + $0x208] sm:$0xff] %vm47_vm0, %v115_v55 }
  0x92   :  { %v5908_v59 = vpop.permute.xlu1 %317 }
  0x93   :  { %v581_v61 = vpop.permute.xlu0 %580  ;;  %620 = vperm.xlu1 %5318, %v5903_v57  }
  0x94   :  { %342 = vperm.xlu0 %5317, %v5905_v58   ;;  %v744_v10 = vmul.f32 %v5921_v2, %v581_v61 }
  0x96   :  { %v5923_v3 = vpop.permute.xlu1 %332  ;;  %v778_v17 = vadd.f32 %v744_v10, %v466_v13 }
  0x97   :  { %v596_v4 = vpop.permute.xlu0 %595  ;;  %357 = vperm.xlu1 %5318, %v5915_v29  }
  0x98   :  { %1145 = vperm.xlu0 %5317, %v5527_v28   ;;  %v5941_v28 = vld [vmem:[%s6867_s1 + $0x2] ss:$0 sm:$0xff] }
  0x99   :  { %v1021_v24 = vmul.f32 %v5941_v28, %v858_v54 }
  0x9a   :  { %v1136_v11 = vpop.permute.xlu1 %1135 }
  0x9b   :  { %v611_v12 = vpop.permute.xlu0 %610  ;;  %1160 = vperm.xlu1 %5318, %v5533_v30   ;;  %v1299_v25 = vmul.f32 %v5946_v14, %v1136_v11  ;;  %v1055_v35 = vadd.f32 %v1021_v24, %v778_v17  ;;  %v747_v11 = vmul.f32 %v5921_v2, %v596_v4  ;;  %v469_v17 = vmul.f32 %v5930_v6, %v5908_v59 }
  0x9c   :  { %635 = vperm.xlu0 %5317, %v5932_v9  }
  0x9d   :  { %v1333_v41 = vadd.f32 %v1299_v25, %v1055_v35  ;;  %v750_v25 = vmul.f32 %v5921_v2, %v611_v12 }
  0x9e   :  { %v888_v30 = vpop.permute.xlu1 %887 }
  0x9f   :  { %v873_v23 = vpop.permute.xlu0 %872  ;;  %1423 = vperm.xlu1 %5318, %v5535_v31   ;;  %v106_v31 = vld [vmem:[%s6866_s0 + $0x1b0] sm:$0xff] }
  0xa0   :  { %897 = vperm.xlu0 %5317, %v820_v16   ;;  %208 = vst.msk [vmem:[#allocation2 + $0x1c0] sm:$0xff] %vm47_vm0, %v106_v31  ;;  %v5998_v16 = vld [vmem:[#allocation2 + $0x1d0] sm:$0xff]  ;;  %v1024_v24 = vmul.f32 %v5941_v28, %v873_v23 }
  0xa2   :  { %v5962_v36 = vpop.permute.xlu1 %347 }
  0xa3   :  { %v1414_v40 = vpop.permute.xlu0 %1413  ;;  %1438 = vperm.xlu1 %5318, %v5537_v33  }
  0xa4   :  { %v1577_v42 = vmul.f32 %v5960_v26, %v1414_v40  ;;  %912 = vperm.xlu0 %5317, %v823_v32   ;;  %v781_v40 = vadd.f32 %v747_v11, %v469_v17 }
  0xa6   :  { %v1611_v50 = vadd.f32 %v1577_v42, %v1333_v41  ;;  %v1151_v53 = vpop.permute.xlu1 %1150  ;;  %v826_v41 = vld [vmem:[#allocation2 + $0x190] sm:$0xff]  ;;  %v1027_v42 = vmul.f32 %v5941_v28, %v888_v30  ;;  %v1058_v59 = vadd.f32 %v1024_v24, %v781_v40 }
  0xa7   :  { %v5979_v54 = vpop.permute.xlu0 %625  ;;  %650 = vperm.xlu1 %5318, %v5974_v44   ;;  %v1302_v4 = vmul.f32 %v5946_v14, %v1151_v53  ;;  %v829_v53 = vld [vmem:[#allocation2 + $0x1d8] sm:$0xff]  ;;  %v6026_v40 = vld [vmem:[#allocation2 + $0x210] sm:$0xff] }
  0xa8   :  { %v1652_v33 = vadd.f32 %v5972_v43, %v1611_v50  ;;  %372 = vperm.xlu0 %5317, %v5976_v45  }
  0xa9   :  { %v1336_v12 = vadd.f32 %v1302_v4, %v1058_v59  ;;  %v6037_v59 = vld [vmem:[#allocation2 + $0x258] sm:$0xff] }
  0xaa   :  { %vm1686_vm2 = vcmp.ge.f32.partialorder %v1652_v33, 0.0  ;;  %v1720_v61 = vmul.f32 0.1, %v1652_v33  ;;  %v5990_v27 = vpop.permute.xlu1 %640 }
  0xab   :  { %v5992_v10 = vpop.permute.xlu0 %362  ;;  %387 = vperm.xlu1 %5318, %v5987_v56  }
  0xac   :  { %v1754_v13 = vsel %vm1686_vm2, %v1652_v33, %v1720_v61  ;;  %1175 = vperm.xlu0 %5317, %v5638_v60   ;;  %v472_v60 = vmul.f32 %v5930_v6, %v5923_v3 }
  0xad   :  { %1795 = vst.msk [vmem:[#allocation3 + $0x20] sm:$0xff] %vm1786_vm1, %v1754_v13 }
  0xae   :  { %v903_v32 = vpop.permute.xlu1 %902  ;;  %v784_v31 = vadd.f32 %v750_v25, %v472_v60  ;;  %v6023_v25 = vld [vmem:[#allocation2 + $0x218] sm:$0xff] }
  0xaf   :  { %v1166_v35 = vpop.permute.xlu0 %1165  ;;  %1190 = vperm.xlu1 %5318, %v5645_v1  }
  0xb0   :  { %665 = vperm.xlu0 %5317, %v5998_v16   ;;  %v1305_v33 = vmul.f32 %v5946_v14, %v1166_v35  ;;  %v1061_v3 = vadd.f32 %v1027_v42, %v784_v31  ;;  %v133_v42 = vld [vmem:[%s6866_s0 + $0x288] sm:$0xff] }
  0xb1   :  { %235 = vst.msk [vmem:[#allocation2 + $0x298] sm:$0xff] %vm47_vm0, %v133_v42 }
  0xb2   :  { %v918_v23 = vpop.permute.xlu1 %917  ;;  %v1339_v13 = vadd.f32 %v1305_v33, %v1061_v3  ;;  %v753_v33 = vmul.f32 %v5921_v2, %v5979_v54  ;;  %v6052_v3 = vld [vmem:[#allocation2 + $0x260] sm:$0xff]  ;;  %v756_v54 = vmul.f32 %v5921_v2, %v5990_v27 }
  0xb3   :  { %v1429_v50 = vpop.permute.xlu0 %1428  ;;  %1453 = vperm.xlu1 %5318, %v5641_v63   ;;  %v124_v63 = vld [vmem:[%s6866_s0 + $0x240] sm:$0xff] }
  0xb4   :  { %v1580_v55 = vmul.f32 %v5960_v26, %v1429_v50  ;;  %927 = vperm.xlu0 %5317, %v826_v41   ;;  %v1842_v1 = vld [vmem:[#allocation3 + $0x20] sm:$0xff]  ;;  %226 = vst.msk [vmem:[#allocation2 + $0x250] sm:$0xff] %vm47_vm0, %v124_v63 }
  0xb5   :  { %4808 = vmatmul.mubr.msk.f32.vlgmr.msra.gmra.mrb[0].mxu0 %vm1786_vm1, %v1842_v1  ;;  %v475_v1 = vmul.f32 %v5930_v6, %v5962_v36  ;;  %v832_v63 = vld [vmem:[#allocation2 + $0x220] sm:$0xff] }
  0xb6   :  { %v1614_v61 = vadd.f32 %v1580_v55, %v1336_v12  ;;  %4826 = vmatpush3.msra.mxu0 %v5951_v22  ;;  %v6015_v30 = vpop.permute.xlu1 %377 }
  0xb7   :  { %v1444_v11 = vpop.permute.xlu0 %1443  ;;  %1468 = vperm.xlu1 %5318, %v5643_v0  }
  0xb8   :  { %v1655_v17 = vadd.f32 %v5972_v43, %v1614_v61  ;;  %v1583_v24 = vmul.f32 %v5960_v26, %v1444_v11  ;;  %942 = vperm.xlu0 %5317, %v829_v53   ;;  %v1030_v53 = vmul.f32 %v5941_v28, %v903_v32  ;;  %v1033_v32 = vmul.f32 %v5941_v28, %v918_v23 }
  0xba   :  { %vm1689_vm3 = vcmp.ge.f32.partialorder %v1655_v17, 0.0  ;;  %v1723_v22 = vmul.f32 0.1, %v1655_v17  ;;  %v1617_v35 = vadd.f32 %v1583_v24, %v1339_v13  ;;  %v1181_v4 = vpop.permute.xlu1 %1180  ;;  %v787_v13 = vadd.f32 %v753_v33, %v475_v1 }
  0xbb   :  { %v6028_v60 = vpop.permute.xlu0 %655  ;;  %680 = vperm.xlu1 %5318, %v6023_v25   ;;  %v1308_v24 = vmul.f32 %v5946_v14, %v1181_v4 }
  0xbc   :  { %v1757_v41 = vsel %vm1689_vm3, %v1655_v17, %v1723_v22  ;;  %v1658_v0 = vadd.f32 %v5972_v43, %v1617_v35  ;;  %402 = vperm.xlu0 %5317, %v6026_v40   ;;  %v478_v17 = vmul.f32 %v5930_v6, %v5992_v10  ;;  %v1064_v36 = vadd.f32 %v1030_v53, %v787_v13 }
  0xbd   :  { %1798 = vst.msk [vmem:[#allocation3 + $0x38] sm:$0xff] %vm1786_vm1, %v1757_v41 }
  0xbe   :  { %vm1692_vm4 = vcmp.ge.f32.partialorder %v1658_v0, 0.0  ;;  %v1726_v31 = vmul.f32 0.1, %v1658_v0  ;;  %v6040_v50 = vpop.permute.xlu1 %670  ;;  %v790_v41 = vadd.f32 %v756_v54, %v478_v17  ;;  %v1342_v27 = vadd.f32 %v1308_v24, %v1064_v36  ;;  %v6078_v17 = vld [vmem:[#allocation2 + $0x2a0] sm:$0xff] }
  0xbf   :  { %v6042_v12 = vpop.permute.xlu0 %392  ;;  %417 = vperm.xlu1 %5318, %v6037_v59  }
  0xc0   :  { %v1760_v55 = vsel %vm1692_vm4, %v1658_v0, %v1726_v31  ;;  %1205 = vperm.xlu0 %5317, %v5747_v34   ;;  %v1067_v4 = vadd.f32 %v1033_v32, %v790_v41  ;;  %v835_v31 = vld [vmem:[#allocation2 + $0x268] sm:$0xff]  ;;  %v151_v32 = vld [vmem:[%s6866_s0 + $0x318] sm:$0xff] }
  0xc1   :  { %1801 = vst.msk [vmem:[#allocation3 + $0x50] sm:$0xff] %vm1786_vm1, %v1760_v55 }
  0xc2   :  { %v933_v61 = vpop.permute.xlu1 %932  ;;  %253 = vst.msk [vmem:[#allocation2 + $0x328] sm:$0xff] %vm47_vm0, %v151_v32 }
  0xc3   :  { %v1196_v11 = vpop.permute.xlu0 %1195  ;;  %1220 = vperm.xlu1 %5318, %v5803_v52  }
  0xc4   :  { %v1843_v34 = vld [vmem:[#allocation3 + $0x38] sm:$0xff]  ;;  %695 = vperm.xlu0 %5317, %v6052_v3   ;;  %v1311_v0 = vmul.f32 %v5946_v14, %v1196_v11  ;;  %v6075_v11 = vld [vmem:[#allocation2 + $0x2a8] sm:$0xff] }
  0xc5   :  { %4810 = vmatprep.mubr.msk.f32.mxu0 %vm1786_vm1, %v1843_v34 }
  0xc6   :  { %v948_v22 = vpop.permute.xlu1 %947  ;;  %v1345_v55 = vadd.f32 %v1311_v0, %v1067_v4  ;;  %v759_v0 = vmul.f32 %v5921_v2, %v6028_v60  ;;  %v481_v4 = vmul.f32 %v5930_v6, %v6015_v30 }
  0xc7   :  { %v1459_v35 = vpop.permute.xlu0 %1458  ;;  %1483 = vperm.xlu1 %5318, %v5753_v38   ;;  %v142_v38 = vld [vmem:[%s6866_s0 + $0x2d0] sm:$0xff] }
  0xc8   :  { %v1586_v10 = vmul.f32 %v5960_v26, %v1459_v35  ;;  %v1844_v52 = vld [vmem:[#allocation3 + $0x50] sm:$0xff]  ;;  %957 = vperm.xlu0 %5317, %v832_v63   ;;  %244 = vst.msk [vmem:[#allocation2 + $0x2e0] sm:$0xff] %vm47_vm0, %v142_v38  ;;  %v6089_v63 = vld [vmem:[#allocation2 + $0x2e8] sm:$0xff] }
  0xc9   :  { %4811 = vmatmul.mubr.msk.f32.gmra.mrb[2].mxu0 %vm1786_vm1, %v1844_v52  ;;  %v152_v52 = vld [vmem:[%s6866_s0 + $0x320] sm:$0xff] }
  0xca   :  { %v1620_v42 = vadd.f32 %v1586_v10, %v1342_v27  ;;  %v6067_v33 = vpop.permute.xlu1 %407  ;;  %254 = vst.msk [vmem:[#allocation2 + $0x330] sm:$0xff] %vm47_vm0, %v152_v52 }
  0xcb   :  { %v1474_v23 = vpop.permute.xlu0 %1473  ;;  %1498 = vperm.xlu1 %5318, %v5801_v51  }
  0xcc   :  { %v1661_v1 = vadd.f32 %v5972_v43, %v1620_v42  ;;  %v1589_v53 = vmul.f32 %v5960_v26, %v1474_v23  ;;  %972 = vperm.xlu0 %5317, %v835_v31   ;;  %v1036_v42 = vmul.f32 %v5941_v28, %v933_v61  ;;  %v6108_v31 = vld [vmem:[#allocation2 + $0x2f0] sm:$0xff]  ;;  %v1039_v61 = vmul.f32 %v5941_v28, %v948_v22 }
  0xce   :  { %vm1695_vm5 = vcmp.ge.f32.partialorder %v1661_v1, 0.0  ;;  %v1729_v13 = vmul.f32 0.1, %v1661_v1  ;;  %v1623_v54 = vadd.f32 %v1589_v53, %v1345_v55  ;;  %v1211_v24 = vpop.permute.xlu1 %1210  ;;  %v793_v55 = vadd.f32 %v759_v0, %v481_v4  ;;  %v841_v0 = vld [vmem:[#allocation2 + $0x2f8] sm:$0xff] }
  0xcf   :  { %v6080_v34 = vpop.permute.xlu0 %685  ;;  %710 = vperm.xlu1 %5318, %v6075_v11   ;;  %v484_v53 = vmul.f32 %v5930_v6, %v6042_v12 }
  0xd0   :  { %v1763_v36 = vsel %vm1695_vm5, %v1661_v1, %v1729_v13  ;;  %v1664_v51 = vadd.f32 %v5972_v43, %v1623_v54  ;;  %432 = vperm.xlu0 %5317, %v6078_v17   ;;  %v762_v1 = vmul.f32 %v5921_v2, %v6040_v50  ;;  %v1070_v30 = vadd.f32 %v1036_v42, %v793_v55  ;;  %v838_v13 = vld [vmem:[#allocation2 + $0x2b0] sm:$0xff] }
  0xd1   :  { %1804 = vst.msk [vmem:[#allocation3 + $0x68] sm:$0xff] %vm1786_vm1, %v1763_v36 }
  0xd2   :  { %vm1698_vm6 = vcmp.ge.f32.partialorder %v1664_v51, 0.0  ;;  %v1732_v35 = vmul.f32 0.1, %v1664_v51  ;;  %v6092_v41 = vpop.permute.xlu1 %700 }
  0xd3   :  { %v6094_v27 = vpop.permute.xlu0 %422  ;;  %447 = vperm.xlu1 %5318, %v6089_v63  }
  0xd4   :  { %v1766_v10 = vsel %vm1698_vm6, %v1664_v51, %v1732_v35  ;;  %1235 = vperm.xlu0 %5317, %v5822_v62   ;;  %v1314_v62 = vmul.f32 %v5946_v14, %v1211_v24  ;;  %v796_v51 = vadd.f32 %v762_v1, %v484_v53  ;;  %v255_v1 = vld [vmem:[#allocation2] sm:$0xff] }
  0xd5   :  { %1807 = vst.msk [vmem:[#allocation3 + $0x80] sm:$0xff] %vm1786_vm1, %v1766_v10 }
  0xd6   :  { %v963_v60 = vpop.permute.xlu1 %962  ;;  %v1348_v50 = vadd.f32 %v1314_v62, %v1070_v30  ;;  %v1073_v24 = vadd.f32 %v1039_v61, %v796_v51  ;;  %v258_v61 = vld [vmem:[#allocation2 + $0x48] sm:$0xff]  ;;  %v765_v51 = vmul.f32 %v5921_v2, %v6080_v34  ;;  %v490_v34 = vmul.f32 %v5930_v6, %v6094_v27 }
  0xd7   :  { %v1226_v23 = vpop.permute.xlu0 %1225  ;;  %1250 = vperm.xlu1 %5318, %v5839_v8  }
  0xd8   :  { %v1845_v38 = vld [vmem:[#allocation3 + $0x68] sm:$0xff]  ;;  %725 = vperm.xlu0 %5317, %v6108_v31   ;;  %v1317_v32 = vmul.f32 %v5946_v14, %v1226_v23 }
  0xd9   :  { %4813 = vmatprep.mubr.msk.f32.mxu0 %vm1786_vm1, %v1845_v38  ;;  %v533_v23 = vld [vmem:[#allocation2 + $0x8] sm:$0xff] }
  0xda   :  { %v978_v54 = vpop.permute.xlu1 %977  ;;  %v1351_v52 = vadd.f32 %v1317_v32, %v1073_v24  ;;  %v487_v32 = vmul.f32 %v5930_v6, %v6067_v33 }
  0xdb   :  { %v1489_v36 = vpop.permute.xlu0 %1488  ;;  %1513 = vperm.xlu1 %5318, %v5830_v5  }
  0xdc   :  { %v1592_v12 = vmul.f32 %v5960_v26, %v1489_v36  ;;  %v1846_v8 = vld [vmem:[#allocation3 + $0x80] sm:$0xff]  ;;  %987 = vperm.xlu0 %5317, %v838_v13  }
  0xdd   :  { %4814 = vmatmul.mubr.msk.f32.gmra.mrb[4].mxu0 %vm1786_vm1, %v1846_v8  ;;  %v536_v8 = vld [vmem:[#allocation2 + $0x50] sm:$0xff] }
  0xde   :  { %v1626_v35 = vadd.f32 %v1592_v12, %v1348_v50  ;;  %v6123_v10 = vpop.permute.xlu1 %437  ;;  %v1042_v12 = vmul.f32 %v5941_v28, %v963_v60  ;;  %v1045_v60 = vmul.f32 %v5941_v28, %v978_v54 }
  0xdf   :  { %v1504_v22 = vpop.permute.xlu0 %1503  ;;  %1528 = vperm.xlu1 %5318, %v5837_v7  }
  0xe0   :  { %v1667_v4 = vadd.f32 %v5972_v43, %v1626_v35  ;;  %v1595_v42 = vmul.f32 %v5960_v26, %v1504_v22  ;;  %1002 = vperm.xlu0 %5317, %v841_v0   ;;  %v799_v0 = vadd.f32 %v765_v51, %v487_v32  ;;  %v768_v22 = vmul.f32 %v5921_v2, %v6092_v41  ;;  %v539_v32 = vld [vmem:[#allocation2 + $0x98] sm:$0xff] }
  0xe2   :  { %vm1701_vm7 = vcmp.ge.f32.partialorder %v1667_v4, 0.0  ;;  %v1735_v5 = vmul.f32 0.1, %v1667_v4  ;;  %v1629_v55 = vadd.f32 %v1595_v42, %v1351_v52  ;;  %v1241_v53 = vpop.permute.xlu1 %1240  ;;  %v1076_v33 = vadd.f32 %v1042_v12, %v799_v0  ;;  %v261_v0 = vld [vmem:[#allocation2 + $0x90] sm:$0xff] }
  0xe3   :  { %v716_v62 = vpop.permute.xlu0 %715  ;;  %570 = vperm.xlu1 %5318, %v533_v23   ;;  %v1320_v52 = vmul.f32 %v5946_v14, %v1241_v53 }
  0xe4   :  { %v1769_v38 = vsel %vm1701_vm7, %v1667_v4, %v1735_v5  ;;  %v1670_v30 = vadd.f32 %v5972_v43, %v1629_v55  ;;  %292 = vperm.xlu0 %5317, %v255_v1   ;;  %v810_v4 = vld [vmem:[#allocation2 + $0x10] sm:$0xff]  ;;  %v802_v5 = vadd.f32 %v768_v22, %v490_v34 }
  0xe5   :  { %1810 = vst.msk [vmem:[#allocation3 + $0x98] sm:$0xff] %vm1786_vm1, %v1769_v38  ;;  %v1354_v55 = vadd.f32 %v1320_v52, %v1076_v33  ;;  %v813_v38 = vld [vmem:[#allocation2 + $0x58] sm:$0xff] }
  0xe6   :  { %vm1704_vm8 = vcmp.ge.f32.partialorder %v1670_v30, 0.0  ;;  %v1738_v13 = vmul.f32 0.1, %v1670_v30  ;;  %v731_v36 = vpop.permute.xlu1 %730 }
  0xe7   :  { %v453_v7 = vpop.permute.xlu0 %452  ;;  %307 = vperm.xlu1 %5318, %v258_v61   ;;  %v771_v61 = vmul.f32 %v5921_v2, %v716_v62  ;;  %v774_v62 = vmul.f32 %v5921_v2, %v731_v36 }
  0xe8   :  { %v1772_v50 = vsel %vm1704_vm8, %v1670_v30, %v1738_v13  ;;  %1265 = vperm.xlu0 %5317, %v5852_v15   ;;  %v496_v22 = vmul.f32 %v5930_v6, %v453_v7 }
  0xe9   :  { %1813 = vst.msk [vmem:[#allocation3 + $0xb0] sm:$0xff] %vm1786_vm1, %v1772_v50 }
  0xea   :  { %v993_v24 = vpop.permute.xlu1 %992 }
  0xeb   :  { %v1256_v35 = vpop.permute.xlu0 %1255  ;;  %1280 = vperm.xlu1 %5318, %v5860_v21   ;;  %v1079_v21 = vadd.f32 %v1045_v60, %v802_v5  ;;  %v1048_v12 = vmul.f32 %v5941_v28, %v993_v24  ;;  %v264_v24 = vld [vmem:[#allocation2 + $0xd8] sm:$0xff] }
  0xec   :  { %v1847_v15 = vld [vmem:[#allocation3 + $0x98] sm:$0xff]  ;;  %585 = vperm.xlu0 %5317, %v536_v8   ;;  %v1323_v41 = vmul.f32 %v5946_v14, %v1256_v35 }
  0xed   :  { %4816 = vmatprep.mubr.msk.f32.mxu0 %vm1786_vm1, %v1847_v15 }
  0xee   :  { %v1008_v42 = vpop.permute.xlu1 %1007  ;;  %v1357_v13 = vadd.f32 %v1323_v41, %v1079_v21 }
  0xef   :  { %v1519_v23 = vpop.permute.xlu0 %1518  ;;  %1543 = vperm.xlu1 %5318, %v5855_v18   ;;  %v493_v18 = vmul.f32 %v5930_v6, %v6123_v10 }
  0xf0   :  { %v1598_v27 = vmul.f32 %v5960_v26, %v1519_v23  ;;  %v1848_v1 = vld [vmem:[#allocation3 + $0xb0] sm:$0xff]  ;;  %847 = vperm.xlu0 %5317, %v810_v4   ;;  %v1051_v4 = vmul.f32 %v5941_v28, %v1008_v42  ;;  %v808_v23 = vadd.f32 %v774_v62, %v496_v22  ;;  %v819_v62 = vld [vmem:[#allocation2 + $0xe8] sm:$0xff] }
  0xf1   :  { %4817 = vmatmul.mubr.msk.f32.gmra.mrb[6].mxu0 %vm1786_vm1, %v1848_v1  ;;  %v805_v15 = vadd.f32 %v771_v61, %v493_v18 }
  0xf2   :  { %v1632_v53 = vadd.f32 %v1598_v27, %v1354_v55  ;;  %v1271_v30 = vpop.permute.xlu1 %1270  ;;  %v1085_v21 = vadd.f32 %v1051_v4, %v808_v23 }
  0xf3   :  { %v1534_v54 = vpop.permute.xlu0 %1533  ;;  %1558 = vperm.xlu1 %5318, %v5858_v20   ;;  %v1326_v20 = vmul.f32 %v5946_v14, %v1271_v30  ;;  %v1082_v60 = vadd.f32 %v1048_v12, %v805_v15 }
  0xf4   :  { %v1673_v51 = vadd.f32 %v5972_v43, %v1632_v53  ;;  %v1601_v50 = vmul.f32 %v5960_v26, %v1534_v54  ;;  %862 = vperm.xlu0 %5317, %v813_v38   ;;  %v542_v38 = vld [vmem:[#allocation2 + $0xe0] sm:$0xff] }
  0xf5   :  { %v1360_v55 = vadd.f32 %v1326_v20, %v1082_v60  ;;  %v267_v60 = vld [vmem:[#allocation2 + $0x120] sm:$0xff] }
  0xf6   :  { %vm1707_vm9 = vcmp.ge.f32.partialorder %v1673_v51, 0.0  ;;  %v1741_v8 = vmul.f32 0.1, %v1673_v51  ;;  %v1635_v35 = vadd.f32 %v1601_v50, %v1357_v13  ;;  %v576_v34 = vpop.permute.xlu1 %575 }
  0xf7   :  { %v298_v52 = vpop.permute.xlu0 %297  ;;  %600 = vperm.xlu1 %5318, %v539_v32  }
  0xf8   :  { %v1775_v33 = vsel %vm1707_vm9, %v1673_v51, %v1741_v8  ;;  %v1676_v10 = vadd.f32 %v5972_v43, %v1635_v35  ;;  %322 = vperm.xlu0 %5317, %v261_v0   ;;  %v465_v20 = vmul.f32 %v5930_v6, %v298_v52 }
  0xf9   :  { %1816 = vst.msk [vmem:[#allocation3 + $0xc8] sm:$0xff] %vm1786_vm1, %v1775_v33  ;;  %v743_v33 = vmul.f32 %v5921_v2, %v576_v34  ;;  %v270_v34 = vld [vmem:[#allocation2 + $0x168] sm:$0xff] }
  0xfa   :  { %vm1710_vm10 = vcmp.ge.f32.partialorder %v1676_v10, 0.0  ;;  %v1744_v36 = vmul.f32 0.1, %v1676_v10  ;;  %v1549_v7 = vpop.permute.xlu1 %1548 }
  0xfb   :  { %v1286_v5 = vpop.permute.xlu0 %1285  ;;  %v1604_v27 = vmul.f32 %v5960_v26, %v1549_v7  ;;  %337 = vperm.xlu1 %5318, %v264_v24   ;;  %v777_v23 = vadd.f32 %v743_v33, %v465_v20 }
  0xfc   :  { %v1778_v41 = vsel %vm1710_vm10, %v1676_v10, %v1744_v36  ;;  %v1329_v1 = vmul.f32 %v5946_v14, %v1286_v5  ;;  %1125 = vperm.xlu0 %5317, %v5874_v39   ;;  %v816_v39 = vld [vmem:[#allocation2 + $0xa0] sm:$0xff] }
  0xfd   :  { %1819 = vst.msk [vmem:[#allocation3 + $0xe0] sm:$0xff] %vm1786_vm1, %v1778_v41  ;;  %v1638_v53 = vadd.f32 %v1604_v27, %v1360_v55  ;;  %v1827_v41 = vld [vmem:[#allocation3] sm:$0xff] }
  0xfe   :  { %v1564_v42 = vpop.permute.xlu1 %1563  ;;  %v1363_v61 = vadd.f32 %v1329_v1, %v1085_v21 }
  0xff   :  { %v853_v30 = vpop.permute.xlu0 %852  ;;  %v1679_v54 = vadd.f32 %v5972_v43, %v1638_v53  ;;  %v1607_v13 = vmul.f32 %v5960_v26, %v1564_v42  ;;  %1140 = vperm.xlu1 %5318, %v5887_v47  }
 0x100   :  { %v1849_v51 = vld [vmem:[#allocation3 + $0xc8] sm:$0xff]  ;;  %615 = vperm.xlu0 %5317, %v542_v38   ;;  %v1020_v24 = vmul.f32 %v5941_v28, %v853_v30  ;;  %v548_v38 = vld [vmem:[#allocation2 + $0x170] sm:$0xff] }
 0x101   :  { %4819 = vmatprep.mubr.msk.f32.mxu0 %vm1786_vm1, %v1849_v51  ;;  %vm1713_vm11 = vcmp.ge.f32.partialorder %v1679_v54, 0.0  ;;  %v1747_v50 = vmul.f32 0.1, %v1679_v54  ;;  %v1641_v18 = vadd.f32 %v1607_v13, %v1363_v61  ;;  %v822_v13 = vld [vmem:[#allocation2 + $0x130] sm:$0xff] }
 0x102   :  { %v591_v32 = vpop.permute.xlu1 %590  ;;  %v1054_v52 = vadd.f32 %v1020_v24, %v777_v23 }
 0x103   :  { %v313_v12 = vpop.permute.xlu0 %312  ;;  %v1781_v8 = vsel %vm1713_vm11, %v1679_v54, %v1747_v50  ;;  %v1682_v35 = vadd.f32 %v5972_v43, %v1641_v18  ;;  %1403 = vperm.xlu1 %5318, %v5872_v37   ;;  %v545_v37 = vld [vmem:[#allocation2 + $0x128] sm:$0xff]  ;;  %v2188_v50 = vld [vmem:[%s6869_s3 + $0x10] sm:$0xff]  ;;  %v746_v18 = vmul.f32 %v5921_v2, %v591_v32 }
 0x104   :  { %v1850_v0 = vld [vmem:[#allocation3 + $0xe0] sm:$0xff]  ;;  %1822 = vst.msk [vmem:[#allocation3 + $0xf8] sm:$0xff] %vm1786_vm1, %v1781_v8  ;;  %877 = vperm.xlu0 %5317, %v816_v39   ;;  %v468_v39 = vmul.f32 %v5930_v6, %v313_v12  ;;  %4845 = vmatprep.subr.mxu0 %v2188_v50 }
 0x105   :  { %4820 = vmatmul.mubr.msk.f32.gmra.mrb[8].mxu0 %vm1786_vm1, %v1850_v0  ;;  %vm1716_vm12 = vcmp.ge.f32.partialorder %v1682_v35, 0.0  ;;  %v1750_v47 = vmul.f32 0.1, %v1682_v35 }
 0x106   :  { %v606_v22 = vpop.permute.xlu1 %605 }
 0x107   :  { %v328_v15 = vpop.permute.xlu0 %327  ;;  %v1784_v10 = vsel %vm1716_vm12, %v1682_v35, %v1750_v47  ;;  %1418 = vperm.xlu1 %5318, %v5885_v46   ;;  %v825_v35 = vld [vmem:[#allocation2 + $0x178] sm:$0xff]  ;;  %v749_v33 = vmul.f32 %v5921_v2, %v606_v22 }
 0x108   :  { %1825 = vst.msk [vmem:[#allocation3 + $0x110] sm:$0xff] %vm1786_vm1, %v1784_v10  ;;  %892 = vperm.xlu0 %5317, %v819_v62   ;;  %v780_v62 = vadd.f32 %v746_v18, %v468_v39  ;;  %v471_v20 = vmul.f32 %v5930_v6, %v328_v15 }
 0x10a   :  { %v868_v4 = vpop.permute.xlu1 %867 }
 0x10b   :  { %v1131_v36 = vpop.permute.xlu0 %1130  ;;  %630 = vperm.xlu1 %5318, %v545_v37   ;;  %v1851_v5 = vld [vmem:[#allocation3 + $0xf8] sm:$0xff]  ;;  %v273_v37 = vld [vmem:[#allocation2 + $0x1b0] sm:$0xff] }
 0x10c   :  { %v1298_v7 = vmul.f32 %v5946_v14, %v1131_v36  ;;  %352 = vperm.xlu0 %5317, %v267_v60   ;;  %4822 = vmatprep.mubr.msk.f32.mxu0 %vm1786_vm1, %v1851_v5 }
 0x10e   :  { %v1409_v46 = vpop.permute.xlu1 %1408  ;;  %v1332_v27 = vadd.f32 %v1298_v7, %v1054_v52 }
 0x10f   :  { %v883_v55 = vpop.permute.xlu0 %882  ;;  %v1576_v1 = vmul.f32 %v5960_v26, %v1409_v46  ;;  %367 = vperm.xlu1 %5318, %v270_v34   ;;  %v1852_v21 = vld [vmem:[#allocation3 + $0x110] sm:$0xff] }
 0x110   :  { %1155 = vperm.xlu0 %5317, %v5894_v49   ;;  %4823 = vmatmul.mubr.msk.f32.gmra.mrb[10].mxu0 %vm1786_vm1, %v1852_v21  ;;  %v1026_v10 = vmul.f32 %v5941_v28, %v883_v55  ;;  %v554_v21 = vld [vmem:[#allocation2 + $0x200] sm:$0xff] }
 0x111   :  { %v1610_v53 = vadd.f32 %v1576_v1, %v1332_v27  ;;  %4827 = vmatprep.mubr.msk.f32.mxu0 %vm1786_vm1, %v1827_v41 }
 0x112   :  { %v6185_v42 = vpop.permute.xlu1 %620 }
 0x113   :  { %v6187_v30 = vpop.permute.xlu0 %342  ;;  %v1651_v54 = vadd.f32 %v5972_v43, %v1610_v53  ;;  %1170 = vperm.xlu1 %5318, %v5905_v58   ;;  %v1023_v58 = vmul.f32 %v5941_v28, %v868_v4  ;;  %v783_v4 = vadd.f32 %v749_v33, %v471_v20  ;;  %v752_v18 = vmul.f32 %v5921_v2, %v6185_v42 }
 0x114   :  { %645 = vperm.xlu0 %5317, %v548_v38   ;;  %v474_v39 = vmul.f32 %v5930_v6, %v6187_v30 }
 0x115   :  { %vm1685_vm13 = vcmp.ge.f32.partialorder %v1651_v54, 0.0  ;;  %v1719_v61 = vmul.f32 0.1, %v1651_v54  ;;  %v1057_v12 = vadd.f32 %v1023_v58, %v780_v62  ;;  %v1060_v7 = vadd.f32 %v1026_v10, %v783_v4  ;;  %v831_v58 = vld [vmem:[#allocation2 + $0x208] sm:$0xff] }
 0x116   :  { %v6191_v51 = vpop.permute.xlu1 %357  ;;  %v786_v62 = vadd.f32 %v752_v18, %v474_v39  ;;  %v837_v18 = vld [vmem:[#allocation2 + $0x298] sm:$0xff] }
 0x117   :  { %v1146_v49 = vpop.permute.xlu0 %1145  ;;  %v1753_v8 = vsel %vm1685_vm13, %v1651_v54, %v1719_v61  ;;  %1433 = vperm.xlu1 %5318, %v5892_v48   ;;  %v551_v48 = vld [vmem:[#allocation2 + $0x1b8] sm:$0xff]  ;;  %v477_v30 = vmul.f32 %v5930_v6, %v6191_v51  ;;  %v282_v51 = vld [vmem:[#allocation2 + $0x288] sm:$0xff] }
 0x118   :  { %1794 = vst.msk [vmem:[#allocation3 + $0x18] sm:$0xff] %vm1786_vm1, %v1753_v8  ;;  %907 = vperm.xlu0 %5317, %v822_v13   ;;  %v1301_v32 = vmul.f32 %v5946_v14, %v1146_v49  ;;  %v828_v49 = vld [vmem:[#allocation2 + $0x1c0] sm:$0xff] }
 0x11a   :  { %v1161_v0 = vpop.permute.xlu1 %1160  ;;  %v1335_v36 = vadd.f32 %v1301_v32, %v1057_v12  ;;  %v279_v12 = vld [vmem:[#allocation2 + $0x240] sm:$0xff] }
 0x11b   :  { %v636_v47 = vpop.permute.xlu0 %635  ;;  %1448 = vperm.xlu1 %5318, %v5903_v57   ;;  %v1304_v23 = vmul.f32 %v5946_v14, %v1161_v0  ;;  %v276_v57 = vld [vmem:[#allocation2 + $0x1f8] sm:$0xff] }
 0x11c   :  { %922 = vperm.xlu0 %5317, %v825_v35   ;;  %v755_v33 = vmul.f32 %v5921_v2, %v636_v47 }
 0x11d   :  { %v1338_v46 = vadd.f32 %v1304_v23, %v1060_v7 }
 0x11e   :  { %v1424_v24 = vpop.permute.xlu1 %1423 }
 0x11f   :  { %v898_v60 = vpop.permute.xlu0 %897  ;;  %v1579_v22 = vmul.f32 %v5960_v26, %v1424_v24  ;;  %660 = vperm.xlu1 %5318, %v551_v48   ;;  %v1828_v15 = vld [vmem:[#allocation3 + $0x18] sm:$0xff] }
 0x120   :  { %382 = vperm.xlu0 %5317, %v273_v37   ;;  %4828 = vmatmul.mubr.msk.f32.vlgmr.msra.gmra.mrb[0].mxu0 %vm1786_vm1, %v1828_v15  ;;  %v789_v37 = vadd.f32 %v755_v33, %v477_v30 }
 0x121   :  { %v1613_v5 = vadd.f32 %v1579_v22, %v1335_v36  ;;  %4846 = vmatpush3.msra.mxu0 %v2188_v50 }
 0x122   :  { %v1439_v34 = vpop.permute.xlu1 %1438 }
 0x123   :  { %v913_v52 = vpop.permute.xlu0 %912  ;;  %v1654_v55 = vadd.f32 %v5972_v43, %v1613_v5  ;;  %v1582_v41 = vmul.f32 %v5960_v26, %v1439_v34  ;;  %397 = vperm.xlu1 %5318, %v276_v57  }
 0x124   :  { %1185 = vperm.xlu0 %5317, %v5915_v29   ;;  %v1032_v48 = vmul.f32 %v5941_v28, %v913_v52 }
 0x125   :  { %vm1688_vm14 = vcmp.ge.f32.partialorder %v1654_v55, 0.0  ;;  %v1722_v27 = vmul.f32 0.1, %v1654_v55  ;;  %v1616_v1 = vadd.f32 %v1582_v41, %v1338_v46  ;;  %v560_v46 = vld [vmem:[#allocation2 + $0x290] sm:$0xff] }
 0x126   :  { %v6212_v53 = vpop.permute.xlu1 %650  ;;  %v1066_v36 = vadd.f32 %v1032_v48, %v789_v37 }
 0x127   :  { %v6214_v38 = vpop.permute.xlu0 %372  ;;  %v1756_v54 = vsel %vm1688_vm14, %v1654_v55, %v1722_v27  ;;  %v1657_v61 = vadd.f32 %v5972_v43, %v1616_v1  ;;  %1200 = vperm.xlu1 %5318, %v5976_v45   ;;  %v1029_v45 = vmul.f32 %v5941_v28, %v898_v60 }
 0x128   :  { %1797 = vst.msk [vmem:[#allocation3 + $0x30] sm:$0xff] %vm1786_vm1, %v1756_v54  ;;  %675 = vperm.xlu0 %5317, %v554_v21   ;;  %v834_v54 = vld [vmem:[#allocation2 + $0x250] sm:$0xff] }
 0x129   :  { %vm1691_vm15 = vcmp.ge.f32.partialorder %v1657_v61, 0.0  ;;  %v1725_v13 = vmul.f32 0.1, %v1657_v61  ;;  %v1063_v32 = vadd.f32 %v1029_v45, %v786_v62 }
 0x12a   :  { %v6219_v29 = vpop.permute.xlu1 %387 }
 0x12b   :  { %v1176_v50 = vpop.permute.xlu0 %1175  ;;  %v1759_v8 = vsel %vm1691_vm15, %v1657_v61, %v1725_v13  ;;  %1463 = vperm.xlu1 %5318, %v5932_v9   ;;  %v557_v9 = vld [vmem:[#allocation2 + $0x248] sm:$0xff]  ;;  %v758_v61 = vmul.f32 %v5921_v2, %v6212_v53  ;;  %v480_v13 = vmul.f32 %v5930_v6, %v6214_v38 }
 0x12c   :  { %1800 = vst.msk [vmem:[#allocation3 + $0x48] sm:$0xff] %vm1786_vm1, %v1759_v8  ;;  %937 = vperm.xlu0 %5317, %v828_v49   ;;  %v1307_v20 = vmul.f32 %v5946_v14, %v1176_v50 }
 0x12d   :  { %v792_v8 = vadd.f32 %v758_v61, %v480_v13  ;;  %v1121_v13 = vld [vmem:[#allocation2 + $0x330] sm:$0xff] }
 0x12e   :  { %v1191_v35 = vpop.permute.xlu1 %1190  ;;  %v1341_v24 = vadd.f32 %v1307_v20, %v1063_v32  ;;  %v285_v20 = vld [vmem:[#allocation2 + $0x2d0] sm:$0xff] }
 0x12f   :  { %v666_v0 = vpop.permute.xlu0 %665  ;;  %1478 = vperm.xlu1 %5318, %v5974_v44   ;;  %v6231_v42 = vld [vmem:[#allocation3 + $0x30] sm:$0xff]  ;;  %v1310_v44 = vmul.f32 %v5946_v14, %v1191_v35  ;;  %v483_v35 = vmul.f32 %v5930_v6, %v6219_v29  ;;  %v288_v6 = vld [vmem:[#allocation2 + $0x318] sm:$0xff] }
 0x130   :  { %952 = vperm.xlu0 %5317, %v831_v58   ;;  %4830 = vmatprep.mubr.msk.f32.mxu0 %vm1786_vm1, %v6231_v42  ;;  %v761_v45 = vmul.f32 %v5921_v2, %v666_v0 }
 0x131   :  { %v1344_v57 = vadd.f32 %v1310_v44, %v1066_v36 }
 0x132   :  { %v1454_v10 = vpop.permute.xlu1 %1453  ;;  %v795_v0 = vadd.f32 %v761_v45, %v483_v35 }
 0x133   :  { %v928_v47 = vpop.permute.xlu0 %927  ;;  %v1585_v60 = vmul.f32 %v5960_v26, %v1454_v10  ;;  %690 = vperm.xlu1 %5318, %v557_v9   ;;  %v6240_v4 = vld [vmem:[#allocation3 + $0x48] sm:$0xff] }
 0x134   :  { %412 = vperm.xlu0 %5317, %v279_v12   ;;  %4831 = vmatmul.mubr.msk.f32.gmra.mrb[2].mxu0 %vm1786_vm1, %v6240_v4 }
 0x135   :  { %v1619_v23 = vadd.f32 %v1585_v60, %v1341_v24  ;;  %v566_v60 = vld [vmem:[#allocation2 + $0x320] sm:$0xff] }
 0x136   :  { %v1469_v22 = vpop.permute.xlu1 %1468 }
 0x137   :  { %v943_v15 = vpop.permute.xlu0 %942  ;;  %v1660_v7 = vadd.f32 %v5972_v43, %v1619_v23  ;;  %v1588_v5 = vmul.f32 %v5960_v26, %v1469_v22  ;;  %427 = vperm.xlu1 %5318, %v282_v51  }
 0x138   :  { %1215 = vperm.xlu0 %5317, %v5987_v56   ;;  %v1038_v33 = vmul.f32 %v5941_v28, %v943_v15  ;;  %v840_v15 = vld [vmem:[#allocation2 + $0x2e0] sm:$0xff] }
 0x139   :  { %vm1694_vm0 = vcmp.ge.f32.partialorder %v1660_v7, 0.0  ;;  %v1728_v34 = vmul.f32 0.1, %v1660_v7  ;;  %v1622_v52 = vadd.f32 %v1588_v5, %v1344_v57  ;;  %v6294_v57 = vld [vmem:[%s6867_s1 + $0x1] ss:$0 sm:$0xff] }
 0x13a   :  { %v6247_v55 = vpop.permute.xlu1 %680  ;;  %v1072_v29 = vadd.f32 %v1038_v33, %v795_v0 }
 0x13b   :  { %v1762_v41 = vsel %vm1694_vm0, %v1660_v7, %v1728_v34  ;;  %v1663_v27 = vadd.f32 %v5972_v43, %v1622_v52  ;;  %v6250_v1 = vpop.permute.xlu0 %402  ;;  %1230 = vperm.xlu1 %5318, %v6026_v40   ;;  %v1035_v40 = vmul.f32 %v5941_v28, %v928_v47  ;;  %v6310_v52 = vld [vmem:[%s6867_s1 + $0x2] ss:$0 sm:$0xff] }
 0x13c   :  { %1803 = vst.msk [vmem:[#allocation3 + $0x60] sm:$0xff] %vm1786_vm1, %v1762_v41  ;;  %705 = vperm.xlu0 %5317, %v560_v46  }
 0x13d   :  { %vm1697_vm2 = vcmp.ge.f32.partialorder %v1663_v27, 0.0  ;;  %v1731_v21 = vmul.f32 0.1, %v1663_v27  ;;  %v1069_v62 = vadd.f32 %v1035_v40, %v792_v8 }
 0x13e   :  { %v6254_v56 = vpop.permute.xlu1 %417 }
 0x13f   :  { %v1765_v49 = vsel %vm1697_vm2, %v1663_v27, %v1731_v21  ;;  %v1206_v50 = vpop.permute.xlu0 %1205  ;;  %1493 = vperm.xlu1 %5318, %v5998_v16   ;;  %v563_v16 = vld [vmem:[#allocation2 + $0x2d8] sm:$0xff] }
 0x140   :  { %1806 = vst.msk [vmem:[#allocation3 + $0x78] sm:$0xff] %vm1786_vm1, %v1765_v49  ;;  %967 = vperm.xlu0 %5317, %v834_v54   ;;  %v1313_v58 = vmul.f32 %v5946_v14, %v1206_v50 }
 0x142   :  { %v1221_v39 = vpop.permute.xlu1 %1220  ;;  %v1347_v9 = vadd.f32 %v1313_v58, %v1069_v62 }
 0x143   :  { %v696_v53 = vpop.permute.xlu0 %695  ;;  %1508 = vperm.xlu1 %5318, %v6023_v25   ;;  %v6266_v38 = vld [vmem:[#allocation3 + $0x60] sm:$0xff]  ;;  %v1316_v30 = vmul.f32 %v5946_v14, %v1221_v39 }
 0x144   :  { %982 = vperm.xlu0 %5317, %v837_v18   ;;  %4833 = vmatprep.mubr.msk.f32.mxu0 %vm1786_vm1, %v6266_v38  ;;  %v767_v21 = vmul.f32 %v6294_v57, %v696_v53 }
 0x145   :  { %v1350_v10 = vadd.f32 %v1316_v30, %v1072_v29 }
 0x146   :  { %v1484_v2 = vpop.permute.xlu1 %1483 }
 0x147   :  { %v1591_v25 = vmul.f32 %v5960_v26, %v1484_v2  ;;  %v958_v32 = vpop.permute.xlu0 %957  ;;  %720 = vperm.xlu1 %5318, %v563_v16   ;;  %v6275_v48 = vld [vmem:[#allocation3 + $0x78] sm:$0xff]  ;;  %v6343_v2 = vld [vmem:[%s6868_s2] ss:$0 sm:$0xff] }
 0x148   :  { %442 = vperm.xlu0 %5317, %v285_v20   ;;  %4834 = vmatmul.mubr.msk.f32.gmra.mrb[4].mxu0 %vm1786_vm1, %v6275_v48  ;;  %v1041_v46 = vmul.f32 %v6310_v52, %v958_v32 }
 0x149   :  { %v1625_v12 = vadd.f32 %v1591_v25, %v1347_v9 }
 0x14a   :  { %v1499_v28 = vpop.permute.xlu1 %1498 }
 0x14b   :  { %v1666_v47 = vadd.f32 %v5972_v43, %v1625_v12  ;;  %v1594_v37 = vmul.f32 %v5960_v26, %v1499_v28  ;;  %v973_v14 = vpop.permute.xlu0 %972  ;;  %457 = vperm.xlu1 %5318, %v288_v6  }
 0x14c   :  { %1245 = vperm.xlu0 %5317, %v6037_v59   ;;  %v1044_v40 = vmul.f32 %v6310_v52, %v973_v14 }
 0x14d   :  { %vm1700_vm3 = vcmp.ge.f32.partialorder %v1666_v47, 0.0  ;;  %v1734_v24 = vmul.f32 0.1, %v1666_v47  ;;  %v1628_v44 = vadd.f32 %v1594_v37, %v1350_v10 }
 0x14e   :  { %v6282_v51 = vpop.permute.xlu1 %710 }
 0x14f   :  { %v1768_v36 = vsel %vm1700_vm3, %v1666_v47, %v1734_v24  ;;  %v1669_v23 = vadd.f32 %v5972_v43, %v1628_v44  ;;  %v6285_v22 = vpop.permute.xlu0 %432  ;;  %1260 = vperm.xlu1 %5318, %v6078_v17   ;;  %v764_v43 = vmul.f32 %v6294_v57, %v6247_v55  ;;  %v6301_v17 = vld [vmem:[%s6867_s1] ss:$0 sm:$0xff]  ;;  %v843_v55 = vld [vmem:[#allocation2 + $0x328] sm:$0xff]  ;;  %v770_v37 = vmul.f32 %v6294_v57, %v6282_v51 }
 0x150   :  { %1809 = vst.msk [vmem:[#allocation3 + $0x90] sm:$0xff] %vm1786_vm1, %v1768_v36  ;;  %735 = vperm.xlu0 %5317, %v566_v60   ;;  %v486_v7 = vmul.f32 %v6301_v17, %v6250_v1  ;;  %v6317_v1 = vld [vmem:[%s6867_s1 + $0x3] ss:$0 sm:$0xff]  ;;  %v489_v49 = vmul.f32 %v6301_v17, %v6254_v56  ;;  %v1399_v56 = vld [vmem:[#allocation2 + $0x338] sm:$0xff] }
 0x151   :  { %vm1703_vm4 = vcmp.ge.f32.partialorder %v1669_v23, 0.0  ;;  %v1737_v26 = vmul.f32 0.1, %v1669_v23  ;;  %v6359_v60 = vld [vmem:[%s6869_s3 + $0x18] sm:$0xff] }
 0x152   :  { %v6289_v59 = vpop.permute.xlu1 %447  ;;  %v798_v27 = vadd.f32 %v764_v43, %v486_v7  ;;  %v801_v39 = vadd.f32 %v767_v21, %v489_v49  ;;  %4865 = vmatprep.subr.mxu0 %v6359_v60 }
 0x153   :  { %v1771_v5 = vsel %vm1703_vm4, %v1669_v23, %v1737_v26  ;;  %v1236_v34 = vpop.permute.xlu0 %1235  ;;  %1523 = vperm.xlu1 %5318, %v6052_v3   ;;  %v495_v43 = vmul.f32 %v6301_v17, %v6289_v59 }
 0x154   :  { %1812 = vst.msk [vmem:[#allocation3 + $0xa8] sm:$0xff] %vm1786_vm1, %v1771_v5  ;;  %997 = vperm.xlu0 %5317, %v840_v15   ;;  %v1319_v3 = vmul.f32 %v6317_v1, %v1236_v34  ;;  %v1075_v50 = vadd.f32 %v1041_v46, %v798_v27  ;;  %v1078_v35 = vadd.f32 %v1044_v40, %v801_v39 }
 0x156   :  { %v1251_v41 = vpop.permute.xlu1 %1250  ;;  %v1353_v8 = vadd.f32 %v1319_v3, %v1075_v50 }
 0x157   :  { %v726_v54 = vpop.permute.xlu0 %725  ;;  %1538 = vperm.xlu1 %5318, %v6075_v11   ;;  %v6321_v61 = vld [vmem:[#allocation3 + $0x90] sm:$0xff]  ;;  %v1322_v45 = vmul.f32 %v6317_v1, %v1251_v41  ;;  %v6332_v11 = vld [vmem:[%s6867_s1 + $0x4] ss:$0 sm:$0xff] }
 0x158   :  { %1012 = vperm.xlu0 %5317, %v843_v55   ;;  %4836 = vmatprep.mubr.msk.f32.mxu0 %vm1786_vm1, %v6321_v61  ;;  %v773_v51 = vmul.f32 %v6294_v57, %v726_v54 }
 0x159   :  { %v1356_v20 = vadd.f32 %v1322_v45, %v1078_v35 }
 0x15a   :  { %v1514_v18 = vpop.permute.xlu1 %1513  ;;  %v807_v46 = vadd.f32 %v773_v51, %v495_v43 }
 0x15b   :  { %v1597_v58 = vmul.f32 %v6332_v11, %v1514_v18  ;;  %v988_v53 = vpop.permute.xlu0 %987  ;;  %1290 = vperm.xlu1 %5318, %v1121_v13   ;;  %v6335_v16 = vld [vmem:[#allocation3 + $0xa8] sm:$0xff] }
 0x15c   :  { %1275 = vperm.xlu0 %5317, %v6089_v63   ;;  %4837 = vmatmul.mubr.msk.f32.gmra.mrb[6].mxu0 %vm1786_vm1, %v6335_v16  ;;  %v4487_v63 = vld [vmem:[#allocation8] sm:$0x1]  ;;  %v1047_v44 = vmul.f32 %v6310_v52, %v988_v53 }
 0x15d   :  { %v1631_v62 = vadd.f32 %v1597_v58, %v1353_v8 }
 0x15e   :  { %v1529_v33 = vpop.permute.xlu1 %1528 }
 0x15f   :  { %v1672_v0 = vadd.f32 %v6343_v2, %v1631_v62  ;;  %v1600_v9 = vmul.f32 %v6332_v11, %v1529_v33  ;;  %v1003_v30 = vpop.permute.xlu0 %1002  ;;  %1568 = vperm.xlu1 %5318, %v1399_v56  }
 0x160   :  { %1553 = vperm.xlu0 %5317, %v6108_v31   ;;  %v492_v31 = vmul.f32 %v6301_v17, %v6285_v22  ;;  %v1050_v5 = vmul.f32 %v6310_v52, %v1003_v30 }
 0x161   :  { %vm1706_vm5 = vcmp.ge.f32.partialorder %v1672_v0, 0.0  ;;  %v1740_v25 = vmul.f32 0.1, %v1672_v0  ;;  %v1634_v32 = vadd.f32 %v1600_v9, %v1356_v20 }
 0x162   :  { %v571_v6 = vpop.permute.xlu1 %570  ;;  %v804_v23 = vadd.f32 %v770_v37, %v492_v31  ;;  %v1084_v54 = vadd.f32 %v1050_v5, %v807_v46 }
 0x163   :  { %v1774_v29 = vsel %vm1706_vm5, %v1672_v0, %v1740_v25  ;;  %v1675_v12 = vadd.f32 %v6343_v2, %v1634_v32  ;;  %v293_v28 = vpop.permute.xlu0 %292  ;;  %4490 = vperm.xlu1 %5318, %v4487_v63   ;;  %v742_v33 = vmul.f32 %v6294_v57, %v571_v6 }
 0x164   :  { %1815 = vst.msk [vmem:[#allocation3 + $0xc0] sm:$0xff] %vm1786_vm1, %v1774_v29  ;;  %v1081_v7 = vadd.f32 %v1047_v44, %v804_v23  ;;  %v464_v20 = vmul.f32 %v6301_v17, %v293_v28 }
 0x165   :  { %vm1709_vm6 = vcmp.ge.f32.partialorder %v1675_v12, 0.0  ;;  %v1743_v10 = vmul.f32 0.1, %v1675_v12 }
 0x166   :  { %v308_v47 = vpop.permute.xlu1 %307  ;;  %v776_v25 = vadd.f32 %v742_v33, %v464_v20 }
 0x167   :  { %v1777_v14 = vsel %vm1709_vm6, %v1675_v12, %v1743_v10  ;;  %v1266_v24 = vpop.permute.xlu0 %1265  ;;  %v467_v6 = vmul.f32 %v6301_v17, %v308_v47  ;;  %vm2791_vm6 = vcmask 261120  }
 0x168   :  { %1818 = vst.msk [vmem:[#allocation3 + $0xd8] sm:$0xff] %vm1786_vm1, %v1777_v14  ;;  %v1325_v26 = vmul.f32 %v6317_v1, %v1266_v24 }
 0x169   :  { %2792 = vst.msk [vmem:[#allocation4] sm:$0xff] %vm2791_vm6, %v5350_v19  ;;  %2793 = vst.msk [vmem:[#allocation4 + $0x8] sm:$0xff] %vm2791_vm6, %v5350_v19 }
 0x16a   :  { %v1281_v36 = vpop.permute.xlu1 %1280  ;;  %v1359_v55 = vadd.f32 %v1325_v26, %v1081_v7  ;;  %3370 = vst.msk [vmem:[#allocation5] sm:$0xff] %vm2791_vm6, %v5350_v19  ;;  %3371 = vst.msk [vmem:[#allocation5 + $0x8] sm:$0xff] %vm2791_vm6, %v5350_v19 }
 0x16b   :  { %v586_v22 = vpop.permute.xlu0 %585  ;;  %v6364_v15 = vld [vmem:[#allocation3 + $0xc0] sm:$0xff]  ;;  %v1328_v41 = vmul.f32 %v6317_v1, %v1281_v36  ;;  %3373 = vst.msk [vmem:[#allocation5 + $0x30] sm:$0xff] %vm2791_vm6, %v5350_v19  ;;  %3374 = vst.msk [vmem:[#allocation5 + $0x38] sm:$0xff] %vm2791_vm6, %v5350_v19 }
 0x16c   :  { %4839 = vmatprep.mubr.msk.f32.mxu0 %vm1786_vm1, %v6364_v15  ;;  %v745_v32 = vmul.f32 %v6294_v57, %v586_v22  ;;  %3839 = vst.msk [vmem:[#allocation6] sm:$0xff] %vm2791_vm6, %v5350_v19  ;;  %3840 = vst.msk [vmem:[#allocation6 + $0x8] sm:$0xff] %vm2791_vm6, %v5350_v19 }
 0x16d   :  { %v1362_v59 = vadd.f32 %v1328_v41, %v1084_v54  ;;  %3842 = vst.msk [vmem:[#allocation6 + $0x20] sm:$0xff] %vm2791_vm6, %v5350_v19  ;;  %3843 = vst.msk [vmem:[#allocation6 + $0x28] sm:$0xff] %vm2791_vm6, %v5350_v19 }
 0x16e   :  { %v1544_v34 = vpop.permute.xlu1 %1543  ;;  %v779_v14 = vadd.f32 %v745_v32, %v467_v6  ;;  %v6417_v6 = vld [vmem:[%s6869_s3 + $0x20] sm:$0xff]  ;;  %4305 = vst.msk [vmem:[#allocation7] sm:$0xff] %vm2791_vm6, %v5350_v19  ;;  %4307 = vst.msk [vmem:[#allocation7 + $0x18] sm:$0xff] %vm2791_vm6, %v5350_v19  ;;  %s5351_s3 = smov 96  }
 0x16f   :  { %v1603_v27 = vmul.f32 %v6332_v11, %v1544_v34  ;;  %v848_v21 = vpop.permute.xlu0 %847  ;;  %v6373_v3 = vld [vmem:[#allocation3 + $0xd8] sm:$0xff] }
 0x170   :  { %4840 = vmatmul.mubr.msk.f32.gmra.mrb[8].mxu0 %vm1786_vm1, %v6373_v3  ;;  %v1019_v30 = vmul.f32 %v6310_v52, %v848_v21 }
 0x171   :  { %v1637_v13 = vadd.f32 %v1603_v27, %v1359_v55 }
 0x172   :  { %v1559_v49 = vpop.permute.xlu1 %1558  ;;  %v1053_v28 = vadd.f32 %v1019_v30, %v776_v25 }
 0x173   :  { %v1678_v50 = vadd.f32 %v6343_v2, %v1637_v13  ;;  %v1606_v40 = vmul.f32 %v6332_v11, %v1559_v49  ;;  %v863_v18 = vpop.permute.xlu0 %862 }
 0x174   :  { %v1022_v37 = vmul.f32 %v6310_v52, %v863_v18 }
 0x175   :  { %vm1712_vm7 = vcmp.ge.f32.partialorder %v1678_v50, 0.0  ;;  %v1746_v39 = vmul.f32 0.1, %v1678_v50  ;;  %v1640_v8 = vadd.f32 %v1606_v40, %v1362_v59 }
 0x176   :  { %v601_v45 = vpop.permute.xlu1 %600  ;;  %v1056_v26 = vadd.f32 %v1022_v37, %v779_v14 }
 0x177   :  { %v1780_v58 = vsel %vm1712_vm7, %v1678_v50, %v1746_v39  ;;  %v1681_v53 = vadd.f32 %v6343_v2, %v1640_v8  ;;  %v323_v56 = vpop.permute.xlu0 %322  ;;  %v748_v59 = vmul.f32 %v6294_v57, %v601_v45 }
 0x178   :  { %1821 = vst.msk [vmem:[#allocation3 + $0xf0] sm:$0xff] %vm1786_vm1, %v1780_v58  ;;  %v470_v50 = vmul.f32 %v6301_v17, %v323_v56 }
 0x179   :  { %vm1715_vm8 = vcmp.ge.f32.partialorder %v1681_v53, 0.0  ;;  %v1749_v35 = vmul.f32 0.1, %v1681_v53 }
 0x17a   :  { %v338_v62 = vpop.permute.xlu1 %337  ;;  %v782_v58 = vadd.f32 %v748_v59, %v470_v50 }
 0x17b   :  { %v1783_v0 = vsel %vm1715_vm8, %v1681_v53, %v1749_v35  ;;  %v1126_v9 = vpop.permute.xlu0 %1125  ;;  %v473_v45 = vmul.f32 %v6301_v17, %v338_v62 }
 0x17c   :  { %1824 = vst.msk [vmem:[#allocation3 + $0x108] sm:$0xff] %vm1786_vm1, %v1783_v0  ;;  %v1297_v29 = vmul.f32 %v6317_v1, %v1126_v9 }
 0x17e   :  { %v1141_v63 = vpop.permute.xlu1 %1140  ;;  %v1331_v24 = vadd.f32 %v1297_v29, %v1053_v28 }
 0x17f   :  { %v616_v12 = vpop.permute.xlu0 %615  ;;  %v6387_v10 = vld [vmem:[#allocation3 + $0xf0] sm:$0xff]  ;;  %v1300_v44 = vmul.f32 %v6317_v1, %v1141_v63 }
 0x180   :  { %4842 = vmatprep.mubr.msk.f32.mxu0 %vm1786_vm1, %v6387_v10  ;;  %v751_v53 = vmul.f32 %v6294_v57, %v616_v12 }
 0x181   :  { %v1334_v47 = vadd.f32 %v1300_v44, %v1056_v26 }
 0x182   :  { %v1404_v31 = vpop.permute.xlu1 %1403  ;;  %v785_v30 = vadd.f32 %v751_v53, %v473_v45 }
 0x183   :  { %v1575_v36 = vmul.f32 %v6332_v11, %v1404_v31  ;;  %v878_v23 = vpop.permute.xlu0 %877  ;;  %v6395_v51 = vld [vmem:[#allocation3 + $0x108] sm:$0xff] }
 0x184   :  { %4843 = vmatmul.mubr.msk.f32.gmra.mrb[10].mxu0 %vm1786_vm1, %v6395_v51  ;;  %v1025_v39 = vmul.f32 %v6310_v52, %v878_v23 }
 0x185   :  { %v1609_v22 = vadd.f32 %v1575_v36, %v1331_v24 }
 0x186   :  { %v1419_v43 = vpop.permute.xlu1 %1418  ;;  %v1059_v0 = vadd.f32 %v1025_v39, %v782_v58 }
 0x187   :  { %v1650_v7 = vadd.f32 %v6343_v2, %v1609_v22  ;;  %v1578_v5 = vmul.f32 %v6332_v11, %v1419_v43  ;;  %v893_v34 = vpop.permute.xlu0 %892 }
 0x188   :  { %v1028_v56 = vmul.f32 %v6310_v52, %v893_v34 }
 0x189   :  { %vm1684_vm9 = vcmp.ge.f32.partialorder %v1650_v7, 0.0  ;;  %v1718_v46 = vmul.f32 0.1, %v1650_v7  ;;  %v1612_v55 = vadd.f32 %v1578_v5, %v1334_v47 }
 0x18a   :  { %v631_v41 = vpop.permute.xlu1 %630  ;;  %v1062_v62 = vadd.f32 %v1028_v56, %v785_v30 }
 0x18b   :  { %v1752_v27 = vsel %vm1684_vm9, %v1650_v7, %v1718_v46  ;;  %v1653_v21 = vadd.f32 %v6343_v2, %v1612_v55  ;;  %v353_v54 = vpop.permute.xlu0 %352  ;;  %v754_v5 = vmul.f32 %v6294_v57, %v631_v41 }
 0x18c   :  { %1793 = vst.msk [vmem:[#allocation3 + $0x10] sm:$0xff] %vm1786_vm1, %v1752_v27  ;;  %v476_v34 = vmul.f32 %v6301_v17, %v353_v54 }
 0x18d   :  { %vm1687_vm10 = vcmp.ge.f32.partialorder %v1653_v21, 0.0  ;;  %v1721_v13 = vmul.f32 0.1, %v1653_v21 }
 0x18e   :  { %v368_v49 = vpop.permute.xlu1 %367 }
 0x18f   :  { %v1755_v40 = vsel %vm1687_vm10, %v1653_v21, %v1721_v13  ;;  %v1156_v18 = vpop.permute.xlu0 %1155  ;;  %v788_v13 = vadd.f32 %v754_v5, %v476_v34  ;;  %v479_v41 = vmul.f32 %v6301_v17, %v368_v49 }
 0x190   :  { %1796 = vst.msk [vmem:[#allocation3 + $0x28] sm:$0xff] %vm1786_vm1, %v1755_v40  ;;  %v1303_v35 = vmul.f32 %v6317_v1, %v1156_v18 }
 0x192   :  { %v1171_v8 = vpop.permute.xlu1 %1170  ;;  %v1337_v63 = vadd.f32 %v1303_v35, %v1059_v0 }
 0x193   :  { %v646_v33 = vpop.permute.xlu0 %645  ;;  %v2176_v20 = vld [vmem:[#allocation3 + $0x10] sm:$0xff]  ;;  %v1306_v25 = vmul.f32 %v6317_v1, %v1171_v8 }
 0x194   :  { %4847 = vmatprep.mubr.msk.f32.mxu0 %vm1786_vm1, %v2176_v20  ;;  %v757_v59 = vmul.f32 %v6294_v57, %v646_v33 }
 0x195   :  { %v1340_v31 = vadd.f32 %v1306_v25, %v1062_v62 }
 0x196   :  { %v1434_v9 = vpop.permute.xlu1 %1433  ;;  %v791_v58 = vadd.f32 %v757_v59, %v479_v41 }
 0x197   :  { %v1581_v32 = vmul.f32 %v6332_v11, %v1434_v9  ;;  %v908_v29 = vpop.permute.xlu0 %907  ;;  %v2177_v12 = vld [vmem:[#allocation3 + $0x28] sm:$0xff] }
 0x198   :  { %4848 = vmatmul.mubr.msk.f32.vlgmr.msra.gmra.mrb[0].mxu0 %vm1786_vm1, %v2177_v12  ;;  %v1031_v27 = vmul.f32 %v6310_v52, %v908_v29 }
 0x199   :  { %v1615_v28 = vadd.f32 %v1581_v32, %v1337_v63  ;;  %4866 = vmatpush3.msra.mxu0 %v6359_v60 }
 0x19a   :  { %v1449_v37 = vpop.permute.xlu1 %1448  ;;  %4885 = vmatprep.subr.mxu0 %v6417_v6  ;;  %v1065_v39 = vadd.f32 %v1031_v27, %v788_v13 }
 0x19b   :  { %v1656_v14 = vadd.f32 %v6343_v2, %v1615_v28  ;;  %v1584_v24 = vmul.f32 %v6332_v11, %v1449_v37  ;;  %v923_v44 = vpop.permute.xlu0 %922 }
 0x19c   :  { %v1034_v54 = vmul.f32 %v6310_v52, %v923_v44 }
 0x19d   :  { %vm1690_vm11 = vcmp.ge.f32.partialorder %v1656_v14, 0.0  ;;  %v1724_v36 = vmul.f32 0.1, %v1656_v14  ;;  %v1618_v23 = vadd.f32 %v1584_v24, %v1340_v31 }
 0x19e   :  { %v661_v26 = vpop.permute.xlu1 %660  ;;  %v1068_v0 = vadd.f32 %v1034_v54, %v791_v58 }
 0x19f   :  { %v1758_v22 = vsel %vm1690_vm11, %v1656_v14, %v1724_v36  ;;  %v1659_v43 = vadd.f32 %v6343_v2, %v1618_v23  ;;  %v383_v47 = vpop.permute.xlu0 %382  ;;  %v760_v24 = vmul.f32 %v6294_v57, %v661_v26 }
 0x1a0   :  { %1799 = vst.msk [vmem:[#allocation3 + $0x40] sm:$0xff] %vm1786_vm1, %v1758_v22  ;;  %v482_v44 = vmul.f32 %v6301_v17, %v383_v47 }
 0x1a1   :  { %vm1693_vm12 = vcmp.ge.f32.partialorder %v1659_v43, 0.0  ;;  %v1727_v60 = vmul.f32 0.1, %v1659_v43 }
 0x1a2   :  { %v398_v7 = vpop.permute.xlu1 %397 }
 0x1a3   :  { %v1761_v46 = vsel %vm1693_vm12, %v1659_v43, %v1727_v60  ;;  %v1186_v55 = vpop.permute.xlu0 %1185  ;;  %v794_v60 = vadd.f32 %v760_v24, %v482_v44  ;;  %v485_v26 = vmul.f32 %v6301_v17, %v398_v7 }
 0x1a4   :  { %1802 = vst.msk [vmem:[#allocation3 + $0x58] sm:$0xff] %vm1786_vm1, %v1761_v46  ;;  %v1309_v50 = vmul.f32 %v6317_v1, %v1186_v55 }
 0x1a6   :  { %v1201_v21 = vpop.permute.xlu1 %1200  ;;  %v1343_v53 = vadd.f32 %v1309_v50, %v1065_v39 }
 0x1a7   :  { %v676_v40 = vpop.permute.xlu0 %675  ;;  %v2178_v18 = vld [vmem:[#allocation3 + $0x40] sm:$0xff]  ;;  %v1312_v35 = vmul.f32 %v6317_v1, %v1201_v21 }
 0x1a8   :  { %4850 = vmatprep.mubr.msk.f32.mxu0 %vm1786_vm1, %v2178_v18  ;;  %v763_v5 = vmul.f32 %v6294_v57, %v676_v40 }
 0x1a9   :  { %v1346_v30 = vadd.f32 %v1312_v35, %v1068_v0 }
 0x1aa   :  { %v1464_v8 = vpop.permute.xlu1 %1463  ;;  %v797_v13 = vadd.f32 %v763_v5, %v485_v26 }
 0x1ab   :  { %v1587_v20 = vmul.f32 %v6332_v11, %v1464_v8  ;;  %v938_v45 = vpop.permute.xlu0 %937  ;;  %v2179_v33 = vld [vmem:[#allocation3 + $0x58] sm:$0xff] }
 0x1ac   :  { %4851 = vmatmul.mubr.msk.f32.gmra.mrb[2].mxu0 %vm1786_vm1, %v2179_v33  ;;  %v1037_v22 = vmul.f32 %v6310_v52, %v938_v45 }
 0x1ad   :  { %v1621_v56 = vadd.f32 %v1587_v20, %v1343_v53 }
 0x1ae   :  { %v1479_v9 = vpop.permute.xlu1 %1478  ;;  %v1071_v27 = vadd.f32 %v1037_v22, %v794_v60 }
 0x1af   :  { %v1662_v49 = vadd.f32 %v6343_v2, %v1621_v56  ;;  %v1590_v63 = vmul.f32 %v6332_v11, %v1479_v9  ;;  %v953_v25 = vpop.permute.xlu0 %952 }
 0x1b0   :  { %v1040_v47 = vmul.f32 %v6310_v52, %v953_v25 }
 0x1b1   :  { %vm1696_vm13 = vcmp.ge.f32.partialorder %v1662_v49, 0.0  ;;  %v1730_v32 = vmul.f32 0.1, %v1662_v49  ;;  %v1624_v29 = vadd.f32 %v1590_v63, %v1346_v30 }
 0x1b2   :  { %v691_v12 = vpop.permute.xlu1 %690  ;;  %v1074_v39 = vadd.f32 %v1040_v47, %v797_v13 }
 0x1b3   :  { %v1764_v62 = vsel %vm1696_vm13, %v1662_v49, %v1730_v32  ;;  %v1665_v28 = vadd.f32 %v6343_v2, %v1624_v29  ;;  %v413_v37 = vpop.permute.xlu0 %412  ;;  %v766_v63 = vmul.f32 %v6294_v57, %v691_v12 }
 0x1b4   :  { %1805 = vst.msk [vmem:[#allocation3 + $0x70] sm:$0xff] %vm1786_vm1, %v1764_v62  ;;  %v488_v25 = vmul.f32 %v6301_v17, %v413_v37 }
 0x1b5   :  { %vm1699_vm14 = vcmp.ge.f32.partialorder %v1665_v28, 0.0  ;;  %v1733_v31 = vmul.f32 0.1, %v1665_v28 }
 0x1b6   :  { %v428_v14 = vpop.permute.xlu1 %427 }
 0x1b7   :  { %v1767_v36 = vsel %vm1699_vm14, %v1665_v28, %v1733_v31  ;;  %v1216_v23 = vpop.permute.xlu0 %1215  ;;  %v800_v31 = vadd.f32 %v766_v63, %v488_v25  ;;  %v491_v12 = vmul.f32 %v6301_v17, %v428_v14 }
 0x1b8   :  { %1808 = vst.msk [vmem:[#allocation3 + $0x88] sm:$0xff] %vm1786_vm1, %v1767_v36  ;;  %v1315_v34 = vmul.f32 %v6317_v1, %v1216_v23 }
 0x1ba   :  { %v1231_v43 = vpop.permute.xlu1 %1230  ;;  %v1349_v59 = vadd.f32 %v1315_v34, %v1071_v27 }
 0x1bb   :  { %v706_v46 = vpop.permute.xlu0 %705  ;;  %v2180_v55 = vld [vmem:[#allocation3 + $0x70] sm:$0xff]  ;;  %v1318_v50 = vmul.f32 %v6317_v1, %v1231_v43 }
 0x1bc   :  { %4853 = vmatprep.mubr.msk.f32.mxu0 %vm1786_vm1, %v2180_v55  ;;  %v769_v24 = vmul.f32 %v6294_v57, %v706_v46 }
 0x1bd   :  { %v1352_v58 = vadd.f32 %v1318_v50, %v1074_v39 }
 0x1be   :  { %v1494_v21 = vpop.permute.xlu1 %1493  ;;  %v803_v60 = vadd.f32 %v769_v24, %v491_v12 }
 0x1bf   :  { %v1593_v18 = vmul.f32 %v6332_v11, %v1494_v21  ;;  %v968_v41 = vpop.permute.xlu0 %967  ;;  %v2181_v40 = vld [vmem:[#allocation3 + $0x88] sm:$0xff] }
 0x1c0   :  { %4854 = vmatmul.mubr.msk.f32.gmra.mrb[4].mxu0 %vm1786_vm1, %v2181_v40  ;;  %v1043_v62 = vmul.f32 %v6310_v52, %v968_v41 }
 0x1c1   :  { %v1627_v54 = vadd.f32 %v1593_v18, %v1349_v59 }
 0x1c2   :  { %v1509_v8 = vpop.permute.xlu1 %1508  ;;  %v1077_v22 = vadd.f32 %v1043_v62, %v800_v31 }
 0x1c3   :  { %v1668_v7 = vadd.f32 %v6343_v2, %v1627_v54  ;;  %v1596_v53 = vmul.f32 %v6332_v11, %v1509_v8  ;;  %v983_v35 = vpop.permute.xlu0 %982 }
 0x1c4   :  { %v1046_v37 = vmul.f32 %v6310_v52, %v983_v35 }
 0x1c5   :  { %vm1702_vm15 = vcmp.ge.f32.partialorder %v1668_v7, 0.0  ;;  %v1736_v20 = vmul.f32 0.1, %v1668_v7  ;;  %v1630_v45 = vadd.f32 %v1596_v53, %v1352_v58 }
 0x1c6   :  { %v721_v33 = vpop.permute.xlu1 %720  ;;  %v1080_v27 = vadd.f32 %v1046_v37, %v803_v60  ;;  %v2560_v60 = vld [vmem:[#allocation3 + $0x110] sm:$0xff] }
 0x1c7   :  { %v1770_v0 = vsel %vm1702_vm15, %v1668_v7, %v1736_v20  ;;  %v1671_v56 = vadd.f32 %v6343_v2, %v1630_v45  ;;  %v443_v9 = vpop.permute.xlu0 %442  ;;  %v772_v41 = vmul.f32 %v6294_v57, %v721_v33 }
 0x1c8   :  { %1811 = vst.msk [vmem:[#allocation3 + $0xa0] sm:$0xff] %vm1786_vm1, %v1770_v0  ;;  %v494_v40 = vmul.f32 %v6301_v17, %v443_v9 }
 0x1c9   :  { %vm1705_vm0 = vcmp.ge.f32.partialorder %v1671_v56, 0.0  ;;  %v1739_v30 = vmul.f32 0.1, %v1671_v56 }
 0x1ca   :  { %v458_v49 = vpop.permute.xlu1 %457 }
 0x1cb   :  { %v1773_v32 = vsel %vm1705_vm0, %v1671_v56, %v1739_v30  ;;  %v1246_v29 = vpop.permute.xlu0 %1245  ;;  %v497_v39 = vmul.f32 %v6301_v17, %v458_v49 }
 0x1cc   :  { %1814 = vst.msk [vmem:[#allocation3 + $0xb8] sm:$0xff] %vm1786_vm1, %v1773_v32  ;;  %v1321_v44 = vmul.f32 %v6317_v1, %v1246_v29 }
 0x1ce   :  { %v1261_v28 = vpop.permute.xlu1 %1260  ;;  %v1355_v5 = vadd.f32 %v1321_v44, %v1077_v22 }
 0x1cf   :  { %v736_v36 = vpop.permute.xlu0 %735  ;;  %v2182_v23 = vld [vmem:[#allocation3 + $0xa0] sm:$0xff]  ;;  %v1324_v34 = vmul.f32 %v6317_v1, %v1261_v28 }
 0x1d0   :  { %4856 = vmatprep.mubr.msk.f32.mxu0 %vm1786_vm1, %v2182_v23  ;;  %v775_v14 = vmul.f32 %v6294_v57, %v736_v36  ;;  %v806_v57 = vadd.f32 %v772_v41, %v494_v40 }
 0x1d1   :  { %v1358_v13 = vadd.f32 %v1324_v34, %v1080_v27  ;;  %v2820_v34 = vld [vmem:[%s6871_s5 + $0x20] sm:$0xff]  ;;  %v2823_v27 = vld [vmem:[%s6871_s5 + $0x38] sm:$0xff] }
 0x1d2   :  { %v1524_v43 = vpop.permute.xlu1 %1523  ;;  %v809_v35 = vadd.f32 %v775_v14, %v497_v39  ;;  %v2812_v14 = vld [vmem:[%s6871_s5 + $0x8] sm:$0xff] }
 0x1d3   :  { %v1599_v55 = vmul.f32 %v6332_v11, %v1524_v43  ;;  %v998_v26 = vpop.permute.xlu0 %997  ;;  %v2183_v46 = vld [vmem:[#allocation3 + $0xb8] sm:$0xff] }
 0x1d4   :  { %4857 = vmatmul.mubr.msk.f32.gmra.mrb[6].mxu0 %vm1786_vm1, %v2183_v46  ;;  %v1049_v7 = vmul.f32 %v6310_v52, %v998_v26  ;;  %v2822_v46 = vld [vmem:[%s6871_s5 + $0x30] sm:$0xff] }
 0x1d5   :  { %v1633_v47 = vadd.f32 %v1599_v55, %v1355_v5  ;;  %v2561_v5 = vld [vmem:[#allocation3 + $0x128] sm:$0xff] }
 0x1d6   :  { %v1539_v21 = vpop.permute.xlu1 %1538  ;;  %v1083_v30 = vadd.f32 %v1049_v7, %v806_v57  ;;  %v2821_v55 = vld [vmem:[%s6871_s5 + $0x28] sm:$0xff] }
 0x1d7   :  { %v1674_v59 = vadd.f32 %v6343_v2, %v1633_v47  ;;  %v1602_v50 = vmul.f32 %v6332_v11, %v1539_v21  ;;  %v1013_v18 = vpop.permute.xlu0 %1012  ;;  %v5103_v26 = vpack.c.bf16 %v2821_v55, %v2820_v34  ;;  %v5107_v47 = vpack.c.bf16 %v2823_v27, %v2822_v46  ;;  %v2816_v21 = vld [vmem:[#allocation4 + $0x8] sm:$0xff]  ;;  %v2807_v27 = vld [vmem:[#allocation4] sm:$0xff] }
 0x1d8   :  { %v1052_v58 = vmul.f32 %v6310_v52, %v1013_v18  ;;  %4913 = vmatprep.mubr.msk.f32.mxu1 %vm2791_vm6, %v2816_v21  ;;  %v3024_v21 = vld [vmem:[%s6871_s5 + $0x50] sm:$0xff] }
 0x1d9   :  { %vm1708_vm2 = vcmp.ge.f32.partialorder %v1674_v59, 0.0  ;;  %v1742_v54 = vmul.f32 0.1, %v1674_v59  ;;  %v1636_v8 = vadd.f32 %v1602_v50, %v1358_v13  ;;  %5104 = vmatprep.subr.bf16.mxu1 %v5103_v26  ;;  %v2811_v13 = vld [vmem:[%s6871_s5] sm:$0xff] }
 0x1da   :  { %v1291_v53 = vpop.permute.xlu1 %1290  ;;  %v1086_v9 = vadd.f32 %v1052_v58, %v809_v35  ;;  %5106 = vmatpush3.bf16.msra.mxu1 %v5103_v26  ;;  %v6577_v50 = vld [vmem:[%s6870_s4] ss:$0 sm:$0xff] }
 0x1db   :  { %v1776_v20 = vsel %vm1708_vm2, %v1674_v59, %v1742_v54  ;;  %v1677_v45 = vadd.f32 %v6343_v2, %v1636_v8  ;;  %v1330_v0 = vmul.f32 %v6317_v1, %v1291_v53  ;;  %v1276_v56 = vpop.permute.xlu0 %1275  ;;  %5108 = vmatprep.subr.bf16.mxu1 %v5107_v47  ;;  %v6571_v59 = vpack.c.bf16 %v2812_v14, %v2811_v13  ;;  %v3025_v13 = vld [vmem:[%s6871_s5 + $0x58] sm:$0xff] }
 0x1dc   :  { %1817 = vst.msk [vmem:[#allocation3 + $0xd0] sm:$0xff] %vm1786_vm1, %v1776_v20  ;;  %v1327_v17 = vmul.f32 %v6317_v1, %v1276_v56  ;;  %v5123_v14 = vpack.c.bf16 %v3025_v13, %v3024_v21  ;;  %v3647_v21 = vld [vmem:[%s6873_s7 + $0x60] sm:$0xff]  ;;  %v3648_v13 = vld [vmem:[%s6873_s7 + $0x68] sm:$0xff] }
 0x1dd   :  { %vm1711_vm3 = vcmp.ge.f32.partialorder %v1677_v45, 0.0  ;;  %v1745_v33 = vmul.f32 0.1, %v1677_v45  ;;  %v1364_v52 = vadd.f32 %v1330_v0, %v1086_v9 }
 0x1de   :  { %v1569_v49 = vpop.permute.xlu1 %1568  ;;  %v1361_v29 = vadd.f32 %v1327_v17, %v1083_v30  ;;  %5110 = vmatpush3.bf16.msra.mxu1 %v5107_v47 }
 0x1df   :  { %v1779_v63 = vsel %vm1711_vm3, %v1677_v45, %v1745_v33  ;;  %v1608_v25 = vmul.f32 %v6332_v11, %v1569_v49  ;;  %v1554_v32 = vpop.permute.xlu0 %1553  ;;  %5112 = vmatprep.subr.bf16.mxu1 %v6571_v59 }
 0x1e0   :  { %1820 = vst.msk [vmem:[#allocation3 + $0xe8] sm:$0xff] %vm1786_vm1, %v1779_v63  ;;  %v1605_v62 = vmul.f32 %v6332_v11, %v1554_v32 }
 0x1e1   :  { %v1642_v28 = vadd.f32 %v1608_v25, %v1364_v52 }
 0x1e2   :  { %v1639_v31 = vadd.f32 %v1605_v62, %v1361_v29 }
 0x1e3   :  { %v1683_v24 = vadd.f32 %v6343_v2, %v1642_v28  ;;  %v2184_v1 = vld [vmem:[#allocation3 + $0xd0] sm:$0xff] }
 0x1e4   :  { %v1680_v44 = vadd.f32 %v6343_v2, %v1639_v31  ;;  %4859 = vmatprep.mubr.msk.f32.mxu0 %vm1786_vm1, %v2184_v1  ;;  %v2363_v2 = vld [vmem:[#allocation3 + $0x18] sm:$0xff] }
 0x1e5   :  { %vm1717_vm4 = vcmp.ge.f32.partialorder %v1683_v24, 0.0  ;;  %v1751_v36 = vmul.f32 0.1, %v1683_v24  ;;  %v2814_v1 = vld [vmem:[%s6871_s5 + $0x18] sm:$0xff] }
 0x1e6   :  { %vm1714_vm5 = vcmp.ge.f32.partialorder %v1680_v44, 0.0  ;;  %v1748_v23 = vmul.f32 0.1, %v1680_v44 }
 0x1e7   :  { %v1785_v12 = vsel %vm1717_vm4, %v1683_v24, %v1751_v36  ;;  %v2185_v22 = vld [vmem:[#allocation3 + $0xe8] sm:$0xff]  ;;  %v2813_v24 = vld [vmem:[%s6871_s5 + $0x10] sm:$0xff] }
 0x1e8   :  { %1826 = vst.msk [vmem:[#allocation3 + $0x118] sm:$0xff] %vm1786_vm1, %v1785_v12  ;;  %v1782_v37 = vsel %vm1714_vm5, %v1680_v44, %v1748_v23  ;;  %4860 = vmatmul.mubr.msk.f32.gmra.mrb[8].mxu0 %vm1786_vm1, %v2185_v22 }
 0x1e9   :  { %1823 = vst.msk [vmem:[#allocation3 + $0x100] sm:$0xff] %vm1786_vm1, %v1782_v37 }
 0x1ef   :  { %v2187_v11 = vld [vmem:[#allocation3 + $0x118] sm:$0xff] }
 0x1f0   :  { %v2186_v43 = vld [vmem:[#allocation3 + $0x100] sm:$0xff] }
 0x1f1   :  { %4862 = vmatprep.mubr.msk.f32.mxu0 %vm1786_vm1, %v2186_v43 }
 0x1f2   :  { %4863 = vmatmul.mubr.msk.f32.gmra.mrb[10].mxu0 %vm1786_vm1, %v2187_v11  ;;  %v5115_v11 = vpack.c.bf16 %v2814_v1, %v2813_v24  ;;  %v4601_v1 = vld [vmem:[%s6872_s6] ss:$0 sm:$0xff] }
 0x1f3   :  { %4867 = vmatprep.mubr.msk.f32.mxu0 %vm1786_vm1, %v2363_v2 }
 0x1f6   :  { %4868 = vmatmul.mubr.msk.f32.vlgmr.msra.gmra.mrb[0].mxu0 %vm1786_vm1, %v6231_v42  ;;  %v2374_v42 = vld [vmem:[#allocation3 + $0x120] sm:$0xff] }
 0x1f7   :  { %4870 = vmatprep.mubr.msk.f32.mxu0 %vm1786_vm1, %v6240_v4  ;;  %4886 = vmatpush3.msra.mxu0 %v6417_v6  ;;  %v2550_v4 = vld [vmem:[#allocation3 + $0x20] sm:$0xff]  ;;  %v2559_v6 = vld [vmem:[#allocation3 + $0xf8] sm:$0xff] }
 0x1fa   :  { %4871 = vmatmul.mubr.msk.f32.gmra.mrb[2].mxu0 %vm1786_vm1, %v6266_v38  ;;  %v2551_v38 = vld [vmem:[#allocation3 + $0x38] sm:$0xff] }
 0x1fb   :  { %4873 = vmatprep.mubr.msk.f32.mxu0 %vm1786_vm1, %v6275_v48  ;;  %v2552_v48 = vld [vmem:[#allocation3 + $0x50] sm:$0xff] }
 0x1fe   :  { %4874 = vmatmul.mubr.msk.f32.gmra.mrb[4].mxu0 %vm1786_vm1, %v6321_v61  ;;  %v2553_v61 = vld [vmem:[#allocation3 + $0x68] sm:$0xff] }
 0x1ff   :  { %4876 = vmatprep.mubr.msk.f32.mxu0 %vm1786_vm1, %v6335_v16  ;;  %v2554_v16 = vld [vmem:[#allocation3 + $0x80] sm:$0xff] }
 0x202   :  { %4877 = vmatmul.mubr.msk.f32.gmra.mrb[6].mxu0 %vm1786_vm1, %v6364_v15  ;;  %v2555_v15 = vld [vmem:[#allocation3 + $0x98] sm:$0xff] }
 0x203   :  { %4879 = vmatprep.mubr.msk.f32.mxu0 %vm1786_vm1, %v6373_v3  ;;  %v2556_v3 = vld [vmem:[#allocation3 + $0xb0] sm:$0xff] }
 0x206   :  { %4880 = vmatmul.mubr.msk.f32.gmra.mrb[8].mxu0 %vm1786_vm1, %v6387_v10  ;;  %v2557_v10 = vld [vmem:[#allocation3 + $0xc8] sm:$0xff] }
 0x207   :  { %4882 = vmatprep.mubr.msk.f32.mxu0 %vm1786_vm1, %v6395_v51  ;;  %v2558_v51 = vld [vmem:[#allocation3 + $0xe0] sm:$0xff] }
 0x20a   :  { %4883 = vmatmul.mubr.msk.f32.gmra.mrb[10].mxu0 %vm1786_vm1, %v2374_v42 }
 0x20b   :  { %4887 = vmatprep.mubr.msk.f32.mxu0 %vm1786_vm1, %v2550_v4  ;;  %v3022_v4 = vld [vmem:[%s6871_s5 + $0x40] sm:$0xff] }
 0x20e   :  { %4888 = vmatmul.mubr.msk.f32.vlgmr.msra.gmra.mrb[0].mxu0 %vm1786_vm1, %v2551_v38  ;;  %v3023_v38 = vld [vmem:[%s6871_s5 + $0x48] sm:$0xff] }
 0x20f   :  { %4890 = vmatprep.mubr.msk.f32.mxu0 %vm1786_vm1, %v2552_v48 }
 0x212   :  { %4891 = vmatmul.mubr.msk.f32.gmra.mrb[2].mxu0 %vm1786_vm1, %v2553_v61 }
 0x213   :  { %4893 = vmatprep.mubr.msk.f32.mxu0 %vm1786_vm1, %v2554_v16 }
 0x216   :  { %4894 = vmatmul.mubr.msk.f32.gmra.mrb[4].mxu0 %vm1786_vm1, %v2555_v15 }
 0x217   :  { %4896 = vmatprep.mubr.msk.f32.mxu0 %vm1786_vm1, %v2556_v3 }
 0x21a   :  { %4897 = vmatmul.mubr.msk.f32.gmra.mrb[6].mxu0 %vm1786_vm1, %v2557_v10 }
 0x21b   :  { %4899 = vmatprep.mubr.msk.f32.mxu0 %vm1786_vm1, %v2558_v51 }
 0x21e   :  { %4900 = vmatmul.mubr.msk.f32.gmra.mrb[8].mxu0 %vm1786_vm1, %v2559_v6  ;;  %v5119_v6 = vpack.c.bf16 %v3023_v38, %v3022_v4 }
 0x21f   :  { %4902 = vmatprep.mubr.msk.f32.mxu0 %vm1786_vm1, %v2560_v60 }
 0x222   :  { %4903 = vmatmul.mubr.msk.f32.gmra.mrb[10].mxu0 %vm1786_vm1, %v2561_v5 }
 0x2e1   :  { %v4889_v18 = vpop.f32.mrb[0].mxu0 }
 0x2e2   :  { %v2744_v41 = vadd.f32 %v4889_v18, %v6577_v50  ;;  %v2665_v40 = vpop.f32.mrb[1].mxu0  ;;  %v3133_v18 = vld [vmem:[%s6871_s5 + $0x68] sm:$0xff] }
 0x2e3   :  { %v2743_v39 = vadd.f32 %v6577_v50, %v2665_v40 }
 0x2e4   :  { %vm2756_vm1 = vcmp.ge.f32.partialorder %v2744_v41, 0.0  ;;  %v2768_v54 = vmul.f32 0.1, %v2744_v41 }
 0x2e5   :  { %vm2755_vm7 = vcmp.ge.f32.partialorder %v2743_v39, 0.0  ;;  %v2767_v8 = vmul.f32 0.1, %v2743_v39  ;;  %v4892_v58 = vpop.f32.mrb[2].mxu0 }
 0x2e6   :  { %v2780_v7 = vsel %vm2756_vm1, %v2744_v41, %v2768_v54  ;;  %v2746_v53 = vadd.f32 %v4892_v58, %v6577_v50  ;;  %v2675_v35 = vpop.f32.mrb[3].mxu0  ;;  %v3134_v54 = vld [vmem:[%s6871_s5 + $0x70] sm:$0xff] }
 0x2e7   :  { %2796 = vst.msk [vmem:[#allocation4 + $0x18] sm:$0xff] %vm2791_vm6, %v2780_v7  ;;  %v2779_v20 = vsel %vm2755_vm7, %v2743_v39, %v2767_v8  ;;  %v2745_v45 = vadd.f32 %v6577_v50, %v2675_v35  ;;  %v3135_v8 = vld [vmem:[%s6871_s5 + $0x78] sm:$0xff]  ;;  %v3242_v35 = vld [vmem:[%s6871_s5 + $0x80] sm:$0xff] }
 0x2e8   :  { %2795 = vst.msk [vmem:[#allocation4 + $0x10] sm:$0xff] %vm2791_vm6, %v2779_v20  ;;  %vm2758_vm8 = vcmp.ge.f32.partialorder %v2746_v53, 0.0  ;;  %v2770_v0 = vmul.f32 0.1, %v2746_v53  ;;  %v5131_v7 = vpack.c.bf16 %v3135_v8, %v3134_v54  ;;  %v3243_v20 = vld [vmem:[%s6871_s5 + $0x88] sm:$0xff] }
 0x2e9   :  { %vm2757_vm9 = vcmp.ge.f32.partialorder %v2745_v45, 0.0  ;;  %v2769_v56 = vmul.f32 0.1, %v2745_v45  ;;  %v4895_v57 = vpop.f32.mrb[4].mxu0  ;;  %v3738_v54 = vld [vmem:[%s6873_s7 + $0x88] sm:$0xff] }
 0x2ea   :  { %v2782_v17 = vsel %vm2758_vm8, %v2746_v53, %v2770_v0  ;;  %v2748_v33 = vadd.f32 %v4895_v57, %v6577_v50  ;;  %v2685_v9 = vpop.f32.mrb[5].mxu0  ;;  %v5135_v0 = vpack.c.bf16 %v3243_v20, %v3242_v35  ;;  %v3244_v57 = vld [vmem:[%s6871_s5 + $0x90] sm:$0xff]  ;;  %v3736_v20 = vld [vmem:[#allocation5 + $0x38] sm:$0xff] }
 0x2eb   :  { %2798 = vst.msk [vmem:[#allocation4 + $0x28] sm:$0xff] %vm2791_vm6, %v2782_v17  ;;  %v2781_v30 = vsel %vm2757_vm9, %v2745_v45, %v2769_v56  ;;  %v2747_v49 = vadd.f32 %v6577_v50, %v2685_v9  ;;  %v3245_v17 = vld [vmem:[%s6871_s5 + $0x98] sm:$0xff]  ;;  %vm5353_vm9 = vmmov 0  }
 0x2ec   :  { %2797 = vst.msk [vmem:[#allocation4 + $0x20] sm:$0xff] %vm2791_vm6, %v2781_v30  ;;  %vm2760_vm10 = vcmp.ge.f32.partialorder %v2748_v33, 0.0  ;;  %v2772_v63 = vmul.f32 0.1, %v2748_v33  ;;  %5091 = vmatprep.mubr.msk.f32.mxu0 %vm5353_vm9, %v5350_v19 }
 0x2ed   :  { %vm2759_vm11 = vcmp.ge.f32.partialorder %v2747_v49, 0.0  ;;  %v2771_v52 = vmul.f32 0.1, %v2747_v49  ;;  %v4898_v25 = vpop.f32.mrb[6].mxu0 }
 0x2ee   :  { %v2784_v32 = vsel %vm2760_vm10, %v2748_v33, %v2772_v63  ;;  %v2750_v29 = vadd.f32 %v4898_v25, %v6577_v50  ;;  %v2695_v62 = vpop.f32.mrb[7].mxu0  ;;  %v5139_v33 = vpack.c.bf16 %v3245_v17, %v3244_v57  ;;  %v3390_v63 = vld [vmem:[%s6873_s7 + $0x28] sm:$0xff]  ;;  %v3391_v25 = vld [vmem:[%s6873_s7 + $0x30] sm:$0xff]  ;;  %v3859_v17 = vld [vmem:[%s6875_s9 + $0x38] sm:$0xff] }
 0x2ef   :  { %2800 = vst.msk [vmem:[#allocation4 + $0x38] sm:$0xff] %vm2791_vm6, %v2784_v32  ;;  %v2783_v28 = vsel %vm2759_vm11, %v2747_v49, %v2771_v52  ;;  %v2749_v31 = vadd.f32 %v6577_v50, %v2695_v62  ;;  %v3018_v58 = vld [vmem:[#allocation4 + $0x10] sm:$0xff]  ;;  %v3392_v32 = vld [vmem:[%s6873_s7 + $0x38] sm:$0xff]  ;;  %v3858_v57 = vld [vmem:[%s6875_s9 + $0x30] sm:$0xff] }
 0x2f0   :  { %2799 = vst.msk [vmem:[#allocation4 + $0x30] sm:$0xff] %vm2791_vm6, %v2783_v28  ;;  %vm2762_vm12 = vcmp.ge.f32.partialorder %v2750_v29, 0.0  ;;  %v2774_v44 = vmul.f32 0.1, %v2750_v29  ;;  %v3389_v49 = vld [vmem:[%s6873_s7 + $0x20] sm:$0xff]  ;;  %v5147_v62 = vpack.c.bf16 %v3392_v32, %v3391_v25 }
 0x2f1   :  { %vm2761_vm13 = vcmp.ge.f32.partialorder %v2749_v31, 0.0  ;;  %v2773_v36 = vmul.f32 0.1, %v2749_v31  ;;  %v4901_v23 = vpop.f32.mrb[8].mxu0  ;;  %v5143_v52 = vpack.c.bf16 %v3390_v63, %v3389_v49  ;;  %v3382_v28 = vld [vmem:[%s6873_s7] sm:$0xff]  ;;  %v3850_v49 = vld [vmem:[%s6875_s9 + $0x8] sm:$0xff] }
 0x2f2   :  { %v2786_v12 = vsel %vm2762_vm12, %v2750_v29, %v2774_v44  ;;  %v2752_v22 = vadd.f32 %v4901_v23, %v6577_v50  ;;  %v2705_v37 = vpop.f32.mrb[9].mxu0  ;;  %v3019_v53 = vld [vmem:[#allocation4 + $0x28] sm:$0xff]  ;;  %v3387_v29 = vld [vmem:[#allocation5 + $0x8] sm:$0xff]  ;;  %v6774_v32 = vld [vmem:[%s6877_s11] sm:$0x1] }
 0x2f3   :  { %2802 = vst.msk [vmem:[#allocation4 + $0x48] sm:$0xff] %vm2791_vm6, %v2786_v12  ;;  %v2785_v43 = vsel %vm2761_vm13, %v2749_v31, %v2773_v36  ;;  %v2751_v2 = vadd.f32 %v6577_v50, %v2705_v37  ;;  %v6602_v42 = vld [vmem:[#allocation4 + $0x20] sm:$0xff]  ;;  %v3383_v31 = vld [vmem:[%s6873_s7 + $0x8] sm:$0xff]  ;;  %vm5225_vm12 = vmpackc.low %vm2791_vm6, %vm2791_vm6  ;;  %vm4498_vm13 = vcmask 188416  }
 0x2f4   :  { %2801 = vst.msk [vmem:[#allocation4 + $0x40] sm:$0xff] %vm2791_vm6, %v2785_v43  ;;  %vm2764_vm14 = vcmp.ge.f32.partialorder %v2752_v22, 0.0  ;;  %v2776_v48 = vmul.f32 0.1, %v2752_v22  ;;  %4914 = vmatmul.mubr.msk.f32.vlgmr.msra.gmra.mrb[0].mxu1 %vm2791_vm6, %v6602_v42  ;;  %v5151_v24 = vpack.c.bf16 %v3383_v31, %v3382_v28  ;;  %v4612_v28 = vld [vmem:[%s6874_s8] ss:$0 sm:$0xff] }
 0x2f5   :  { %vm2763_vm15 = vcmp.ge.f32.partialorder %v2751_v2, 0.0  ;;  %v2775_v61 = vmul.f32 0.1, %v2751_v2  ;;  %v4904_v16 = vpop.f32.mrb[10].mxu0  ;;  %5114 = vmatpush3.bf16.msra.mxu1 %v6571_v59  ;;  %v2808_v59 = vld [vmem:[#allocation4 + $0x18] sm:$0xff] }
 0x2f6   :  { %v2788_v15 = vsel %vm2764_vm14, %v2752_v22, %v2776_v48  ;;  %v2754_v3 = vadd.f32 %v4904_v16, %v6577_v50  ;;  %v2715_v10 = vpop.f32.mrb[11].mxu0  ;;  %v6615_v51 = vld [vmem:[#allocation4 + $0x38] sm:$0xff]  ;;  %5116 = vmatprep.subr.bf16.mxu1 %v5115_v11 }
 0x2f7   :  { %2804 = vst.msk [vmem:[#allocation4 + $0x58] sm:$0xff] %vm2791_vm6, %v2788_v15  ;;  %v2787_v60 = vsel %vm2763_vm15, %v2751_v2, %v2775_v61  ;;  %v2753_v5 = vadd.f32 %v6577_v50, %v2715_v10  ;;  %4916 = vmatprep.mubr.msk.f32.mxu1 %vm2791_vm6, %v6615_v51  ;;  %v3132_v50 = vld [vmem:[%s6871_s5 + $0x60] sm:$0xff]  ;;  %v3385_v10 = vld [vmem:[%s6873_s7 + $0x18] sm:$0xff] }
 0x2f8   :  { %2803 = vst.msk [vmem:[#allocation4 + $0x50] sm:$0xff] %vm2791_vm6, %v2787_v60  ;;  %vm2766_vm0 = vcmp.ge.f32.partialorder %v2754_v3, 0.0  ;;  %v2778_v34 = vmul.f32 0.1, %v2754_v3  ;;  %v2809_v41 = vld [vmem:[#allocation4 + $0x30] sm:$0xff]  ;;  %v5127_v40 = vpack.c.bf16 %v3133_v18, %v3132_v50  ;;  %v3649_v50 = vld [vmem:[%s6873_s7 + $0x70] sm:$0xff] }
 0x2f9   :  { %vm2765_vm2 = vcmp.ge.f32.partialorder %v2753_v5, 0.0  ;;  %v2777_v55 = vmul.f32 0.1, %v2753_v5  ;;  %5118 = vmatpush3.bf16.msra.mxu1 %v5115_v11  ;;  %v3650_v18 = vld [vmem:[%s6873_s7 + $0x78] sm:$0xff] }
 0x2fa   :  { %v2790_v26 = vsel %vm2766_vm0, %v2754_v3, %v2778_v34  ;;  %5120 = vmatprep.subr.bf16.mxu1 %v5119_v6  ;;  %v2810_v39 = vld [vmem:[#allocation4 + $0x48] sm:$0xff]  ;;  %v3384_v3 = vld [vmem:[%s6873_s7 + $0x10] sm:$0xff]  ;;  %v3558_v34 = vld [vmem:[%s6873_s7 + $0x48] sm:$0xff] }
 0x2fb   :  { %2806 = vst.msk [vmem:[#allocation4 + $0x68] sm:$0xff] %vm2791_vm6, %v2790_v26  ;;  %v2789_v46 = vsel %vm2765_vm2, %v2753_v5, %v2777_v55  ;;  %v3020_v45 = vld [vmem:[#allocation4 + $0x40] sm:$0xff]  ;;  %v3557_v5 = vld [vmem:[%s6873_s7 + $0x40] sm:$0xff] }
 0x2fc   :  { %2805 = vst.msk [vmem:[#allocation4 + $0x60] sm:$0xff] %vm2791_vm6, %v2789_v46  ;;  %v5159_v55 = vpack.c.bf16 %v3558_v34, %v3557_v5  ;;  %v3559_v26 = vld [vmem:[%s6873_s7 + $0x50] sm:$0xff]  ;;  %v3560_v46 = vld [vmem:[%s6873_s7 + $0x58] sm:$0xff] }
 0x2fe   :  { %v3021_v56 = vld [vmem:[#allocation4 + $0x58] sm:$0xff] }
 0x2ff   :  { %v2819_v47 = vld [vmem:[#allocation4 + $0x50] sm:$0xff] }
 0x300   :  { %4917 = vmatmul.mubr.msk.f32.gmra.mrb[2].mxu1 %vm2791_vm6, %v2819_v47 }
 0x301   :  { %4927 = vmatprep.mubr.msk.f32.mxu1 %vm2791_vm6, %v2807_v27  ;;  %v5163_v27 = vpack.c.bf16 %v3560_v46, %v3559_v26  ;;  %v4204_v26 = vld [vmem:[%s6875_s9 + $0x88] sm:$0xff] }
 0x302   :  { %v3241_v30 = vld [vmem:[#allocation4 + $0x68] sm:$0xff] }
 0x303   :  { %v3131_v9 = vld [vmem:[#allocation4 + $0x60] sm:$0xff] }
 0x304   :  { %4928 = vmatmul.mubr.msk.f32.vlgmr.msra.gmra.mrb[0].mxu1 %vm2791_vm6, %v2808_v59 }
 0x305   :  { %4930 = vmatprep.mubr.msk.f32.mxu1 %vm2791_vm6, %v2809_v41  ;;  %5122 = vmatpush3.bf16.msra.mxu1 %v5119_v6  ;;  %v3380_v6 = vld [vmem:[#allocation5] sm:$0xff] }
 0x306   :  { %5124 = vmatprep.subr.bf16.mxu1 %v5123_v14 }
 0x308   :  { %4931 = vmatmul.mubr.msk.f32.gmra.mrb[2].mxu1 %vm2791_vm6, %v2810_v39 }
 0x309   :  { %5126 = vmatpush3.bf16.msra.mxu1 %v5123_v14  ;;  %4941 = vmatprep.mubr.msk.f32.mxu1 %vm2791_vm6, %v3018_v58  ;;  %v3739_v58 = vld [vmem:[%s6873_s7 + $0x90] sm:$0xff] }
 0x30a   :  { %5128 = vmatprep.subr.bf16.mxu1 %v5127_v40 }
 0x30c   :  { %4942 = vmatmul.mubr.msk.f32.vlgmr.msra.gmra.mrb[0].mxu1 %vm2791_vm6, %v3019_v53  ;;  %v3646_v53 = vld [vmem:[#allocation5 + $0x30] sm:$0xff] }
 0x30d   :  { %4944 = vmatprep.mubr.msk.f32.mxu1 %vm2791_vm6, %v3020_v45  ;;  %5130 = vmatpush3.bf16.msra.mxu1 %v5127_v40  ;;  %v3856_v45 = vld [vmem:[%s6875_s9 + $0x20] sm:$0xff] }
 0x30e   :  { %5132 = vmatprep.subr.bf16.mxu1 %v5131_v7 }
 0x310   :  { %4945 = vmatmul.mubr.msk.f32.gmra.mrb[2].mxu1 %vm2791_vm6, %v3021_v56 }
 0x311   :  { %5134 = vmatpush3.bf16.msra.mxu1 %v5131_v7  ;;  %4955 = vmatprep.mubr.msk.f32.mxu1 %vm2791_vm6, %v2808_v59  ;;  %v5167_v59 = vpack.c.bf16 %v3648_v13, %v3647_v21  ;;  %v3740_v7 = vld [vmem:[%s6873_s7 + $0x98] sm:$0xff]  ;;  %v4113_v21 = vld [vmem:[#allocation6 + $0x20] sm:$0xff] }
 0x312   :  { %5136 = vmatprep.subr.bf16.mxu1 %v5135_v0  ;;  %v5179_v35 = vpack.c.bf16 %v3740_v7, %v3739_v58 }
 0x314   :  { %4956 = vmatmul.mubr.msk.f32.vlgmr.msra.gmra.mrb[0].mxu1 %vm2791_vm6, %v2809_v41  ;;  %v5171_v41 = vpack.c.bf16 %v3650_v18, %v3649_v50  ;;  %v4623_v50 = vld [vmem:[%s6876_s10] ss:$0 sm:$0xff]  ;;  %s5354_s10 = smov [#allocation9]  }
 0x315   :  { %4958 = vmatprep.mubr.msk.f32.mxu1 %vm2791_vm6, %v2810_v39  ;;  %5138 = vmatpush3.bf16.msra.mxu1 %v5135_v0  ;;  %v3737_v39 = vld [vmem:[%s6873_s7 + $0x80] sm:$0xff]  ;;  %v3857_v0 = vld [vmem:[%s6875_s9 + $0x28] sm:$0xff]  ;;  %s4506_s28 = sshll.u32 %s5354_s10, 4  ;;  %s4507_s28 = int_to_ptr.vmem [resolvable:$true] %s4506_s28 }
 0x316   :  { %5140 = vmatprep.subr.bf16.mxu1 %v5139_v33  ;;  %v5175_v8 = vpack.c.bf16 %v3738_v54, %v3737_v39  ;;  %v5183_v56 = vpack.c.bf16 %v3857_v0, %v3856_v45  ;;  %s5325_s0 = scalar_lea.vmem %s4507_s28, 16  ;;  %s5329_s8 = scalar_lea.vmem %s4507_s28, 32 }
 0x317   :  { %p5326_p0 = scmp.ne.s32.totalorder %s4507_s28, %s5325_s0  ;;  %p5330_p1 = scmp.lt.s32.totalorder %s4507_s28, %s4507_s28 }
 0x318   :  { %4959 = vmatmul.mubr.msk.f32.gmra.mrb[2].mxu1 %vm2791_vm6, %v3131_v9  ;;  %v5187_v9 = vpack.c.bf16 %v3859_v17, %v3858_v57  ;;  %v4491_v17 = vpop.permute.xlu1 %4490  ;;  %p5331_p2 = scmp.lt.s32.totalorder %s5329_s8, %s5325_s0 }
 0x319   :  { %5142 = vmatpush3.bf16.msra.mxu1 %v5139_v33  ;;  %4969 = vmatprep.mubr.msk.f32.mxu1 %vm2791_vm6, %v6602_v42  ;;  %v3854_v33 = vld [vmem:[#allocation6 + $0x8] sm:$0xff] }
 0x31a   :  { %5144 = vmatprep.subr.bf16.mxu1 %v5143_v52  ;;  %p5332_p3 = por %p5331_p2, %p5330_p1 }
 0x31c   :  { %4970 = vmatmul.mubr.msk.f32.vlgmr.msra.gmra.mrb[0].mxu1 %vm2791_vm6, %v6615_v51  ;;  %v5155_v51 = vpack.c.bf16 %v3385_v10, %v3384_v3  ;;  %v4114_v3 = vld [vmem:[%s6875_s9 + $0x60] sm:$0xff]  ;;  %v4115_v10 = vld [vmem:[%s6875_s9 + $0x68] sm:$0xff]  ;;  %p5333_p4 = pnand %p5332_p3, %p5326_p0 }
 0x31d   :  { %4972 = vmatprep.mubr.msk.f32.mxu1 %vm2791_vm6, %v2819_v47  ;;  %5146 = vmatpush3.bf16.msra.mxu1 %v5143_v52  ;;  %v4319_v52 = vlaneseq }
 0x31e   :  { %5148 = vmatprep.subr.bf16.mxu1 %v5147_v62 }
 0x31f   :  { %v6769_v25 = vshrl.u32 %v4319_v52, 7 }
 0x320   :  { %4973 = vmatmul.mubr.msk.f32.gmra.mrb[2].mxu1 %vm2791_vm6, %v3241_v30  ;;  %v3849_v30 = vld [vmem:[%s6875_s9] sm:$0xff] }
 0x321   :  { %4983 = vmatprep.mubr.msk.f32.mxu1 %vm2791_vm6, %v3387_v29  ;;  %5150 = vmatpush3.bf16.msra.mxu1 %v5147_v62  ;;  %v5191_v63 = vpack.c.bf16 %v3850_v49, %v3849_v30  ;;  %v4321_v29 = vsub.s32 0, %v6769_v25 }
 0x322   :  { %5152 = vmatprep.subr.bf16.mxu1 %v5151_v24 }
 0x323   :  { %v4322_v62 = vrot.slane %v6774_v32, %v4321_v29  ;;  %v4496_v30 = vrot.slane %v4491_v17, %v4321_v29 }
 0x325   :  { %4323 = vrot.lane.b32.xlu0 %v4322_v62, %s5351_s3 }
 0x397   :  { %v4324_v57 = vpop.permute.xlu0 %4323 }
 0x3ef   :  { %v4971_v44 = vpop.f32.mrb[0].mxu1 }
 0x3f0   :  { %v3355_v36 = vadd.f32 %v4971_v44, %v4601_v1  ;;  %v3324_v23 = vpop.f32.mrb[1].mxu1 }
 0x3f1   :  { %v3354_v12 = vadd.f32 %v4601_v1, %v3324_v23 }
 0x3f2   :  { %vm3359_vm3 = vcmp.ge.f32.partialorder %v3355_v36, 0.0  ;;  %v3363_v22 = vmul.f32 0.1, %v3355_v36 }
 0x3f3   :  { %vm3358_vm4 = vcmp.ge.f32.partialorder %v3354_v12, 0.0  ;;  %v3362_v37 = vmul.f32 0.1, %v3354_v12  ;;  %v4974_v11 = vpop.f32.mrb[2].mxu1 }
 0x3f4   :  { %v3367_v43 = vsel %vm3359_vm3, %v3355_v36, %v3363_v22  ;;  %v3357_v2 = vadd.f32 %v4974_v11, %v4601_v1  ;;  %v3334_v42 = vpop.f32.mrb[3].mxu1  ;;  %v3852_v11 = vld [vmem:[%s6875_s9 + $0x18] sm:$0xff] }
 0x3f5   :  { %3377 = vst.msk [vmem:[#allocation5 + $0x18] sm:$0xff] %vm2791_vm6, %v3367_v43  ;;  %v3366_v4 = vsel %vm3358_vm4, %v3354_v12, %v3362_v37  ;;  %v3356_v38 = vadd.f32 %v4601_v1, %v3334_v42  ;;  %v3851_v37 = vld [vmem:[%s6875_s9 + $0x10] sm:$0xff] }
 0x3f6   :  { %3376 = vst.msk [vmem:[#allocation5 + $0x10] sm:$0xff] %vm2791_vm6, %v3366_v4  ;;  %vm3361_vm5 = vcmp.ge.f32.partialorder %v3357_v2, 0.0  ;;  %v3365_v48 = vmul.f32 0.1, %v3357_v2  ;;  %v5195_v43 = vpack.c.bf16 %v3852_v11, %v3851_v37  ;;  %v4024_v4 = vld [vmem:[%s6875_s9 + $0x40] sm:$0xff] }
 0x3f7   :  { %vm3360_vm1 = vcmp.ge.f32.partialorder %v3356_v38, 0.0  ;;  %v3364_v61 = vmul.f32 0.1, %v3356_v38 }
 0x3f8   :  { %v3369_v16 = vsel %vm3361_vm5, %v3357_v2, %v3365_v48  ;;  %v3847_v2 = vld [vmem:[#allocation6] sm:$0xff] }
 0x3f9   :  { %3379 = vst.msk [vmem:[#allocation5 + $0x28] sm:$0xff] %vm2791_vm6, %v3369_v16  ;;  %v3368_v15 = vsel %vm3360_vm1, %v3356_v38, %v3364_v61  ;;  %v4025_v38 = vld [vmem:[%s6875_s9 + $0x48] sm:$0xff]  ;;  %v4026_v61 = vld [vmem:[%s6875_s9 + $0x50] sm:$0xff]  ;;  %v4027_v16 = vld [vmem:[%s6875_s9 + $0x58] sm:$0xff] }
 0x3fa   :  { %3378 = vst.msk [vmem:[#allocation5 + $0x20] sm:$0xff] %vm2791_vm6, %v3368_v15  ;;  %v5199_v48 = vpack.c.bf16 %v4025_v38, %v4024_v4  ;;  %v5203_v15 = vpack.c.bf16 %v4027_v16, %v4026_v61 }
 0x3fc   :  { %v3381_v47 = vld [vmem:[#allocation5 + $0x18] sm:$0xff] }
 0x3fd   :  { %v3555_v14 = vld [vmem:[#allocation5 + $0x10] sm:$0xff] }
 0x400   :  { %v3556_v40 = vld [vmem:[#allocation5 + $0x28] sm:$0xff] }
 0x401   :  { %v3388_v60 = vld [vmem:[#allocation5 + $0x20] sm:$0xff] }
 0x402   :  { %4984 = vmatmul.mubr.msk.f32.vlgmr.msra.gmra.mrb[4].mxu1 %vm2791_vm6, %v3388_v60 }
 0x403   :  { %5154 = vmatpush3.bf16.msra.mxu1 %v5151_v24  ;;  %4994 = vmatprep.mubr.msk.f32.mxu1 %vm2791_vm6, %v3380_v6  ;;  %v4116_v6 = vld [vmem:[%s6875_s9 + $0x70] sm:$0xff] }
 0x404   :  { %5156 = vmatprep.subr.bf16.mxu1 %v5155_v51 }
 0x407   :  { %5158 = vmatpush3.bf16.msra.mxu1 %v5155_v51  ;;  %v5207_v51 = vpack.c.bf16 %v4115_v10, %v4114_v3 }
 0x408   :  { %5160 = vmatprep.subr.bf16.mxu1 %v5159_v55 }
 0x40a   :  { %4995 = vmatmul.mubr.msk.f32.vlgmr.msra.gmra.mrb[4].mxu1 %vm2791_vm6, %v3381_v47 }
 0x40b   :  { %5162 = vmatpush3.bf16.msra.mxu1 %v5159_v55  ;;  %5005 = vmatprep.mubr.msk.f32.mxu1 %vm2791_vm6, %v3555_v14  ;;  %v4203_v55 = vld [vmem:[%s6875_s9 + $0x80] sm:$0xff]  ;;  %v4202_v14 = vld [vmem:[#allocation6 + $0x28] sm:$0xff] }
 0x40c   :  { %5164 = vmatprep.subr.bf16.mxu1 %v5163_v27  ;;  %v5215_v46 = vpack.c.bf16 %v4204_v26, %v4203_v55 }
 0x40f   :  { %5166 = vmatpush3.bf16.msra.mxu1 %v5163_v27  ;;  %v4205_v27 = vld [vmem:[%s6875_s9 + $0x90] sm:$0xff] }
 0x410   :  { %5168 = vmatprep.subr.bf16.mxu1 %v5167_v59 }
 0x412   :  { %5006 = vmatmul.mubr.msk.f32.vlgmr.msra.gmra.mrb[4].mxu1 %vm2791_vm6, %v3556_v40 }
 0x413   :  { %5170 = vmatpush3.bf16.msra.mxu1 %v5167_v59  ;;  %5016 = vmatprep.mubr.msk.f32.mxu1 %vm2791_vm6, %v3381_v47  ;;  %v4206_v47 = vld [vmem:[%s6875_s9 + $0x98] sm:$0xff]  ;;  %v5352_v59 = vmov 0.0|0.0  }
 0x414   :  { %5172 = vmatprep.subr.bf16.mxu1 %v5171_v41  ;;  %v5219_v13 = vpack.c.bf16 %v4206_v47, %v4205_v27  ;;  %5223 = vmatprep.subr.bf16.mxu0 %v5352_v59 }
 0x417   :  { %5174 = vmatpush3.bf16.msra.mxu1 %v5171_v41 }
 0x418   :  { %5176 = vmatprep.subr.bf16.mxu1 %v5175_v8 }
 0x41a   :  { %5017 = vmatmul.mubr.msk.f32.vlgmr.msra.gmra.mrb[4].mxu1 %vm2791_vm6, %v3646_v53  ;;  %v4312_v53 = vld [vmem:[#allocation7] sm:$0xff] }
 0x41b   :  { %5178 = vmatpush3.bf16.msra.mxu1 %v5175_v8  ;;  %5027 = vmatprep.mubr.msk.f32.mxu1 %vm2791_vm6, %v3388_v60  ;;  %v4117_v60 = vld [vmem:[%s6875_s9 + $0x78] sm:$0xff] }
 0x41c   :  { %5180 = vmatprep.subr.bf16.mxu1 %v5179_v35  ;;  %v5211_v5 = vpack.c.bf16 %v4117_v60, %v4116_v6 }
 0x41f   :  { %5182 = vmatpush3.bf16.msra.mxu1 %v5179_v35 }
 0x420   :  { %5184 = vmatprep.subr.bf16.mxu1 %v5183_v56 }
 0x422   :  { %5028 = vmatmul.mubr.msk.f32.vlgmr.msra.gmra.mrb[4].mxu1 %vm2791_vm6, %v3736_v20 }
 0x423   :  { %5186 = vmatpush3.bf16.msra.mxu1 %v5183_v56  ;;  %5038 = vmatprep.mubr.msk.f32.mxu1 %vm2791_vm6, %v3854_v33  ;;  %v4317_v56 = vld [vmem:[#allocation7 + $0x18] sm:$0xff] }
 0x424   :  { %5188 = vmatprep.subr.bf16.mxu1 %v5187_v9 }
 0x427   :  { %5190 = vmatpush3.bf16.msra.mxu1 %v5187_v9 }
 0x428   :  { %5192 = vmatprep.subr.bf16.mxu1 %v5191_v63 }
 0x4f5   :  { %v5029_v31 = vpop.f32.mrb[4].mxu1 }
 0x4f6   :  { %v3832_v24 = vadd.f32 %v5029_v31, %v4612_v28  ;;  %v3813_v1 = vpop.f32.mrb[5].mxu1 }
 0x4f7   :  { %v3831_v44 = vadd.f32 %v4612_v28, %v3813_v1 }
 0x4f8   :  { %vm3834_vm7 = vcmp.ge.f32.partialorder %v3832_v24, 0.0  ;;  %v3836_v36 = vmul.f32 0.1, %v3832_v24 }
 0x4f9   :  { %vm3833_vm8 = vcmp.ge.f32.partialorder %v3831_v44, 0.0  ;;  %v3835_v23 = vmul.f32 0.1, %v3831_v44 }
 0x4fa   :  { %v3838_v12 = vsel %vm3834_vm7, %v3832_v24, %v3836_v36 }
 0x4fb   :  { %3846 = vst.msk [vmem:[#allocation6 + $0x18] sm:$0xff] %vm2791_vm6, %v3838_v12  ;;  %v3837_v22 = vsel %vm3833_vm8, %v3831_v44, %v3835_v23 }
 0x4fc   :  { %3845 = vst.msk [vmem:[#allocation6 + $0x10] sm:$0xff] %vm2791_vm6, %v3837_v22 }
 0x502   :  { %v4023_v34 = vld [vmem:[#allocation6 + $0x18] sm:$0xff] }
 0x503   :  { %v3855_v42 = vld [vmem:[#allocation6 + $0x10] sm:$0xff] }
 0x504   :  { %5039 = vmatmul.mubr.msk.f32.vlgmr.msra.gmra.mrb[6].mxu1 %vm2791_vm6, %v3855_v42 }
 0x505   :  { %5194 = vmatpush3.bf16.msra.mxu1 %v5191_v63  ;;  %5049 = vmatprep.mubr.msk.f32.mxu1 %vm2791_vm6, %v3847_v2 }
 0x506   :  { %5196 = vmatprep.subr.bf16.mxu1 %v5195_v43 }
 0x509   :  { %5198 = vmatpush3.bf16.msra.mxu1 %v5195_v43 }
 0x50a   :  { %5200 = vmatprep.subr.bf16.mxu1 %v5199_v48 }
 0x50c   :  { %5050 = vmatmul.mubr.msk.f32.vlgmr.msra.gmra.mrb[6].mxu1 %vm2791_vm6, %v3854_v33 }
 0x50d   :  { %5202 = vmatpush3.bf16.msra.mxu1 %v5199_v48  ;;  %5060 = vmatprep.mubr.msk.f32.mxu1 %vm2791_vm6, %v3855_v42 }
 0x50e   :  { %5204 = vmatprep.subr.bf16.mxu1 %v5203_v15 }
 0x511   :  { %5206 = vmatpush3.bf16.msra.mxu1 %v5203_v15 }
 0x512   :  { %5208 = vmatprep.subr.bf16.mxu1 %v5207_v51 }
 0x514   :  { %5061 = vmatmul.mubr.msk.f32.vlgmr.msra.gmra.mrb[6].mxu1 %vm2791_vm6, %v4023_v34 }
 0x515   :  { %5210 = vmatpush3.bf16.msra.mxu1 %v5207_v51  ;;  %5071 = vmatprep.mubr.msk.f32.mxu1 %vm2791_vm6, %v4023_v34 }
 0x516   :  { %5212 = vmatprep.subr.bf16.mxu1 %v5211_v5 }
 0x519   :  { %5214 = vmatpush3.bf16.msra.mxu1 %v5211_v5 }
 0x51a   :  { %5216 = vmatprep.subr.bf16.mxu1 %v5215_v46 }
 0x51c   :  { %5072 = vmatmul.mubr.msk.f32.vlgmr.msra.gmra.mrb[6].mxu1 %vm2791_vm6, %v4113_v21 }
 0x51d   :  { %5218 = vmatpush3.bf16.msra.mxu1 %v5215_v46  ;;  %5082 = vmatprep.mubr.msk.f32.mxu1 %vm2791_vm6, %v4113_v21 }
 0x51e   :  { %5220 = vmatprep.subr.bf16.mxu1 %v5219_v13 }
 0x521   :  { %5222 = vmatpush3.bf16.msra.mxu1 %v5219_v13 }
 0x522   :  { %5227 = vmatprep.subr.bf16.mxu1 %v5352_v59 }
 0x524   :  { %5083 = vmatmul.mubr.msk.f32.vlgmr.msra.gmra.mrb[6].mxu1 %vm2791_vm6, %v4202_v14 }
 0x525   :  { %5100 = vmatprep.mubr.msk.f32.mxu1 %vm5353_vm9, %v5350_v19 }
 0x5f7   :  { %v5084_v18 = vpop.f32.mrb[6].mxu1 }
 0x5f8   :  { %v4298_v41 = vadd.f32 %v5084_v18, %v4623_v50  ;;  %v4279_v40 = vpop.f32.mrb[7].mxu1 }
 0x5f9   :  { %v4297_v39 = vadd.f32 %v4623_v50, %v4279_v40 }
 0x5fa   :  { %vm4300_vm10 = vcmp.ge.f32.partialorder %v4298_v41, 0.0  ;;  %v4302_v54 = vmul.f32 0.1, %v4298_v41 }
 0x5fb   :  { %vm4299_vm11 = vcmp.ge.f32.partialorder %v4297_v39, 0.0  ;;  %v4301_v8 = vmul.f32 0.1, %v4297_v39 }
 0x5fc   :  { %v4304_v58 = vsel %vm4300_vm10, %v4298_v41, %v4302_v54 }
 0x5fd   :  { %4310 = vst.msk [vmem:[#allocation7 + $0x10] sm:$0xff] %vm2791_vm6, %v4304_v58  ;;  %v4303_v7 = vsel %vm4299_vm11, %v4297_v39, %v4301_v8 }
 0x5fe   :  { %4309 = vst.msk [vmem:[#allocation7 + $0x8] sm:$0xff] %vm2791_vm6, %v4303_v7 }
 0x604   :  { %v4316_v35 = vld [vmem:[#allocation7 + $0x10] sm:$0xff] }
 0x605   :  { %v4315_v20 = vld [vmem:[#allocation7 + $0x8] sm:$0xff] }
 0x606   :  { %v5224_v45 = vpack.c.bf16 %v4316_v35, %v4315_v20  ;;  %v5228_v0 = vpack.c.bf16 %v4315_v20, %v4312_v53 }
 0x608   :  { %5226 = vmatpush3.bf16.xpose.msk.msra.mxu0 %vm5225_vm12, %v5224_v45  ;;  %5230 = vmatpush3.bf16.xpose.msk.msra.mxu1 %vm5225_vm12, %v5228_v0 }
 0x609   :  { %5089 = vmatprep.subr.mxu0 %v5350_v19  ;;  %5098 = vmatprep.subr.mxu1 %v5350_v19 }
 0x610   :  { %5090 = vmatpush3.xpose.msk.msra.mxu0 %vm2791_vm6, %v4317_v56  ;;  %5099 = vmatpush3.xpose.msk.msra.mxu1 %vm2791_vm6, %v4316_v35 }
 0x613   :  { %5092 = vmatmul.mubr.msk.f32.vlgmr.msra.gmra.mrb[12].mxu0 %vm2791_vm6, %v4324_v57  ;;  %5101 = vmatmul.mubr.msk.f32.vlgmr.msra.gmra.mrb[8].mxu1 %vm2791_vm6, %v6774_v32 }
 0x6e6   :  { %v4402_v33 = vpop.f32.mrb[12].mxu0  ;;  %v4483_v9 = vpop.f32.mrb[8].mxu1 }
 0x6e7   :  { %v4484_v19 = vadd.f32 %v4483_v9, %v4402_v33  ;;  %v5093_v49 = vpop.f32.mrb[13].mxu0  ;;  %v5102_v63 = vpop.f32.mrb[9].mxu1 }
 0x6e9   :  { %v4497_v52 = vadd.f32 %v4496_v30, %v4484_v19 }
 0x6eb   :  { %4499 = vst.msk [vmem:[#allocation9] sm:$0x1] %vm4498_vm13, %v4497_v52 }
 0x6ec   :  { %5336 = shalt.err (!%p5333_p4)
}
 0x6ed   :  { %s5337_s14 = scalar_lea.hbm %s6879_s13, 16 }
 0x6ee   :  { %p5338_p5 = scmp.ne.s32.totalorder %s6879_s13, %s5337_s14  ;;  %p5341_p6 = scmp.lt.u32.totalorder %s5337_s14, %s6879_s13 }
 0x6f0   :  { %p5343_p7 = pnand %p5341_p6, %p5338_p5 }
 0x6f2   :  { %5346 = shalt.err (!%p5343_p7)
}
 0x6f3   :  { %4509 = dma.vmem_to_hbm [thread:$0]  %s4507_s28, 16, %s6879_s13, [#allocation10]  }
 0x6f4   :  { %5347 = dma.done.wait [#allocation10], 16  }
 0x6f5   :  { %5348 = vsyncadd [#allocation10], 4294967280 }
 0x6f6   :  { %4513 = vsyncpa [#allocation10], 1 }

</bundles_post_ra>
